<compile_context>
chip_gen: v7x
topology: tpu7x:2x2x1
jax: 0.10.0
libtpu: 0.0.40
codegen_flags: <defaults>
</compile_context>

<pallas_src>
import jax
import jax.numpy as jnp
from jax.experimental import pallas as pl
from jax.experimental.pallas import tpu as pltpu


def _dot(a, b):
    return jnp.dot(a, b, preferred_element_type=jnp.float32)


def _gate_slices(ref, layer=None):
    """Per-gate (r, z, n) weight/bias tiles from a gate-stacked ref."""
    if layer is None:
        return ref[0], ref[1], ref[2]
    return ref[layer, 0], ref[layer, 1], ref[layer, 2]


def _gru_cell(x, h, wx, wh, bx, bh):
    """PyTorch nn.GRUCell semantics (gates r, z, n).

    wx/wh are 3-tuples of pre-transposed (in, H) / (H, H) weights, bx/bh are
    3-tuples of (1, H) biases, so every gate matmul output starts at lane 0.
    """
    r = jax.nn.sigmoid(_dot(x, wx[0]) + bx[0] + _dot(h, wh[0]) + bh[0])
    z = jax.nn.sigmoid(_dot(x, wx[1]) + bx[1] + _dot(h, wh[1]) + bh[1])
    n = jnp.tanh(_dot(x, wx[2]) + bx[2] + r * (_dot(h, wh[2]) + bh[2]))
    return (1.0 - z) * n + z * h


def attn_decoder_kernel(
    # inputs
    x_ref, ah0_ref, dh0_ref, enc_ref,
    a_wx_ref, a_wh_ref, a_bx_ref, a_bh_ref,
    w1t_ref, w2t_ref, v_ref,
    comb_wt_ref, comb_b_ref,
    d_wx_ref, d_wh_ref, d_bx_ref, d_bh_ref,
    out_wt_ref, out_b_ref,
    # outputs
    out_ref, ah_out_ref, dh_out_ref, a_out_ref,
    # scratch
    ah_s, dh_s, ew1_s,
):
    B, T, H = enc_ref.shape
    L = dh_s.shape[0]
    step = pl.program_id(0)
    last = pl.num_programs(0) - 1

    # Step 0: load initial hidden states into the VMEM carry and precompute the
    # step-invariant W1 . encoder_outputs term (single flat matmul, reused by
    # every later step).
    @pl.when(step == 0)
    def _():
        ah_s[...] = ah0_ref[...]
        dh_s[...] = dh0_ref[...]
        ew1_s[...] = _dot(enc_ref[...].reshape(B * T, H),
                          w1t_ref[...]).reshape(B, T, H)

    # ---- attention GRU cell ----
    ah = _gru_cell(x_ref[...], ah_s[...],
                   _gate_slices(a_wx_ref), _gate_slices(a_wh_ref),
                   _gate_slices(a_bx_ref), _gate_slices(a_bh_ref))
    ah_s[...] = ah
    attn_output = jnp.maximum(ah, 0.0)                        # relu

    # ---- additive (Bahdanau) attention: v^T tanh(W1 e_t + W2 d_t) ----
    enc = enc_ref[...]                                        # (B, T, H)
    aw2 = _dot(attn_output, w2t_ref[...])                     # (B, H)
    m = jnp.tanh(ew1_s[...] + aw2[:, None, :])                # (B, T, H)
    u = jnp.sum(m * v_ref[...][None, :, :], axis=-1)          # (B, T)

    # softmax over time -> attention weights a
    u_max = jnp.max(u, axis=-1, keepdims=True)
    e = jnp.exp(u - u_max)
    a = e * pl.reciprocal(jnp.sum(e, axis=-1, keepdims=True), approx=True)
    a_out_ref[...] = a

    # context vector dtp[b, :] = sum_t a[b, t] * enc[b, t, :]
    # (T is tiny here -> cheap VPU multiply + cross-sublane reduce; switch to an
    #  MXU contraction if T grows large.)
    dtp = jnp.sum(enc * a[:, :, None], axis=1)                # (B, H)

    # ---- attn_combine: one fused (B, 2H) x (2H, H) matmul on the lane concat ----
    dec_in = (_dot(jnp.concatenate([attn_output, dtp], axis=1), comb_wt_ref[...])
              + comb_b_ref[...])                              # (B, H)

    # ---- stacked decoder GRU cells with residual relu accumulation ----
    # Static unroll is fine at small L; switch to lax.fori_loop(unroll=True)
    # with pl.ds indexing if L grows (bounds vreg live ranges).
    dec_out = dec_in
    for i in range(L):
        h_i = _gru_cell(dec_out, dh_s[i],
                        _gate_slices(d_wx_ref, i), _gate_slices(d_wh_ref, i),
                        _gate_slices(d_bx_ref, i), _gate_slices(d_bh_ref, i))
        dh_s[i] = h_i
        dec_out = dec_out + jnp.maximum(h_i, 0.0)

    # ---- output projection + softmax ----
    logits = _dot(dec_out, out_wt_ref[...]) + out_b_ref[...]
    el = jnp.exp(logits - jnp.max(logits, axis=-1, keepdims=True))
    out_ref[...] = el * pl.reciprocal(jnp.sum(el, axis=-1, keepdims=True),
                                      approx=True)

    # Final hidden states: written once, at the last step.
    @pl.when(step == last)
    def _():
        ah_out_ref[...] = ah_s[...]
        dh_out_ref[...] = dh_s[...]


# ----------------------------------------------------------------------------
# Host-side wrappers
# ----------------------------------------------------------------------------

def _split_gru_weight(w, H):
    """(3H, in) PyTorch GRUCell weight -> (3, in, H) per-gate, pre-transposed."""
    return jnp.stack([w[g * H:(g + 1) * H].T for g in range(3)], axis=0)


def _full_spec(shape):
    nd = len(shape)
    return pl.BlockSpec(tuple(shape), lambda s, nd=nd: (0,) * nd)


def _step_spec(shape):
    nd = len(shape)
    return pl.BlockSpec((None,) + tuple(shape[1:]),
                        lambda s, nd=nd: (s,) + (0,) * (nd - 1))


def attn_decoder_steps(xs, attn_hidden, decoder_hiddens, encoder_outputs, p):
    """Run S fused decode steps in one pallas_call.

    xs: (S, B, I) pre-net inputs (one per step); attn_hidden: (B, H);
    decoder_hiddens: (L, B, H); encoder_outputs: (B, T, H).
    Returns (outputs (S, B, O), final attn_hidden (B, H),
             final decoder_hiddens (L, B, H), attention weights (S, B, T)).
    Equivalent to calling the PyTorch module S times, feeding hidden state back.
    """
    S, B, _ = xs.shape
    _, T, H = encoder_outputs.shape
    L = decoder_hiddens.shape[0]
    O = p['out_w'].shape[0]

    # Host-side weight prep (free, done once): per-gate split + transpose.
    a_wx = _split_gru_weight(p['a_wih'], H)                 # (3, I, H)
    a_wh = _split_gru_weight(p['a_whh'], H)                 # (3, H, H)
    a_bx = p['a_bih'].reshape(3, 1, H)
    a_bh = p['a_bhh'].reshape(3, 1, H)
    d_wx = p['d_wih'].reshape(L, 3, H, H).transpose(0, 1, 3, 2)   # (L, 3, H, H)
    d_wh = p['d_whh'].reshape(L, 3, H, H).transpose(0, 1, 3, 2)
    d_bx = p['d_bih'].reshape(L, 3, 1, H)
    d_bh = p['d_bhh'].reshape(L, 3, 1, H)

    inputs = (xs, attn_hidden, decoder_hiddens, encoder_outputs,
              a_wx, a_wh, a_bx, a_bh,
              p['w1'].T, p['w2'].T, p['v'],
              p['comb_w'].T, p['comb_b'],
              d_wx, d_wh, d_bx, d_bh,
              p['out_w'].T, p['out_b'])

    in_specs = [_step_spec(xs.shape)] + [_full_spec(a.shape) for a in inputs[1:]]

    out_shapes = (
        jax.ShapeDtypeStruct((S, B, O), jnp.float32),   # per-step output
        jax.ShapeDtypeStruct((B, H), jnp.float32),      # final attn_hidden
        jax.ShapeDtypeStruct((L, B, H), jnp.float32),   # final decoder_hiddens
        jax.ShapeDtypeStruct((S, B, T), jnp.float32),   # per-step attn weights
    )
    out_specs = (
        _step_spec((S, B, O)),
        _full_spec((B, H)),
        _full_spec((L, B, H)),
        _step_spec((S, B, T)),
    )

    fn = pl.pallas_call(
        attn_decoder_kernel,
        grid=(S,),
        out_shape=out_shapes,
        in_specs=in_specs,
        out_specs=out_specs,
        scratch_shapes=[pltpu.VMEM((B, H), jnp.float32),      # attn hidden carry
                        pltpu.VMEM((L, B, H), jnp.float32),   # decoder hidden carry
                        pltpu.VMEM((B, T, H), jnp.float32)],  # cached W1 . enc
        compiler_params=pltpu.CompilerParams(
            dimension_semantics=("arbitrary",)),   # sequential carry over steps
    )
    return fn(*inputs)


def attn_decoder(x, attn_hidden, decoder_hiddens, encoder_outputs, p):
    """Single-step forward matching the PyTorch module signature."""
    out, ah, dh, a = attn_decoder_steps(x[None], attn_hidden, decoder_hiddens,
                                        encoder_outputs, p)
    return out[0], ah, dh, a[0]


def make_params(key, I, H, O, L):
    """Deterministic synthetic parameters (shapes follow the PyTorch module)."""
    ks = iter(jax.random.split(key, 16))
    s = 0.1

    def rn(shape):
        return jax.random.normal(next(ks), shape, jnp.float32) * s

    return dict(
        # attn GRUCell(I -> H): weight_ih (3H, I), weight_hh (3H, H), biases (3H,)
        a_wih=rn((3 * H, I)), a_whh=rn((3 * H, H)),
        a_bih=rn((1, 3 * H)), a_bhh=rn((1, 3 * H)),
        # attention parameters
        w1=rn((H, H)), w2=rn((H, H)), v=rn((1, H)),
        # attn_combine: Linear(2H -> H)
        comb_w=rn((H, 2 * H)), comb_b=rn((1, H)),
        # decoder GRUCells (H -> H), stacked over layers
        d_wih=rn((L, 3 * H, H)), d_whh=rn((L, 3 * H, H)),
        d_bih=rn((L, 1, 3 * H)), d_bhh=rn((L, 1, 3 * H)),
        # output Linear(H -> O)
        out_w=rn((O, H)), out_b=rn((1, O)),
    )


def reference_step(x, ah, dh, enc, p):
    """Pure-JAX single-step reference matching the PyTorch forward."""
    H = ah.shape[1]

    def gru(x, h, w_ih, w_hh, b_ih, b_hh):
        gi = x @ w_ih.T + b_ih
        gh = h @ w_hh.T + b_hh
        r = jax.nn.sigmoid(gi[:, :H] + gh[:, :H])
        z = jax.nn.sigmoid(gi[:, H:2 * H] + gh[:, H:2 * H])
        n = jnp.tanh(gi[:, 2 * H:] + r * gh[:, 2 * H:])
        return (1 - z) * n + z * h

    ah = gru(x, ah, p['a_wih'], p['a_whh'], p['a_bih'], p['a_bhh'])
    attn_out = jax.nn.relu(ah)
    m = jnp.tanh(jnp.einsum('bth,ih->bti', enc, p['w1'])
                 + (attn_out @ p['w2'].T)[:, None, :])
    u = jnp.einsum('bti,i->bt', m, p['v'][0])
    a = jax.nn.softmax(u, axis=-1)
    dtp = jnp.sum(enc * a[:, :, None], axis=1)
    dec_out = jnp.concatenate([attn_out, dtp], axis=1) @ p['comb_w'].T + p['comb_b']
    new_dh = []
    for i in range(dh.shape[0]):
        h_i = gru(dec_out, dh[i], p['d_wih'][i], p['d_whh'][i],
                  p['d_bih'][i], p['d_bhh'][i])
        new_dh.append(h_i)
        dec_out = dec_out + jax.nn.relu(h_i)
    out = jax.nn.softmax(dec_out @ p['out_w'].T + p['out_b'], axis=-1)
    return out, ah, jnp.stack(new_dh), a


if __name__ == "__main__":
    # Small shapes consistent with the module (attn_hidden_size ==
    # decoder_hidden_size == 2 * encoder_hidden_size; T == max_length),
    # S fused decode steps in one kernel call.
    B, I, H, O, T, L, S = 8, 32, 32, 16, 8, 2, 4

    key = jax.random.PRNGKey(0)
    kx, kh, kd, ke, kp = jax.random.split(key, 5)
    xs = jax.random.normal(kx, (S, B, I), jnp.float32)
    attn_hidden = jax.random.normal(kh, (B, H), jnp.float32)
    decoder_hiddens = jax.random.normal(kd, (L, B, H), jnp.float32)
    encoder_outputs = jax.random.normal(ke, (B, T, H), jnp.float32)
    params = make_params(kp, I, H, O, L)

    outs = attn_decoder_steps(xs, attn_hidden, decoder_hiddens,
                              encoder_outputs, params)
    outs = jax.block_until_ready(outs)

    # Pure-JAX reference: apply the single-step reference S times sequentially.
    ref_out, ref_a = [], []
    ah_r, dh_r = attn_hidden, decoder_hiddens
    for s in range(S):
        o, ah_r, dh_r, a = reference_step(xs[s], ah_r, dh_r,
                                          encoder_outputs, params)
        ref_out.append(o)
        ref_a.append(a)
    refs = (jnp.stack(ref_out), ah_r, dh_r, jnp.stack(ref_a))

    names = ("output", "attn_hidden", "decoder_hiddens", "a")
    for name, got, want in zip(names, outs, refs):
        assert got.shape == want.shape, (name, got.shape, want.shape)
        # approx=True reciprocal in the two softmaxes -> slightly looser tolerance
        assert jnp.allclose(got, want, rtol=2e-3, atol=2e-3), name

    print("KERNEL_OK")
</pallas_src>

<mosaic_0001>
module attributes {stable_mosaic.version = 11 : i64} {
  func.func @attn_decoder_kernel(%arg0: i32, %arg1: memref<1x8x32xf32, #tpu.memory_space<vmem>>, %arg2: memref<8x32xf32, #tpu.memory_space<vmem>>, %arg3: memref<2x8x32xf32, #tpu.memory_space<vmem>>, %arg4: memref<8x8x32xf32, #tpu.memory_space<vmem>>, %arg5: memref<3x32x32xf32, #tpu.memory_space<vmem>>, %arg6: memref<3x32x32xf32, #tpu.memory_space<vmem>>, %arg7: memref<3x1x32xf32, #tpu.memory_space<vmem>>, %arg8: memref<3x1x32xf32, #tpu.memory_space<vmem>>, %arg9: memref<32x32xf32, #tpu.memory_space<vmem>>, %arg10: memref<32x32xf32, #tpu.memory_space<vmem>>, %arg11: memref<1x32xf32, #tpu.memory_space<vmem>>, %arg12: memref<64x32xf32, #tpu.memory_space<vmem>>, %arg13: memref<1x32xf32, #tpu.memory_space<vmem>>, %arg14: memref<2x3x32x32xf32, #tpu.memory_space<vmem>>, %arg15: memref<2x3x32x32xf32, #tpu.memory_space<vmem>>, %arg16: memref<2x3x1x32xf32, #tpu.memory_space<vmem>>, %arg17: memref<2x3x1x32xf32, #tpu.memory_space<vmem>>, %arg18: memref<32x16xf32, #tpu.memory_space<vmem>>, %arg19: memref<1x16xf32, #tpu.memory_space<vmem>>, %arg20: memref<1x8x16xf32, #tpu.memory_space<vmem>>, %arg21: memref<8x32xf32, #tpu.memory_space<vmem>>, %arg22: memref<2x8x32xf32, #tpu.memory_space<vmem>>, %arg23: memref<1x8x8xf32, #tpu.memory_space<vmem>>, %arg24: memref<8x32xf32, #tpu.memory_space<vmem>>, %arg25: memref<2x8x32xf32, #tpu.memory_space<vmem>>, %arg26: memref<8x8x32xf32, #tpu.memory_space<vmem>>) attributes {dimension_semantics = [#tpu.dimension_semantics<arbitrary>], iteration_bounds = array<i64: 4>, scalar_prefetch = 0 : i64, scratch_operands = 3 : i64, tpu.core_type = #tpu.core_type<tc>, window_params = [{transform_indices = @transform_0, window_bounds = array<i64: 1, 8, 32>}, {pipeline_mode = #tpu.pipeline_mode<synchronous>, transform_indices = @transform_1, window_bounds = array<i64: 8, 32>}, {pipeline_mode = #tpu.pipeline_mode<synchronous>, transform_indices = @transform_2, window_bounds = array<i64: 2, 8, 32>}, {pipeline_mode = #tpu.pipeline_mode<synchronous>, transform_indices = @transform_3, window_bounds = array<i64: 8, 8, 32>}, {pipeline_mode = #tpu.pipeline_mode<synchronous>, transform_indices = @transform_4, window_bounds = array<i64: 3, 32, 32>}, {pipeline_mode = #tpu.pipeline_mode<synchronous>, transform_indices = @transform_5, window_bounds = array<i64: 3, 32, 32>}, {pipeline_mode = #tpu.pipeline_mode<synchronous>, transform_indices = @transform_6, window_bounds = array<i64: 3, 1, 32>}, {pipeline_mode = #tpu.pipeline_mode<synchronous>, transform_indices = @transform_7, window_bounds = array<i64: 3, 1, 32>}, {pipeline_mode = #tpu.pipeline_mode<synchronous>, transform_indices = @transform_8, window_bounds = array<i64: 32, 32>}, {pipeline_mode = #tpu.pipeline_mode<synchronous>, transform_indices = @transform_9, window_bounds = array<i64: 32, 32>}, {pipeline_mode = #tpu.pipeline_mode<synchronous>, transform_indices = @transform_10, window_bounds = array<i64: 1, 32>}, {pipeline_mode = #tpu.pipeline_mode<synchronous>, transform_indices = @transform_11, window_bounds = array<i64: 64, 32>}, {pipeline_mode = #tpu.pipeline_mode<synchronous>, transform_indices = @transform_12, window_bounds = array<i64: 1, 32>}, {pipeline_mode = #tpu.pipeline_mode<synchronous>, transform_indices = @transform_13, window_bounds = array<i64: 2, 3, 32, 32>}, {pipeline_mode = #tpu.pipeline_mode<synchronous>, transform_indices = @transform_14, window_bounds = array<i64: 2, 3, 32, 32>}, {pipeline_mode = #tpu.pipeline_mode<synchronous>, transform_indices = @transform_15, window_bounds = array<i64: 2, 3, 1, 32>}, {pipeline_mode = #tpu.pipeline_mode<synchronous>, transform_indices = @transform_16, window_bounds = array<i64: 2, 3, 1, 32>}, {pipeline_mode = #tpu.pipeline_mode<synchronous>, transform_indices = @transform_17, window_bounds = array<i64: 32, 16>}, {pipeline_mode = #tpu.pipeline_mode<synchronous>, transform_indices = @transform_18, window_bounds = array<i64: 1, 16>}, {transform_indices = @transform_19, window_bounds = array<i64: 1, 8, 16>}, {pipeline_mode = #tpu.pipeline_mode<synchronous>, transform_indices = @transform_20, window_bounds = array<i64: 8, 32>}, {pipeline_mode = #tpu.pipeline_mode<synchronous>, transform_indices = @transform_21, window_bounds = array<i64: 2, 8, 32>}, {transform_indices = @transform_22, window_bounds = array<i64: 1, 8, 8>}]} {
    %c0_i32 = arith.constant 0 : i32
    %0 = arith.cmpi eq, %arg0, %c0_i32 : i32
    %1 = arith.extui %0 : i1 to i32
    %c0_i32_0 = arith.constant 0 : i32
    %2 = arith.cmpi ne, %1, %c0_i32_0 : i32
    scf.if %2 {
      %c0_212 = arith.constant 0 : index
      %c0_213 = arith.constant 0 : index
      %268 = vector.load %arg2[%c0_212, %c0_213] : memref<8x32xf32, #tpu.memory_space<vmem>>, vector<8x32xf32>
      %c0_214 = arith.constant 0 : index
      %c0_215 = arith.constant 0 : index
      %269 = vector.load %arg24[%c0_214, %c0_215] : memref<8x32xf32, #tpu.memory_space<vmem>>, vector<8x32xf32>
      tpu.vector_store %arg24[%c0_214, %c0_215], %268 {strides = array<i32>} : memref<8x32xf32, #tpu.memory_space<vmem>>, vector<8x32xf32>,
      %c0_216 = arith.constant 0 : index
      %c0_217 = arith.constant 0 : index
      %c0_218 = arith.constant 0 : index
      %270 = vector.load %arg3[%c0_216, %c0_217, %c0_218] : memref<2x8x32xf32, #tpu.memory_space<vmem>>, vector<2x8x32xf32>
      %c0_219 = arith.constant 0 : index
      %c0_220 = arith.constant 0 : index
      %c0_221 = arith.constant 0 : index
      %271 = vector.load %arg25[%c0_219, %c0_220, %c0_221] : memref<2x8x32xf32, #tpu.memory_space<vmem>>, vector<2x8x32xf32>
      tpu.vector_store %arg25[%c0_219, %c0_220, %c0_221], %270 {strides = array<i32>} : memref<2x8x32xf32, #tpu.memory_space<vmem>>, vector<2x8x32xf32>,
      %c0_222 = arith.constant 0 : index
      %c0_223 = arith.constant 0 : index
      %c0_224 = arith.constant 0 : index
      %272 = vector.load %arg4[%c0_222, %c0_223, %c0_224] : memref<8x8x32xf32, #tpu.memory_space<vmem>>, vector<8x8x32xf32>
      %273 = vector.shape_cast %272 : vector<8x8x32xf32> to vector<64x32xf32>
      %c0_225 = arith.constant 0 : index
      %c0_226 = arith.constant 0 : index
      %274 = vector.load %arg9[%c0_225, %c0_226] : memref<32x32xf32, #tpu.memory_space<vmem>>, vector<32x32xf32>
      %cst_227 = arith.constant dense<0.000000e+00> : vector<64x32xf32>
      %275 = tpu.matmul %273, %274, %cst_227 {dimension_numbers = #tpu.dot_dimension_numbers<[1], [0], [0], [1], [0, 0, 1, 1], [], []>} : vector<64x32xf32>, vector<32x32xf32>, vector<64x32xf32> -> vector<64x32xf32>
      %276 = vector.shape_cast %275 : vector<64x32xf32> to vector<8x8x32xf32>
      %c0_228 = arith.constant 0 : index
      %c0_229 = arith.constant 0 : index
      %c0_230 = arith.constant 0 : index
      %277 = vector.load %arg26[%c0_228, %c0_229, %c0_230] : memref<8x8x32xf32, #tpu.memory_space<vmem>>, vector<8x8x32xf32>
      tpu.vector_store %arg26[%c0_228, %c0_229, %c0_230], %276 {strides = array<i32>} : memref<8x8x32xf32, #tpu.memory_space<vmem>>, vector<8x8x32xf32>,
    } else {
    }
    %c0 = arith.constant 0 : index
    %c0_1 = arith.constant 0 : index
    %c0_2 = arith.constant 0 : index
    %3 = vector.load %arg1[%c0, %c0_1, %c0_2] : memref<1x8x32xf32, #tpu.memory_space<vmem>>, vector<1x8x32xf32>
    %4 = vector.shape_cast %3 : vector<1x8x32xf32> to vector<8x32xf32>
    %c0_3 = arith.constant 0 : index
    %c0_4 = arith.constant 0 : index
    %5 = vector.load %arg24[%c0_3, %c0_4] : memref<8x32xf32, #tpu.memory_space<vmem>>, vector<8x32xf32>
    %c0_5 = arith.constant 0 : index
    %c0_6 = arith.constant 0 : index
    %c0_7 = arith.constant 0 : index
    %6 = vector.load %arg5[%c0_5, %c0_6, %c0_7] : memref<3x32x32xf32, #tpu.memory_space<vmem>>, vector<1x32x32xf32>
    %7 = vector.shape_cast %6 : vector<1x32x32xf32> to vector<32x32xf32>
    %c1 = arith.constant 1 : index
    %c0_8 = arith.constant 0 : index
    %c0_9 = arith.constant 0 : index
    %8 = vector.load %arg5[%c1, %c0_8, %c0_9] : memref<3x32x32xf32, #tpu.memory_space<vmem>>, vector<1x32x32xf32>
    %9 = vector.shape_cast %8 : vector<1x32x32xf32> to vector<32x32xf32>
    %c2 = arith.constant 2 : index
    %c0_10 = arith.constant 0 : index
    %c0_11 = arith.constant 0 : index
    %10 = vector.load %arg5[%c2, %c0_10, %c0_11] : memref<3x32x32xf32, #tpu.memory_space<vmem>>, vector<1x32x32xf32>
    %11 = vector.shape_cast %10 : vector<1x32x32xf32> to vector<32x32xf32>
    %c0_12 = arith.constant 0 : index
    %c0_13 = arith.constant 0 : index
    %c0_14 = arith.constant 0 : index
    %12 = vector.load %arg6[%c0_12, %c0_13, %c0_14] : memref<3x32x32xf32, #tpu.memory_space<vmem>>, vector<1x32x32xf32>
    %13 = vector.shape_cast %12 : vector<1x32x32xf32> to vector<32x32xf32>
    %c1_15 = arith.constant 1 : index
    %c0_16 = arith.constant 0 : index
    %c0_17 = arith.constant 0 : index
    %14 = vector.load %arg6[%c1_15, %c0_16, %c0_17] : memref<3x32x32xf32, #tpu.memory_space<vmem>>, vector<1x32x32xf32>
    %15 = vector.shape_cast %14 : vector<1x32x32xf32> to vector<32x32xf32>
    %c2_18 = arith.constant 2 : index
    %c0_19 = arith.constant 0 : index
    %c0_20 = arith.constant 0 : index
    %16 = vector.load %arg6[%c2_18, %c0_19, %c0_20] : memref<3x32x32xf32, #tpu.memory_space<vmem>>, vector<1x32x32xf32>
    %17 = vector.shape_cast %16 : vector<1x32x32xf32> to vector<32x32xf32>
    %c0_21 = arith.constant 0 : index
    %c0_22 = arith.constant 0 : index
    %c0_23 = arith.constant 0 : index
    %18 = vector.load %arg7[%c0_21, %c0_22, %c0_23] : memref<3x1x32xf32, #tpu.memory_space<vmem>>, vector<1x1x32xf32>
    %19 = vector.shape_cast %18 : vector<1x1x32xf32> to vector<1x32xf32>
    %c1_24 = arith.constant 1 : index
    %c0_25 = arith.constant 0 : index
    %c0_26 = arith.constant 0 : index
    %20 = vector.load %arg7[%c1_24, %c0_25, %c0_26] : memref<3x1x32xf32, #tpu.memory_space<vmem>>, vector<1x1x32xf32>
    %21 = vector.shape_cast %20 : vector<1x1x32xf32> to vector<1x32xf32>
    %c2_27 = arith.constant 2 : index
    %c0_28 = arith.constant 0 : index
    %c0_29 = arith.constant 0 : index
    %22 = vector.load %arg7[%c2_27, %c0_28, %c0_29] : memref<3x1x32xf32, #tpu.memory_space<vmem>>, vector<1x1x32xf32>
    %23 = vector.shape_cast %22 : vector<1x1x32xf32> to vector<1x32xf32>
    %c0_30 = arith.constant 0 : index
    %c0_31 = arith.constant 0 : index
    %c0_32 = arith.constant 0 : index
    %24 = vector.load %arg8[%c0_30, %c0_31, %c0_32] : memref<3x1x32xf32, #tpu.memory_space<vmem>>, vector<1x1x32xf32>
    %25 = vector.shape_cast %24 : vector<1x1x32xf32> to vector<1x32xf32>
    %c1_33 = arith.constant 1 : index
    %c0_34 = arith.constant 0 : index
    %c0_35 = arith.constant 0 : index
    %26 = vector.load %arg8[%c1_33, %c0_34, %c0_35] : memref<3x1x32xf32, #tpu.memory_space<vmem>>, vector<1x1x32xf32>
    %27 = vector.shape_cast %26 : vector<1x1x32xf32> to vector<1x32xf32>
    %c2_36 = arith.constant 2 : index
    %c0_37 = arith.constant 0 : index
    %c0_38 = arith.constant 0 : index
    %28 = vector.load %arg8[%c2_36, %c0_37, %c0_38] : memref<3x1x32xf32, #tpu.memory_space<vmem>>, vector<1x1x32xf32>
    %29 = vector.shape_cast %28 : vector<1x1x32xf32> to vector<1x32xf32>
    %cst = arith.constant dense<0.000000e+00> : vector<8x32xf32>
    %30 = tpu.matmul %4, %7, %cst {dimension_numbers = #tpu.dot_dimension_numbers<[1], [0], [0], [1], [0, 0, 1, 1], [], []>} : vector<8x32xf32>, vector<32x32xf32>, vector<8x32xf32> -> vector<8x32xf32>
    %31 = vector.broadcast %19 : vector<1x32xf32> to vector<8x32xf32>
    %32 = arith.addf %30, %31 : vector<8x32xf32>
    %cst_39 = arith.constant dense<0.000000e+00> : vector<8x32xf32>
    %33 = tpu.matmul %5, %13, %cst_39 {dimension_numbers = #tpu.dot_dimension_numbers<[1], [0], [0], [1], [0, 0, 1, 1], [], []>} : vector<8x32xf32>, vector<32x32xf32>, vector<8x32xf32> -> vector<8x32xf32>
    %34 = arith.addf %32, %33 : vector<8x32xf32>
    %35 = vector.broadcast %25 : vector<1x32xf32> to vector<8x32xf32>
    %36 = arith.addf %34, %35 : vector<8x32xf32>
    %37 = arith.negf %36 : vector<8x32xf32>
    %38 = math.exp %37 : vector<8x32xf32>
    %cst_40 = arith.constant 1.000000e+00 : f32
    %39 = vector.broadcast %cst_40 : f32 to vector<8x32xf32>
    %40 = arith.addf %39, %38 : vector<8x32xf32>
    %41 = arith.divf %39, %40 : vector<8x32xf32>
    %cst_41 = arith.constant dense<0.000000e+00> : vector<8x32xf32>
    %42 = tpu.matmul %4, %9, %cst_41 {dimension_numbers = #tpu.dot_dimension_numbers<[1], [0], [0], [1], [0, 0, 1, 1], [], []>} : vector<8x32xf32>, vector<32x32xf32>, vector<8x32xf32> -> vector<8x32xf32>
    %43 = vector.broadcast %21 : vector<1x32xf32> to vector<8x32xf32>
    %44 = arith.addf %42, %43 : vector<8x32xf32>
    %cst_42 = arith.constant dense<0.000000e+00> : vector<8x32xf32>
    %45 = tpu.matmul %5, %15, %cst_42 {dimension_numbers = #tpu.dot_dimension_numbers<[1], [0], [0], [1], [0, 0, 1, 1], [], []>} : vector<8x32xf32>, vector<32x32xf32>, vector<8x32xf32> -> vector<8x32xf32>
    %46 = arith.addf %44, %45 : vector<8x32xf32>
    %47 = vector.broadcast %27 : vector<1x32xf32> to vector<8x32xf32>
    %48 = arith.addf %46, %47 : vector<8x32xf32>
    %49 = arith.negf %48 : vector<8x32xf32>
    %50 = math.exp %49 : vector<8x32xf32>
    %cst_43 = arith.constant 1.000000e+00 : f32
    %51 = vector.broadcast %cst_43 : f32 to vector<8x32xf32>
    %52 = arith.addf %51, %50 : vector<8x32xf32>
    %53 = arith.divf %51, %52 : vector<8x32xf32>
    %cst_44 = arith.constant dense<0.000000e+00> : vector<8x32xf32>
    %54 = tpu.matmul %4, %11, %cst_44 {dimension_numbers = #tpu.dot_dimension_numbers<[1], [0], [0], [1], [0, 0, 1, 1], [], []>} : vector<8x32xf32>, vector<32x32xf32>, vector<8x32xf32> -> vector<8x32xf32>
    %55 = vector.broadcast %23 : vector<1x32xf32> to vector<8x32xf32>
    %56 = arith.addf %54, %55 : vector<8x32xf32>
    %cst_45 = arith.constant dense<0.000000e+00> : vector<8x32xf32>
    %57 = tpu.matmul %5, %17, %cst_45 {dimension_numbers = #tpu.dot_dimension_numbers<[1], [0], [0], [1], [0, 0, 1, 1], [], []>} : vector<8x32xf32>, vector<32x32xf32>, vector<8x32xf32> -> vector<8x32xf32>
    %58 = vector.broadcast %29 : vector<1x32xf32> to vector<8x32xf32>
    %59 = arith.addf %57, %58 : vector<8x32xf32>
    %60 = arith.mulf %41, %59 : vector<8x32xf32>
    %61 = arith.addf %56, %60 : vector<8x32xf32>
    %62 = math.tanh %61 : vector<8x32xf32>
    %cst_46 = arith.constant 1.000000e+00 : f32
    %63 = vector.broadcast %cst_46 : f32 to vector<8x32xf32>
    %64 = arith.subf %63, %53 : vector<8x32xf32>
    %65 = arith.mulf %64, %62 : vector<8x32xf32>
    %66 = arith.mulf %53, %5 : vector<8x32xf32>
    %67 = arith.addf %65, %66 : vector<8x32xf32>
    %c0_47 = arith.constant 0 : index
    %c0_48 = arith.constant 0 : index
    %68 = vector.load %arg24[%c0_47, %c0_48] : memref<8x32xf32, #tpu.memory_space<vmem>>, vector<8x32xf32>
    tpu.vector_store %arg24[%c0_47, %c0_48], %67 {strides = array<i32>} : memref<8x32xf32, #tpu.memory_space<vmem>>, vector<8x32xf32>,
    %cst_49 = arith.constant 0.000000e+00 : f32
    %69 = vector.broadcast %cst_49 : f32 to vector<8x32xf32>
    %70 = arith.maximumf %67, %69 : vector<8x32xf32>
    %c0_50 = arith.constant 0 : index
    %c0_51 = arith.constant 0 : index
    %c0_52 = arith.constant 0 : index
    %71 = vector.load %arg4[%c0_50, %c0_51, %c0_52] : memref<8x8x32xf32, #tpu.memory_space<vmem>>, vector<8x8x32xf32>
    %c0_53 = arith.constant 0 : index
    %c0_54 = arith.constant 0 : index
    %72 = vector.load %arg10[%c0_53, %c0_54] : memref<32x32xf32, #tpu.memory_space<vmem>>, vector<32x32xf32>
    %cst_55 = arith.constant dense<0.000000e+00> : vector<8x32xf32>
    %73 = tpu.matmul %70, %72, %cst_55 {dimension_numbers = #tpu.dot_dimension_numbers<[1], [0], [0], [1], [0, 0, 1, 1], [], []>} : vector<8x32xf32>, vector<32x32xf32>, vector<8x32xf32> -> vector<8x32xf32>
    %c0_56 = arith.constant 0 : index
    %c0_57 = arith.constant 0 : index
    %c0_58 = arith.constant 0 : index
    %74 = vector.load %arg26[%c0_56, %c0_57, %c0_58] : memref<8x8x32xf32, #tpu.memory_space<vmem>>, vector<8x8x32xf32>
    %75 = vector.shape_cast %73 : vector<8x32xf32> to vector<8x1x32xf32>
    %76 = vector.broadcast %75 : vector<8x1x32xf32> to vector<8x8x32xf32>
    %77 = arith.addf %74, %76 : vector<8x8x32xf32>
    %78 = math.tanh %77 : vector<8x8x32xf32>
    %c0_59 = arith.constant 0 : index
    %c0_60 = arith.constant 0 : index
    %79 = vector.load %arg11[%c0_59, %c0_60] : memref<1x32xf32, #tpu.memory_space<vmem>>, vector<1x32xf32>
    %80 = vector.shape_cast %79 : vector<1x32xf32> to vector<1x1x32xf32>
    %81 = vector.broadcast %80 : vector<1x1x32xf32> to vector<8x8x32xf32>
    %82 = arith.mulf %78, %81 : vector<8x8x32xf32>
    %cst_61 = arith.constant dense<0.000000e+00> : vector<8x8xf32>
    %83 = vector.multi_reduction <add>, %82, %cst_61 [2] : vector<8x8x32xf32> to vector<8x8xf32>
    %cst_62 = arith.constant dense<0xFF800000> : vector<8xf32>
    %84 = vector.multi_reduction <maximumf>, %83, %cst_62 [1] : vector<8x8xf32> to vector<8xf32>
    %85 = vector.shape_cast %84 : vector<8xf32> to vector<8x1xf32>
    %86 = vector.broadcast %85 : vector<8x1xf32> to vector<8x8xf32>
    %87 = arith.subf %83, %86 : vector<8x8xf32>
    %88 = math.exp %87 : vector<8x8xf32>
    %cst_63 = arith.constant dense<0.000000e+00> : vector<8xf32>
    %89 = vector.multi_reduction <add>, %88, %cst_63 [1] : vector<8x8xf32> to vector<8xf32>
    %90 = vector.shape_cast %89 : vector<8xf32> to vector<8x1xf32>
    %91 = tpu.reciprocal %90 {approx = true} : vector<8x1xf32> -> vector<8x1xf32>
    %92 = vector.broadcast %91 : vector<8x1xf32> to vector<8x8xf32>
    %93 = arith.mulf %88, %92 : vector<8x8xf32>
    %c0_64 = arith.constant 0 : index
    %c0_65 = arith.constant 0 : index
    %c0_66 = arith.constant 0 : index
    %94 = vector.load %arg23[%c0_64, %c0_65, %c0_66] : memref<1x8x8xf32, #tpu.memory_space<vmem>>, vector<1x8x8xf32>
    %95 = vector.shape_cast %94 : vector<1x8x8xf32> to vector<8x8xf32>
    %96 = vector.shape_cast %93 : vector<8x8xf32> to vector<1x8x8xf32>
    tpu.vector_store %arg23[%c0_64, %c0_65, %c0_66], %96 {strides = array<i32>} : memref<1x8x8xf32, #tpu.memory_space<vmem>>, vector<1x8x8xf32>,
    %97 = vector.shape_cast %93 : vector<8x8xf32> to vector<8x8x1xf32>
    %98 = vector.broadcast %97 : vector<8x8x1xf32> to vector<8x8x32xf32>
    %99 = arith.mulf %71, %98 : vector<8x8x32xf32>
    %cst_67 = arith.constant dense<0.000000e+00> : vector<8x32xf32>
    %100 = vector.multi_reduction <add>, %99, %cst_67 [1] : vector<8x8x32xf32> to vector<8x32xf32>
    %101 = tpu.concatenate %70, %100 in 1 : vector<8x32xf32>, vector<8x32xf32> -> vector<8x64xf32>
    %c0_68 = arith.constant 0 : index
    %c0_69 = arith.constant 0 : index
    %102 = vector.load %arg12[%c0_68, %c0_69] : memref<64x32xf32, #tpu.memory_space<vmem>>, vector<64x32xf32>
    %cst_70 = arith.constant dense<0.000000e+00> : vector<8x32xf32>
    %103 = tpu.matmul %101, %102, %cst_70 {dimension_numbers = #tpu.dot_dimension_numbers<[1], [0], [0], [1], [0, 0, 1, 1], [], []>} : vector<8x64xf32>, vector<64x32xf32>, vector<8x32xf32> -> vector<8x32xf32>
    %c0_71 = arith.constant 0 : index
    %c0_72 = arith.constant 0 : index
    %104 = vector.load %arg13[%c0_71, %c0_72] : memref<1x32xf32, #tpu.memory_space<vmem>>, vector<1x32xf32>
    %105 = vector.broadcast %104 : vector<1x32xf32> to vector<8x32xf32>
    %106 = arith.addf %103, %105 : vector<8x32xf32>
    %c0_73 = arith.constant 0 : index
    %c0_74 = arith.constant 0 : index
    %c0_75 = arith.constant 0 : index
    %107 = vector.load %arg25[%c0_73, %c0_74, %c0_75] : memref<2x8x32xf32, #tpu.memory_space<vmem>>, vector<1x8x32xf32>
    %108 = vector.shape_cast %107 : vector<1x8x32xf32> to vector<8x32xf32>
    %c0_76 = arith.constant 0 : index
    %c0_77 = arith.constant 0 : index
    %c0_78 = arith.constant 0 : index
    %c0_79 = arith.constant 0 : index
    %109 = vector.load %arg14[%c0_76, %c0_77, %c0_78, %c0_79] : memref<2x3x32x32xf32, #tpu.memory_space<vmem>>, vector<1x1x32x32xf32>
    %110 = vector.shape_cast %109 : vector<1x1x32x32xf32> to vector<32x32xf32>
    %c0_80 = arith.constant 0 : index
    %c1_81 = arith.constant 1 : index
    %c0_82 = arith.constant 0 : index
    %c0_83 = arith.constant 0 : index
    %111 = vector.load %arg14[%c0_80, %c1_81, %c0_82, %c0_83] : memref<2x3x32x32xf32, #tpu.memory_space<vmem>>, vector<1x1x32x32xf32>
    %112 = vector.shape_cast %111 : vector<1x1x32x32xf32> to vector<32x32xf32>
    %c0_84 = arith.constant 0 : index
    %c2_85 = arith.constant 2 : index
    %c0_86 = arith.constant 0 : index
    %c0_87 = arith.constant 0 : index
    %113 = vector.load %arg14[%c0_84, %c2_85, %c0_86, %c0_87] : memref<2x3x32x32xf32, #tpu.memory_space<vmem>>, vector<1x1x32x32xf32>
    %114 = vector.shape_cast %113 : vector<1x1x32x32xf32> to vector<32x32xf32>
    %c0_88 = arith.constant 0 : index
    %c0_89 = arith.constant 0 : index
    %c0_90 = arith.constant 0 : index
    %c0_91 = arith.constant 0 : index
    %115 = vector.load %arg15[%c0_88, %c0_89, %c0_90, %c0_91] : memref<2x3x32x32xf32, #tpu.memory_space<vmem>>, vector<1x1x32x32xf32>
    %116 = vector.shape_cast %115 : vector<1x1x32x32xf32> to vector<32x32xf32>
    %c0_92 = arith.constant 0 : index
    %c1_93 = arith.constant 1 : index
    %c0_94 = arith.constant 0 : index
    %c0_95 = arith.constant 0 : index
    %117 = vector.load %arg15[%c0_92, %c1_93, %c0_94, %c0_95] : memref<2x3x32x32xf32, #tpu.memory_space<vmem>>, vector<1x1x32x32xf32>
    %118 = vector.shape_cast %117 : vector<1x1x32x32xf32> to vector<32x32xf32>
    %c0_96 = arith.constant 0 : index
    %c2_97 = arith.constant 2 : index
    %c0_98 = arith.constant 0 : index
    %c0_99 = arith.constant 0 : index
    %119 = vector.load %arg15[%c0_96, %c2_97, %c0_98, %c0_99] : memref<2x3x32x32xf32, #tpu.memory_space<vmem>>, vector<1x1x32x32xf32>
    %120 = vector.shape_cast %119 : vector<1x1x32x32xf32> to vector<32x32xf32>
    %c0_100 = arith.constant 0 : index
    %c0_101 = arith.constant 0 : index
    %c0_102 = arith.constant 0 : index
    %c0_103 = arith.constant 0 : index
    %121 = vector.load %arg16[%c0_100, %c0_101, %c0_102, %c0_103] : memref<2x3x1x32xf32, #tpu.memory_space<vmem>>, vector<1x1x1x32xf32>
    %122 = vector.shape_cast %121 : vector<1x1x1x32xf32> to vector<1x32xf32>
    %c0_104 = arith.constant 0 : index
    %c1_105 = arith.constant 1 : index
    %c0_106 = arith.constant 0 : index
    %c0_107 = arith.constant 0 : index
    %123 = vector.load %arg16[%c0_104, %c1_105, %c0_106, %c0_107] : memref<2x3x1x32xf32, #tpu.memory_space<vmem>>, vector<1x1x1x32xf32>
    %124 = vector.shape_cast %123 : vector<1x1x1x32xf32> to vector<1x32xf32>
    %c0_108 = arith.constant 0 : index
    %c2_109 = arith.constant 2 : index
    %c0_110 = arith.constant 0 : index
    %c0_111 = arith.constant 0 : index
    %125 = vector.load %arg16[%c0_108, %c2_109, %c0_110, %c0_111] : memref<2x3x1x32xf32, #tpu.memory_space<vmem>>, vector<1x1x1x32xf32>
    %126 = vector.shape_cast %125 : vector<1x1x1x32xf32> to vector<1x32xf32>
    %c0_112 = arith.constant 0 : index
    %c0_113 = arith.constant 0 : index
    %c0_114 = arith.constant 0 : index
    %c0_115 = arith.constant 0 : index
    %127 = vector.load %arg17[%c0_112, %c0_113, %c0_114, %c0_115] : memref<2x3x1x32xf32, #tpu.memory_space<vmem>>, vector<1x1x1x32xf32>
    %128 = vector.shape_cast %127 : vector<1x1x1x32xf32> to vector<1x32xf32>
    %c0_116 = arith.constant 0 : index
    %c1_117 = arith.constant 1 : index
    %c0_118 = arith.constant 0 : index
    %c0_119 = arith.constant 0 : index
    %129 = vector.load %arg17[%c0_116, %c1_117, %c0_118, %c0_119] : memref<2x3x1x32xf32, #tpu.memory_space<vmem>>, vector<1x1x1x32xf32>
    %130 = vector.shape_cast %129 : vector<1x1x1x32xf32> to vector<1x32xf32>
    %c0_120 = arith.constant 0 : index
    %c2_121 = arith.constant 2 : index
    %c0_122 = arith.constant 0 : index
    %c0_123 = arith.constant 0 : index
    %131 = vector.load %arg17[%c0_120, %c2_121, %c0_122, %c0_123] : memref<2x3x1x32xf32, #tpu.memory_space<vmem>>, vector<1x1x1x32xf32>
    %132 = vector.shape_cast %131 : vector<1x1x1x32xf32> to vector<1x32xf32>
    %cst_124 = arith.constant dense<0.000000e+00> : vector<8x32xf32>
    %133 = tpu.matmul %106, %110, %cst_124 {dimension_numbers = #tpu.dot_dimension_numbers<[1], [0], [0], [1], [0, 0, 1, 1], [], []>} : vector<8x32xf32>, vector<32x32xf32>, vector<8x32xf32> -> vector<8x32xf32>
    %134 = vector.broadcast %122 : vector<1x32xf32> to vector<8x32xf32>
    %135 = arith.addf %133, %134 : vector<8x32xf32>
    %cst_125 = arith.constant dense<0.000000e+00> : vector<8x32xf32>
    %136 = tpu.matmul %108, %116, %cst_125 {dimension_numbers = #tpu.dot_dimension_numbers<[1], [0], [0], [1], [0, 0, 1, 1], [], []>} : vector<8x32xf32>, vector<32x32xf32>, vector<8x32xf32> -> vector<8x32xf32>
    %137 = arith.addf %135, %136 : vector<8x32xf32>
    %138 = vector.broadcast %128 : vector<1x32xf32> to vector<8x32xf32>
    %139 = arith.addf %137, %138 : vector<8x32xf32>
    %140 = arith.negf %139 : vector<8x32xf32>
    %141 = math.exp %140 : vector<8x32xf32>
    %cst_126 = arith.constant 1.000000e+00 : f32
    %142 = vector.broadcast %cst_126 : f32 to vector<8x32xf32>
    %143 = arith.addf %142, %141 : vector<8x32xf32>
    %144 = arith.divf %142, %143 : vector<8x32xf32>
    %cst_127 = arith.constant dense<0.000000e+00> : vector<8x32xf32>
    %145 = tpu.matmul %106, %112, %cst_127 {dimension_numbers = #tpu.dot_dimension_numbers<[1], [0], [0], [1], [0, 0, 1, 1], [], []>} : vector<8x32xf32>, vector<32x32xf32>, vector<8x32xf32> -> vector<8x32xf32>
    %146 = vector.broadcast %124 : vector<1x32xf32> to vector<8x32xf32>
    %147 = arith.addf %145, %146 : vector<8x32xf32>
    %cst_128 = arith.constant dense<0.000000e+00> : vector<8x32xf32>
    %148 = tpu.matmul %108, %118, %cst_128 {dimension_numbers = #tpu.dot_dimension_numbers<[1], [0], [0], [1], [0, 0, 1, 1], [], []>} : vector<8x32xf32>, vector<32x32xf32>, vector<8x32xf32> -> vector<8x32xf32>
    %149 = arith.addf %147, %148 : vector<8x32xf32>
    %150 = vector.broadcast %130 : vector<1x32xf32> to vector<8x32xf32>
    %151 = arith.addf %149, %150 : vector<8x32xf32>
    %152 = arith.negf %151 : vector<8x32xf32>
    %153 = math.exp %152 : vector<8x32xf32>
    %cst_129 = arith.constant 1.000000e+00 : f32
    %154 = vector.broadcast %cst_129 : f32 to vector<8x32xf32>
    %155 = arith.addf %154, %153 : vector<8x32xf32>
    %156 = arith.divf %154, %155 : vector<8x32xf32>
    %cst_130 = arith.constant dense<0.000000e+00> : vector<8x32xf32>
    %157 = tpu.matmul %106, %114, %cst_130 {dimension_numbers = #tpu.dot_dimension_numbers<[1], [0], [0], [1], [0, 0, 1, 1], [], []>} : vector<8x32xf32>, vector<32x32xf32>, vector<8x32xf32> -> vector<8x32xf32>
    %158 = vector.broadcast %126 : vector<1x32xf32> to vector<8x32xf32>
    %159 = arith.addf %157, %158 : vector<8x32xf32>
    %cst_131 = arith.constant dense<0.000000e+00> : vector<8x32xf32>
    %160 = tpu.matmul %108, %120, %cst_131 {dimension_numbers = #tpu.dot_dimension_numbers<[1], [0], [0], [1], [0, 0, 1, 1], [], []>} : vector<8x32xf32>, vector<32x32xf32>, vector<8x32xf32> -> vector<8x32xf32>
    %161 = vector.broadcast %132 : vector<1x32xf32> to vector<8x32xf32>
    %162 = arith.addf %160, %161 : vector<8x32xf32>
    %163 = arith.mulf %144, %162 : vector<8x32xf32>
    %164 = arith.addf %159, %163 : vector<8x32xf32>
    %165 = math.tanh %164 : vector<8x32xf32>
    %cst_132 = arith.constant 1.000000e+00 : f32
    %166 = vector.broadcast %cst_132 : f32 to vector<8x32xf32>
    %167 = arith.subf %166, %156 : vector<8x32xf32>
    %168 = arith.mulf %167, %165 : vector<8x32xf32>
    %169 = arith.mulf %156, %108 : vector<8x32xf32>
    %170 = arith.addf %168, %169 : vector<8x32xf32>
    %c0_133 = arith.constant 0 : index
    %c0_134 = arith.constant 0 : index
    %c0_135 = arith.constant 0 : index
    %171 = vector.load %arg25[%c0_133, %c0_134, %c0_135] : memref<2x8x32xf32, #tpu.memory_space<vmem>>, vector<1x8x32xf32>
    %172 = vector.shape_cast %171 : vector<1x8x32xf32> to vector<8x32xf32>
    %173 = vector.shape_cast %170 : vector<8x32xf32> to vector<1x8x32xf32>
    tpu.vector_store %arg25[%c0_133, %c0_134, %c0_135], %173 {strides = array<i32>} : memref<2x8x32xf32, #tpu.memory_space<vmem>>, vector<1x8x32xf32>,
    %cst_136 = arith.constant 0.000000e+00 : f32
    %174 = vector.broadcast %cst_136 : f32 to vector<8x32xf32>
    %175 = arith.maximumf %170, %174 : vector<8x32xf32>
    %176 = arith.addf %106, %175 : vector<8x32xf32>
    %c1_137 = arith.constant 1 : index
    %c0_138 = arith.constant 0 : index
    %c0_139 = arith.constant 0 : index
    %177 = vector.load %arg25[%c1_137, %c0_138, %c0_139] : memref<2x8x32xf32, #tpu.memory_space<vmem>>, vector<1x8x32xf32>
    %178 = vector.shape_cast %177 : vector<1x8x32xf32> to vector<8x32xf32>
    %c1_140 = arith.constant 1 : index
    %c0_141 = arith.constant 0 : index
    %c0_142 = arith.constant 0 : index
    %c0_143 = arith.constant 0 : index
    %179 = vector.load %arg14[%c1_140, %c0_141, %c0_142, %c0_143] : memref<2x3x32x32xf32, #tpu.memory_space<vmem>>, vector<1x1x32x32xf32>
    %180 = vector.shape_cast %179 : vector<1x1x32x32xf32> to vector<32x32xf32>
    %c1_144 = arith.constant 1 : index
    %c1_145 = arith.constant 1 : index
    %c0_146 = arith.constant 0 : index
    %c0_147 = arith.constant 0 : index
    %181 = vector.load %arg14[%c1_144, %c1_145, %c0_146, %c0_147] : memref<2x3x32x32xf32, #tpu.memory_space<vmem>>, vector<1x1x32x32xf32>
    %182 = vector.shape_cast %181 : vector<1x1x32x32xf32> to vector<32x32xf32>
    %c1_148 = arith.constant 1 : index
    %c2_149 = arith.constant 2 : index
    %c0_150 = arith.constant 0 : index
    %c0_151 = arith.constant 0 : index
    %183 = vector.load %arg14[%c1_148, %c2_149, %c0_150, %c0_151] : memref<2x3x32x32xf32, #tpu.memory_space<vmem>>, vector<1x1x32x32xf32>
    %184 = vector.shape_cast %183 : vector<1x1x32x32xf32> to vector<32x32xf32>
    %c1_152 = arith.constant 1 : index
    %c0_153 = arith.constant 0 : index
    %c0_154 = arith.constant 0 : index
    %c0_155 = arith.constant 0 : index
    %185 = vector.load %arg15[%c1_152, %c0_153, %c0_154, %c0_155] : memref<2x3x32x32xf32, #tpu.memory_space<vmem>>, vector<1x1x32x32xf32>
    %186 = vector.shape_cast %185 : vector<1x1x32x32xf32> to vector<32x32xf32>
    %c1_156 = arith.constant 1 : index
    %c1_157 = arith.constant 1 : index
    %c0_158 = arith.constant 0 : index
    %c0_159 = arith.constant 0 : index
    %187 = vector.load %arg15[%c1_156, %c1_157, %c0_158, %c0_159] : memref<2x3x32x32xf32, #tpu.memory_space<vmem>>, vector<1x1x32x32xf32>
    %188 = vector.shape_cast %187 : vector<1x1x32x32xf32> to vector<32x32xf32>
    %c1_160 = arith.constant 1 : index
    %c2_161 = arith.constant 2 : index
    %c0_162 = arith.constant 0 : index
    %c0_163 = arith.constant 0 : index
    %189 = vector.load %arg15[%c1_160, %c2_161, %c0_162, %c0_163] : memref<2x3x32x32xf32, #tpu.memory_space<vmem>>, vector<1x1x32x32xf32>
    %190 = vector.shape_cast %189 : vector<1x1x32x32xf32> to vector<32x32xf32>
    %c1_164 = arith.constant 1 : index
    %c0_165 = arith.constant 0 : index
    %c0_166 = arith.constant 0 : index
    %c0_167 = arith.constant 0 : index
    %191 = vector.load %arg16[%c1_164, %c0_165, %c0_166, %c0_167] : memref<2x3x1x32xf32, #tpu.memory_space<vmem>>, vector<1x1x1x32xf32>
    %192 = vector.shape_cast %191 : vector<1x1x1x32xf32> to vector<1x32xf32>
    %c1_168 = arith.constant 1 : index
    %c1_169 = arith.constant 1 : index
    %c0_170 = arith.constant 0 : index
    %c0_171 = arith.constant 0 : index
    %193 = vector.load %arg16[%c1_168, %c1_169, %c0_170, %c0_171] : memref<2x3x1x32xf32, #tpu.memory_space<vmem>>, vector<1x1x1x32xf32>
    %194 = vector.shape_cast %193 : vector<1x1x1x32xf32> to vector<1x32xf32>
    %c1_172 = arith.constant 1 : index
    %c2_173 = arith.constant 2 : index
    %c0_174 = arith.constant 0 : index
    %c0_175 = arith.constant 0 : index
    %195 = vector.load %arg16[%c1_172, %c2_173, %c0_174, %c0_175] : memref<2x3x1x32xf32, #tpu.memory_space<vmem>>, vector<1x1x1x32xf32>
    %196 = vector.shape_cast %195 : vector<1x1x1x32xf32> to vector<1x32xf32>
    %c1_176 = arith.constant 1 : index
    %c0_177 = arith.constant 0 : index
    %c0_178 = arith.constant 0 : index
    %c0_179 = arith.constant 0 : index
    %197 = vector.load %arg17[%c1_176, %c0_177, %c0_178, %c0_179] : memref<2x3x1x32xf32, #tpu.memory_space<vmem>>, vector<1x1x1x32xf32>
    %198 = vector.shape_cast %197 : vector<1x1x1x32xf32> to vector<1x32xf32>
    %c1_180 = arith.constant 1 : index
    %c1_181 = arith.constant 1 : index
    %c0_182 = arith.constant 0 : index
    %c0_183 = arith.constant 0 : index
    %199 = vector.load %arg17[%c1_180, %c1_181, %c0_182, %c0_183] : memref<2x3x1x32xf32, #tpu.memory_space<vmem>>, vector<1x1x1x32xf32>
    %200 = vector.shape_cast %199 : vector<1x1x1x32xf32> to vector<1x32xf32>
    %c1_184 = arith.constant 1 : index
    %c2_185 = arith.constant 2 : index
    %c0_186 = arith.constant 0 : index
    %c0_187 = arith.constant 0 : index
    %201 = vector.load %arg17[%c1_184, %c2_185, %c0_186, %c0_187] : memref<2x3x1x32xf32, #tpu.memory_space<vmem>>, vector<1x1x1x32xf32>
    %202 = vector.shape_cast %201 : vector<1x1x1x32xf32> to vector<1x32xf32>
    %cst_188 = arith.constant dense<0.000000e+00> : vector<8x32xf32>
    %203 = tpu.matmul %176, %180, %cst_188 {dimension_numbers = #tpu.dot_dimension_numbers<[1], [0], [0], [1], [0, 0, 1, 1], [], []>} : vector<8x32xf32>, vector<32x32xf32>, vector<8x32xf32> -> vector<8x32xf32>
    %204 = vector.broadcast %192 : vector<1x32xf32> to vector<8x32xf32>
    %205 = arith.addf %203, %204 : vector<8x32xf32>
    %cst_189 = arith.constant dense<0.000000e+00> : vector<8x32xf32>
    %206 = tpu.matmul %178, %186, %cst_189 {dimension_numbers = #tpu.dot_dimension_numbers<[1], [0], [0], [1], [0, 0, 1, 1], [], []>} : vector<8x32xf32>, vector<32x32xf32>, vector<8x32xf32> -> vector<8x32xf32>
    %207 = arith.addf %205, %206 : vector<8x32xf32>
    %208 = vector.broadcast %198 : vector<1x32xf32> to vector<8x32xf32>
    %209 = arith.addf %207, %208 : vector<8x32xf32>
    %210 = arith.negf %209 : vector<8x32xf32>
    %211 = math.exp %210 : vector<8x32xf32>
    %cst_190 = arith.constant 1.000000e+00 : f32
    %212 = vector.broadcast %cst_190 : f32 to vector<8x32xf32>
    %213 = arith.addf %212, %211 : vector<8x32xf32>
    %214 = arith.divf %212, %213 : vector<8x32xf32>
    %cst_191 = arith.constant dense<0.000000e+00> : vector<8x32xf32>
    %215 = tpu.matmul %176, %182, %cst_191 {dimension_numbers = #tpu.dot_dimension_numbers<[1], [0], [0], [1], [0, 0, 1, 1], [], []>} : vector<8x32xf32>, vector<32x32xf32>, vector<8x32xf32> -> vector<8x32xf32>
    %216 = vector.broadcast %194 : vector<1x32xf32> to vector<8x32xf32>
    %217 = arith.addf %215, %216 : vector<8x32xf32>
    %cst_192 = arith.constant dense<0.000000e+00> : vector<8x32xf32>
    %218 = tpu.matmul %178, %188, %cst_192 {dimension_numbers = #tpu.dot_dimension_numbers<[1], [0], [0], [1], [0, 0, 1, 1], [], []>} : vector<8x32xf32>, vector<32x32xf32>, vector<8x32xf32> -> vector<8x32xf32>
    %219 = arith.addf %217, %218 : vector<8x32xf32>
    %220 = vector.broadcast %200 : vector<1x32xf32> to vector<8x32xf32>
    %221 = arith.addf %219, %220 : vector<8x32xf32>
    %222 = arith.negf %221 : vector<8x32xf32>
    %223 = math.exp %222 : vector<8x32xf32>
    %cst_193 = arith.constant 1.000000e+00 : f32
    %224 = vector.broadcast %cst_193 : f32 to vector<8x32xf32>
    %225 = arith.addf %224, %223 : vector<8x32xf32>
    %226 = arith.divf %224, %225 : vector<8x32xf32>
    %cst_194 = arith.constant dense<0.000000e+00> : vector<8x32xf32>
    %227 = tpu.matmul %176, %184, %cst_194 {dimension_numbers = #tpu.dot_dimension_numbers<[1], [0], [0], [1], [0, 0, 1, 1], [], []>} : vector<8x32xf32>, vector<32x32xf32>, vector<8x32xf32> -> vector<8x32xf32>
    %228 = vector.broadcast %196 : vector<1x32xf32> to vector<8x32xf32>
    %229 = arith.addf %227, %228 : vector<8x32xf32>
    %cst_195 = arith.constant dense<0.000000e+00> : vector<8x32xf32>
    %230 = tpu.matmul %178, %190, %cst_195 {dimension_numbers = #tpu.dot_dimension_numbers<[1], [0], [0], [1], [0, 0, 1, 1], [], []>} : vector<8x32xf32>, vector<32x32xf32>, vector<8x32xf32> -> vector<8x32xf32>
    %231 = vector.broadcast %202 : vector<1x32xf32> to vector<8x32xf32>
    %232 = arith.addf %230, %231 : vector<8x32xf32>
    %233 = arith.mulf %214, %232 : vector<8x32xf32>
    %234 = arith.addf %229, %233 : vector<8x32xf32>
    %235 = math.tanh %234 : vector<8x32xf32>
    %cst_196 = arith.constant 1.000000e+00 : f32
    %236 = vector.broadcast %cst_196 : f32 to vector<8x32xf32>
    %237 = arith.subf %236, %226 : vector<8x32xf32>
    %238 = arith.mulf %237, %235 : vector<8x32xf32>
    %239 = arith.mulf %226, %178 : vector<8x32xf32>
    %240 = arith.addf %238, %239 : vector<8x32xf32>
    %c1_197 = arith.constant 1 : index
    %c0_198 = arith.constant 0 : index
    %c0_199 = arith.constant 0 : index
    %241 = vector.load %arg25[%c1_197, %c0_198, %c0_199] : memref<2x8x32xf32, #tpu.memory_space<vmem>>, vector<1x8x32xf32>
    %242 = vector.shape_cast %241 : vector<1x8x32xf32> to vector<8x32xf32>
    %243 = vector.shape_cast %240 : vector<8x32xf32> to vector<1x8x32xf32>
    tpu.vector_store %arg25[%c1_197, %c0_198, %c0_199], %243 {strides = array<i32>} : memref<2x8x32xf32, #tpu.memory_space<vmem>>, vector<1x8x32xf32>,
    %cst_200 = arith.constant 0.000000e+00 : f32
    %244 = vector.broadcast %cst_200 : f32 to vector<8x32xf32>
    %245 = arith.maximumf %240, %244 : vector<8x32xf32>
    %246 = arith.addf %176, %245 : vector<8x32xf32>
    %c0_201 = arith.constant 0 : index
    %c0_202 = arith.constant 0 : index
    %247 = vector.load %arg18[%c0_201, %c0_202] : memref<32x16xf32, #tpu.memory_space<vmem>>, vector<32x16xf32>
    %cst_203 = arith.constant dense<0.000000e+00> : vector<8x16xf32>
    %248 = tpu.matmul %246, %247, %cst_203 {dimension_numbers = #tpu.dot_dimension_numbers<[1], [0], [0], [1], [0, 0, 1, 1], [], []>} : vector<8x32xf32>, vector<32x16xf32>, vector<8x16xf32> -> vector<8x16xf32>
    %c0_204 = arith.constant 0 : index
    %c0_205 = arith.constant 0 : index
    %249 = vector.load %arg19[%c0_204, %c0_205] : memref<1x16xf32, #tpu.memory_space<vmem>>, vector<1x16xf32>
    %250 = vector.broadcast %249 : vector<1x16xf32> to vector<8x16xf32>
    %251 = arith.addf %248, %250 : vector<8x16xf32>
    %cst_206 = arith.constant dense<0xFF800000> : vector<8xf32>
    %252 = vector.multi_reduction <maximumf>, %251, %cst_206 [1] : vector<8x16xf32> to vector<8xf32>
    %253 = vector.shape_cast %252 : vector<8xf32> to vector<8x1xf32>
    %254 = vector.broadcast %253 : vector<8x1xf32> to vector<8x16xf32>
    %255 = arith.subf %251, %254 : vector<8x16xf32>
    %256 = math.exp %255 : vector<8x16xf32>
    %cst_207 = arith.constant dense<0.000000e+00> : vector<8xf32>
    %257 = vector.multi_reduction <add>, %256, %cst_207 [1] : vector<8x16xf32> to vector<8xf32>
    %258 = vector.shape_cast %257 : vector<8xf32> to vector<8x1xf32>
    %259 = tpu.reciprocal %258 {approx = true} : vector<8x1xf32> -> vector<8x1xf32>
    %260 = vector.broadcast %259 : vector<8x1xf32> to vector<8x16xf32>
    %261 = arith.mulf %256, %260 : vector<8x16xf32>
    %c0_208 = arith.constant 0 : index
    %c0_209 = arith.constant 0 : index
    %c0_210 = arith.constant 0 : index
    %262 = vector.load %arg20[%c0_208, %c0_209, %c0_210] : memref<1x8x16xf32, #tpu.memory_space<vmem>>, vector<1x8x16xf32>
    %263 = vector.shape_cast %262 : vector<1x8x16xf32> to vector<8x16xf32>
    %264 = vector.shape_cast %261 : vector<8x16xf32> to vector<1x8x16xf32>
    tpu.vector_store %arg20[%c0_208, %c0_209, %c0_210], %264 {strides = array<i32>} : memref<1x8x16xf32, #tpu.memory_space<vmem>>, vector<1x8x16xf32>,
    %c3_i32 = arith.constant 3 : i32
    %265 = arith.cmpi eq, %arg0, %c3_i32 : i32
    %266 = arith.extui %265 : i1 to i32
    %c0_i32_211 = arith.constant 0 : i32
    %267 = arith.cmpi ne, %266, %c0_i32_211 : i32
    scf.if %267 {
      %c0_212 = arith.constant 0 : index
      %c0_213 = arith.constant 0 : index
      %268 = vector.load %arg24[%c0_212, %c0_213] : memref<8x32xf32, #tpu.memory_space<vmem>>, vector<8x32xf32>
      %c0_214 = arith.constant 0 : index
      %c0_215 = arith.constant 0 : index
      %269 = vector.load %arg21[%c0_214, %c0_215] : memref<8x32xf32, #tpu.memory_space<vmem>>, vector<8x32xf32>
      tpu.vector_store %arg21[%c0_214, %c0_215], %268 {strides = array<i32>} : memref<8x32xf32, #tpu.memory_space<vmem>>, vector<8x32xf32>,
      %c0_216 = arith.constant 0 : index
      %c0_217 = arith.constant 0 : index
      %c0_218 = arith.constant 0 : index
      %270 = vector.load %arg25[%c0_216, %c0_217, %c0_218] : memref<2x8x32xf32, #tpu.memory_space<vmem>>, vector<2x8x32xf32>
      %c0_219 = arith.constant 0 : index
      %c0_220 = arith.constant 0 : index
      %c0_221 = arith.constant 0 : index
      %271 = vector.load %arg22[%c0_219, %c0_220, %c0_221] : memref<2x8x32xf32, #tpu.memory_space<vmem>>, vector<2x8x32xf32>
      tpu.vector_store %arg22[%c0_219, %c0_220, %c0_221], %270 {strides = array<i32>} : memref<2x8x32xf32, #tpu.memory_space<vmem>>, vector<2x8x32xf32>,
    } else {
    }
    return
  }
  func.func @transform_0(%arg0: i32) -> (i32, i32, i32) {
    %c0_i32 = arith.constant 0 : i32
    %c0_i32_0 = arith.constant 0 : i32
    %c0_i32_1 = arith.constant 0 : i32
    return %arg0, %c0_i32, %c0_i32_0 : i32, i32, i32
  }
  func.func @transform_1(%arg0: i32) -> (i32, i32) {
    %c0_i32 = arith.constant 0 : i32
    %c0_i32_0 = arith.constant 0 : i32
    %c0_i32_1 = arith.constant 0 : i32
    return %c0_i32, %c0_i32_0 : i32, i32
  }
  func.func @transform_2(%arg0: i32) -> (i32, i32, i32) {
    %c0_i32 = arith.constant 0 : i32
    %c0_i32_0 = arith.constant 0 : i32
    %c0_i32_1 = arith.constant 0 : i32
    %c0_i32_2 = arith.constant 0 : i32
    return %c0_i32, %c0_i32_0, %c0_i32_1 : i32, i32, i32
  }
  func.func @transform_3(%arg0: i32) -> (i32, i32, i32) {
    %c0_i32 = arith.constant 0 : i32
    %c0_i32_0 = arith.constant 0 : i32
    %c0_i32_1 = arith.constant 0 : i32
    %c0_i32_2 = arith.constant 0 : i32
    return %c0_i32, %c0_i32_0, %c0_i32_1 : i32, i32, i32
  }
  func.func @transform_4(%arg0: i32) -> (i32, i32, i32) {
    %c0_i32 = arith.constant 0 : i32
    %c0_i32_0 = arith.constant 0 : i32
    %c0_i32_1 = arith.constant 0 : i32
    %c0_i32_2 = arith.constant 0 : i32
    return %c0_i32, %c0_i32_0, %c0_i32_1 : i32, i32, i32
  }
  func.func @transform_5(%arg0: i32) -> (i32, i32, i32) {
    %c0_i32 = arith.constant 0 : i32
    %c0_i32_0 = arith.constant 0 : i32
    %c0_i32_1 = arith.constant 0 : i32
    %c0_i32_2 = arith.constant 0 : i32
    return %c0_i32, %c0_i32_0, %c0_i32_1 : i32, i32, i32
  }
  func.func @transform_6(%arg0: i32) -> (i32, i32, i32) {
    %c0_i32 = arith.constant 0 : i32
    %c0_i32_0 = arith.constant 0 : i32
    %c0_i32_1 = arith.constant 0 : i32
    %c0_i32_2 = arith.constant 0 : i32
    return %c0_i32, %c0_i32_0, %c0_i32_1 : i32, i32, i32
  }
  func.func @transform_7(%arg0: i32) -> (i32, i32, i32) {
    %c0_i32 = arith.constant 0 : i32
    %c0_i32_0 = arith.constant 0 : i32
    %c0_i32_1 = arith.constant 0 : i32
    %c0_i32_2 = arith.constant 0 : i32
    return %c0_i32, %c0_i32_0, %c0_i32_1 : i32, i32, i32
  }
  func.func @transform_8(%arg0: i32) -> (i32, i32) {
    %c0_i32 = arith.constant 0 : i32
    %c0_i32_0 = arith.constant 0 : i32
    %c0_i32_1 = arith.constant 0 : i32
    return %c0_i32, %c0_i32_0 : i32, i32
  }
  func.func @transform_9(%arg0: i32) -> (i32, i32) {
    %c0_i32 = arith.constant 0 : i32
    %c0_i32_0 = arith.constant 0 : i32
    %c0_i32_1 = arith.constant 0 : i32
    return %c0_i32, %c0_i32_0 : i32, i32
  }
  func.func @transform_10(%arg0: i32) -> (i32, i32) {
    %c0_i32 = arith.constant 0 : i32
    %c0_i32_0 = arith.constant 0 : i32
    %c0_i32_1 = arith.constant 0 : i32
    return %c0_i32, %c0_i32_0 : i32, i32
  }
  func.func @transform_11(%arg0: i32) -> (i32, i32) {
    %c0_i32 = arith.constant 0 : i32
    %c0_i32_0 = arith.constant 0 : i32
    %c0_i32_1 = arith.constant 0 : i32
    return %c0_i32, %c0_i32_0 : i32, i32
  }
  func.func @transform_12(%arg0: i32) -> (i32, i32) {
    %c0_i32 = arith.constant 0 : i32
    %c0_i32_0 = arith.constant 0 : i32
    %c0_i32_1 = arith.constant 0 : i32
    return %c0_i32, %c0_i32_0 : i32, i32
  }
  func.func @transform_13(%arg0: i32) -> (i32, i32, i32, i32) {
    %c0_i32 = arith.constant 0 : i32
    %c0_i32_0 = arith.constant 0 : i32
    %c0_i32_1 = arith.constant 0 : i32
    %c0_i32_2 = arith.constant 0 : i32
    %c0_i32_3 = arith.constant 0 : i32
    return %c0_i32, %c0_i32_0, %c0_i32_1, %c0_i32_2 : i32, i32, i32, i32
  }
  func.func @transform_14(%arg0: i32) -> (i32, i32, i32, i32) {
    %c0_i32 = arith.constant 0 : i32
    %c0_i32_0 = arith.constant 0 : i32
    %c0_i32_1 = arith.constant 0 : i32
    %c0_i32_2 = arith.constant 0 : i32
    %c0_i32_3 = arith.constant 0 : i32
    return %c0_i32, %c0_i32_0, %c0_i32_1, %c0_i32_2 : i32, i32, i32, i32
  }
  func.func @transform_15(%arg0: i32) -> (i32, i32, i32, i32) {
    %c0_i32 = arith.constant 0 : i32
    %c0_i32_0 = arith.constant 0 : i32
    %c0_i32_1 = arith.constant 0 : i32
    %c0_i32_2 = arith.constant 0 : i32
    %c0_i32_3 = arith.constant 0 : i32
    return %c0_i32, %c0_i32_0, %c0_i32_1, %c0_i32_2 : i32, i32, i32, i32
  }
  func.func @transform_16(%arg0: i32) -> (i32, i32, i32, i32) {
    %c0_i32 = arith.constant 0 : i32
    %c0_i32_0 = arith.constant 0 : i32
    %c0_i32_1 = arith.constant 0 : i32
    %c0_i32_2 = arith.constant 0 : i32
    %c0_i32_3 = arith.constant 0 : i32
    return %c0_i32, %c0_i32_0, %c0_i32_1, %c0_i32_2 : i32, i32, i32, i32
  }
  func.func @transform_17(%arg0: i32) -> (i32, i32) {
    %c0_i32 = arith.constant 0 : i32
    %c0_i32_0 = arith.constant 0 : i32
    %c0_i32_1 = arith.constant 0 : i32
    return %c0_i32, %c0_i32_0 : i32, i32
  }
  func.func @transform_18(%arg0: i32) -> (i32, i32) {
    %c0_i32 = arith.constant 0 : i32
    %c0_i32_0 = arith.constant 0 : i32
    %c0_i32_1 = arith.constant 0 : i32
    return %c0_i32, %c0_i32_0 : i32, i32
  }
  func.func @transform_19(%arg0: i32) -> (i32, i32, i32) {
    %c0_i32 = arith.constant 0 : i32
    %c0_i32_0 = arith.constant 0 : i32
    %c0_i32_1 = arith.constant 0 : i32
    return %arg0, %c0_i32, %c0_i32_0 : i32, i32, i32
  }
  func.func @transform_20(%arg0: i32) -> (i32, i32) {
    %c0_i32 = arith.constant 0 : i32
    %c0_i32_0 = arith.constant 0 : i32
    %c0_i32_1 = arith.constant 0 : i32
    return %c0_i32, %c0_i32_0 : i32, i32
  }
  func.func @transform_21(%arg0: i32) -> (i32, i32, i32) {
    %c0_i32 = arith.constant 0 : i32
    %c0_i32_0 = arith.constant 0 : i32
    %c0_i32_1 = arith.constant 0 : i32
    %c0_i32_2 = arith.constant 0 : i32
    return %c0_i32, %c0_i32_0, %c0_i32_1 : i32, i32, i32
  }
  func.func @transform_22(%arg0: i32) -> (i32, i32, i32) {
    %c0_i32 = arith.constant 0 : i32
    %c0_i32_0 = arith.constant 0 : i32
    %c0_i32_1 = arith.constant 0 : i32
    return %arg0, %c0_i32, %c0_i32_0 : i32, i32, i32
  }
}

</mosaic_0001>

<bundles_post_ra>
// kernel: tpu_custom_call.1
= control target key start
LH: loop header
LB: loop body
LE: loop exit
PB: predicated region body
PF: predicated region fallthrough
CT: control target
= control target key end

     0   :  { %s6505_s0 = inlined_call_operand.hbm [shape: f32[4,8,32], index: 0, kind: input, shape index: {}]   ;;  %s6506_s1 = inlined_call_operand.hbm [shape: f32[8,32], index: 1, kind: input, shape index: {}]   ;;  %s6507_s2 = inlined_call_operand.hbm [shape: f32[2,8,32], index: 2, kind: input, shape index: {}]   ;;  %s6508_s3 = inlined_call_operand.hbm [shape: f32[8,8,32], index: 3, kind: input, shape index: {}]   ;;  %s6509_s4 = inlined_call_operand.hbm [shape: f32[3,32,32], index: 4, kind: input, shape index: {}]   ;;  %s6510_s5 = inlined_call_operand.hbm [shape: f32[3,32,32], index: 5, kind: input, shape index: {}]   ;;  %s6511_s6 = inlined_call_operand.hbm [shape: f32[3,1,32], index: 6, kind: input, shape index: {}]   ;;  %s6512_s7 = inlined_call_operand.hbm [shape: f32[3,1,32], index: 7, kind: input, shape index: {}]   ;;  %s6513_s8 = inlined_call_operand.hbm [shape: f32[32,32], index: 8, kind: input, shape index: {}]   ;;  %s6514_s9 = inlined_call_operand.hbm [shape: f32[32,32], index: 9, kind: input, shape index: {}]   ;;  %s6515_s10 = inlined_call_operand.hbm [shape: f32[1,32], index: 10, kind: input, shape index: {}]   ;;  %s6516_s11 = inlined_call_operand.vmem [shape: f32[64,32], index: 11, kind: input, shape index: {}]   ;;  %s6517_s12 = inlined_call_operand.hbm [shape: f32[1,32], index: 12, kind: input, shape index: {}]   ;;  %s6518_s13 = inlined_call_operand.vmem [shape: f32[2,3,32,32], index: 13, kind: input, shape index: {}]   ;;  %s6519_s14 = inlined_call_operand.hbm [shape: f32[2,3,32,32], index: 14, kind: input, shape index: {}]   ;;  %s6520_s15 = inlined_call_operand.hbm [shape: f32[2,3,1,32], index: 15, kind: input, shape index: {}]   ;;  %s6521_s16 = inlined_call_operand.hbm [shape: f32[2,3,1,32], index: 16, kind: input, shape index: {}]   ;;  %s6522_s17 = inlined_call_operand.vmem [shape: f32[32,16], index: 17, kind: input, shape index: {}]   ;;  %s6523_s18 = inlined_call_operand.vmem [shape: f32[1,16], index: 18, kind: input, shape index: {}]   ;;  %s6524_s19 = inlined_call_operand.hbm [shape: f32[4,8,16], index: 19, kind: output, shape index: {0}]   ;;  %s6525_s20 = inlined_call_operand.hbm [shape: f32[8,32], index: 20, kind: output, shape index: {1}]   ;;  %s6526_s21 = inlined_call_operand.hbm [shape: f32[2,8,32], index: 21, kind: output, shape index: {2}]   ;;  %s6527_s22 = inlined_call_operand.hbm [shape: f32[4,8,8], index: 22, kind: output, shape index: {3}]  }
   0x1   :  { %6567 = sst [smem:[#allocation47_spill]] %s6505_s0 }
   0x2   :  { %6568 = sst [smem:[#allocation48_spill]] %s6506_s1 }
   0x3   :  { %6569 = sst [smem:[#allocation49_spill]] %s6507_s2 }
   0x4   :  { %6570 = sst [smem:[#allocation50_spill]] %s6508_s3 }
   0x5   :  { %6571 = sst [smem:[#allocation51_spill]] %s6509_s4 }
   0x6   :  { %6572 = sst [smem:[#allocation52_spill]] %s6510_s5 }
   0x7   :  { %6573 = sst [smem:[#allocation53_spill]] %s6511_s6 }
   0x8   :  { %6574 = sst [smem:[#allocation54_spill]] %s6512_s7 }
   0x9   :  { %6575 = sst [smem:[#allocation55_spill]] %s6513_s8 }
   0xa   :  { %6576 = sst [smem:[#allocation56_spill]] %s6514_s9 }
   0xb   :  { %6577 = sst [smem:[#allocation57_spill]] %s6515_s10 }
   0xc   :  { %6578 = sst [smem:[#allocation58_spill]] %s6516_s11 }
   0xd   :  { %6579 = sst [smem:[#allocation59_spill]] %s6517_s12 }
   0xe   :  { %6580 = sst [smem:[#allocation60_spill]] %s6518_s13 }
   0xf   :  { %6581 = sst [smem:[#allocation61_spill]] %s6519_s14 }
  0x10   :  { %6582 = sst [smem:[#allocation62_spill]] %s6520_s15 }
  0x11   :  { %6583 = sst [smem:[#allocation63_spill]] %s6521_s16 }
  0x12   :  { %6584 = sst [smem:[#allocation64_spill]] %s6522_s17 }
  0x13   :  { %6585 = sst [smem:[#allocation65_spill]] %s6523_s18 }
  0x14   :  { %6586 = sst [smem:[#allocation66_spill]] %s6524_s19 }
  0x15   :  { %6587 = sst [smem:[#allocation67_spill]] %s6525_s20 }
  0x16   :  { %6588 = sst [smem:[#allocation68_spill]] %s6526_s21 }
  0x17   :  { %6589 = sst [smem:[#allocation69_spill]] %s6527_s22 }
  0x18   :  { %28 = vsyncpa [#allocation6], 0 }
  0x19   :  { %30 = vsyncpa [#allocation6 + $0x1], 0 }
  0x1a   :  { %31 = vsyncpa [#allocation9], 0 }
  0x1b   :  { %32 = vsyncpa [#allocation12], 0 }
  0x1c   :  { %33 = vsyncpa [#allocation15], 0 }
  0x1d   :  { %34 = vsyncpa [#allocation18], 0 }
  0x1e   :  { %35 = vsyncpa [#allocation21], 0 }
  0x1f   :  { %36 = vsyncpa [#allocation24], 0 }
  0x20   :  { %37 = vsyncpa [#allocation27], 0 }
  0x21   :  { %38 = vsyncpa [#allocation7], 0 }
  0x22   :  { %40 = vsyncpa [#allocation7 + $0x1], 0 }
  0x23   :  { %41 = vsyncpa [#allocation31], 0 }
  0x24   :  { %42 = vsyncpa [#allocation34], 0 }
  0x25   :  { %44 = vsyncpa [#allocation34 + $0x1], 0  ;;  %s5499_s3 = smov 0   ;;  %s5501_s28 = smov 0  }
  0x26   :  { %s5503_s29 = smov 0   ;;  %s5505_s30 = smov 0  }
  0x27 LB: > { %s5353_s4 = smov [#allocation8]   ;;  %s5520_s23 = sadd.s32 4294967295, %s5351_s30   ;;  %s5351_s30 = sphi %s5505_s30, %s6660_s30   ;;  %s5347_s29 = sphi %s5503_s29, %s6659_s29   ;;  %s5343_s28 = sphi %s5501_s28, %s6658_s28   ;;  %s5339_s3 = sphi %s5499_s3, %s6657_s3  }
  0x28   : > { %s566_s0 = sshll.u32 %s5353_s4, 4  ;;  %p3811_p0 = scmp.ge.s32.totalorder %s5351_s30, 1  ;;  %s567_s0 = int_to_ptr.vmem [resolvable:$true] %s566_s0 }
  0x29   : > { %p6539_p1 = scmp.eq.s32.totalorder %s5520_s23, 0  ;;  %p553_p2 = scmp.lt.s32.totalorder %s5351_s30, 5 }
  0x2a   : > { %s5354_s5 = smov [#allocation11]   ;;  %s5355_s25 = smov [#allocation14]  }
  0x2b   : > { %p5526_p4 = pnand %p3811_p0, %p553_p2  ;;  %s589_s24 = sshll.u32 %s5354_s5, 4  ;;  %s5538_s24 = int_to_ptr.vmem [resolvable:$true] %s589_s24 }
  0x2c   : > { %s615_s26 = sshll.u32 %s5355_s25, 4  ;;  %s6593_s4 = sld [smem:[#allocation48_spill]]  ;;  %s5540_s26 = int_to_ptr.vmem [resolvable:$true] %s615_s26 }
  0x2d   : > { %s6590_s1 = scalar_select %p5526_p4, 1, 0 }
  0x2e   : > { %p4529_p5 = pneg %p5526_p4 }
  0x2f   : > { %6591 = sst [smem:[#allocation46_spill]] %s6590_s1 }
  0x30   : > { %p5534_p6 = pnand %p4529_p5, %p6539_p1 }
  0x32   : > { %s4747_s22 = scalar_lea.hbm %s6593_s4, 128  ;;  %p5550_p8 = pneg %p5534_p6 }
  0x33   : > { %p4748_p7 = scmp.ne.s32.totalorder %s6593_s4, %s4747_s22  ;;  %p4754_p11 = scmp.lt.u32.totalorder %s4747_s22, %s6593_s4 }
  0x35   : > { %p4750_p9 = pnand %p5550_p8, %p4748_p7 }
  0x37   : > { %p4751_p10 = pneg %p4750_p9 }
  0x39   : > { %p4756_p12 = pnand %p4754_p11, %p4751_p10 }
  0x3b   : > { %4759 = shalt.err (!%p4756_p12)
}
  0x3c   : > { %s4760_s2 = scalar_lea.vmem %s567_s0, 128  ;;  %p4768_p5 = scmp.lt.s32.totalorder %s567_s0, %s567_s0 }
  0x3d   : > { %p4761_p13 = scmp.ne.s32.totalorder %s567_s0, %s4760_s2  ;;  %p4769_p3 = scmp.lt.s32.totalorder %s4760_s2, %s4760_s2 }
  0x3f   : > { %p4763_p0 = pnand %p4761_p13, %p5550_p8  ;;  %p4770_p1 = por %p4769_p3, %p4768_p5 }
  0x41   : > { %p4764_p2 = pneg %p4763_p0 }
  0x43   : > { %p4771_p4 = pnand %p4770_p1, %p4764_p2 }
  0x45   : > { %4774 = shalt.err (!%p4771_p4)
}
  0x46   : > { %4532 = dma.hbm_to_vmem [thread:$0]  (!%p5534_p6), %s6593_s4, 128, %s567_s0, [#allocation9]  }
  0x47   : > { %s6595_s27 = sld [smem:[#allocation50_spill]] }
  0x4d   : > { %s4775_s25 = scalar_lea.hbm %s6595_s27, 1024 }
  0x4e   : > { %p4776_p7 = scmp.ne.s32.totalorder %s6595_s27, %s4775_s25  ;;  %p4782_p1 = scmp.lt.u32.totalorder %s4775_s25, %s6595_s27 }
  0x50   : > { %p4778_p9 = pnand %p4776_p7, %p5550_p8 }
  0x52   : > { %p4779_p3 = pneg %p4778_p9 }
  0x54   : > { %p4784_p4 = pnand %p4782_p1, %p4779_p3 }
  0x56   : > { %4787 = shalt.err (!%p4784_p4)
}
  0x57   : > { %s4788_s0 = scalar_lea.vmem %s5538_s24, 1024  ;;  %p4796_p13 = scmp.lt.s32.totalorder %s5538_s24, %s5538_s24 }
  0x58   : > { %p4789_p10 = scmp.ne.s32.totalorder %s5538_s24, %s4788_s0  ;;  %p4797_p0 = scmp.lt.s32.totalorder %s4788_s0, %s4788_s0 }
  0x5a   : > { %p4791_p11 = pnand %p4789_p10, %p5550_p8  ;;  %p4798_p2 = por %p4797_p0, %p4796_p13 }
  0x5c   : > { %p4792_p12 = pneg %p4791_p11 }
  0x5e   : > { %p4799_p5 = pnand %p4798_p2, %p4792_p12 }
  0x60   : > { %4802 = shalt.err (!%p4799_p5)
}
  0x61   : > { %s6551_s17 = smov 128   ;;  %s6553_s13 = smov 8  }
  0x62   : > { %4538 = dma.hbm_to_vmem [thread:$0]  (!%p5534_p6), %s6595_s27, 1024, %s5538_s24, [#allocation12], %s6551_s17, %s6551_s17, %s6553_s13  }
  0x63   : > { %s6596_s22 = sld [smem:[#allocation52_spill]] }
  0x69   : > { %s4803_s25 = scalar_lea.hbm %s6596_s22, 1536 }
  0x6a   : > { %p4804_p7 = scmp.ne.s32.totalorder %s6596_s22, %s4803_s25  ;;  %p4810_p1 = scmp.lt.u32.totalorder %s4803_s25, %s6596_s22 }
  0x6c   : > { %p4806_p9 = pnand %p4804_p7, %p5550_p8 }
  0x6e   : > { %p4807_p3 = pneg %p4806_p9 }
  0x70   : > { %p4812_p4 = pnand %p4810_p1, %p4807_p3 }
  0x72   : > { %4815 = shalt.err (!%p4812_p4)
}
  0x73   : > { %s4816_s24 = scalar_lea.vmem %s5540_s26, 1536  ;;  %p4824_p13 = scmp.lt.s32.totalorder %s5540_s26, %s5540_s26 }
  0x74   : > { %p4817_p10 = scmp.ne.s32.totalorder %s5540_s26, %s4816_s24  ;;  %p4825_p0 = scmp.lt.s32.totalorder %s4816_s24, %s4816_s24 }
  0x76   : > { %p4819_p11 = pnand %p4817_p10, %p5550_p8  ;;  %p4826_p2 = por %p4825_p0, %p4824_p13 }
  0x78   : > { %p4820_p12 = pneg %p4819_p11 }
  0x7a   : > { %p4827_p5 = pnand %p4826_p2, %p4820_p12 }
  0x7c   : > { %4830 = shalt.err (!%p4827_p5)
}
  0x7d   : > { %4544 = dma.hbm_to_vmem [thread:$0]  (!%p5534_p6), %s6596_s22, 1536, %s5540_s26, [#allocation15], %s6551_s17, %s6551_s17, %s6553_s13  }
  0x7e   : > { %s5358_s18 = smov [#allocation17]   ;;  %s5359_s21 = smov [#allocation20]  }
  0x7f   : > { %s641_s20 = sshll.u32 %s5358_s18, 4  ;;  %s667_s19 = sshll.u32 %s5359_s21, 4  ;;  %s642_s20 = int_to_ptr.vmem [resolvable:$true] %s641_s20  ;;  %s668_s19 = int_to_ptr.vmem [resolvable:$true] %s667_s19 }
  0x80   : > { %s6597_s7 = sld [smem:[#allocation54_spill]] }
  0x86   : > { %s4831_s0 = scalar_lea.hbm %s6597_s7, 48 }
  0x87   : > { %p4832_p7 = scmp.ne.s32.totalorder %s6597_s7, %s4831_s0  ;;  %p4838_p1 = scmp.lt.u32.totalorder %s4831_s0, %s6597_s7 }
  0x89   : > { %p4834_p9 = pnand %p4832_p7, %p5550_p8 }
  0x8b   : > { %p4835_p3 = pneg %p4834_p9 }
  0x8d   : > { %p4840_p4 = pnand %p4838_p1, %p4835_p3 }
  0x8f   : > { %4843 = shalt.err (!%p4840_p4)
}
  0x90   : > { %s4844_s26 = scalar_lea.vmem %s642_s20, 48  ;;  %s4851_s4 = scalar_lea.vmem %s642_s20, 64 }
  0x91   : > { %p4845_p10 = scmp.ne.s32.totalorder %s642_s20, %s4844_s26  ;;  %p4852_p13 = scmp.lt.s32.totalorder %s642_s20, %s642_s20 }
  0x92   : > { %p4853_p0 = scmp.lt.s32.totalorder %s4851_s4, %s4844_s26 }
  0x93   : > { %p4847_p11 = pnand %p4845_p10, %p5550_p8 }
  0x94   : > { %p4854_p2 = por %p4853_p0, %p4852_p13 }
  0x95   : > { %p4848_p12 = pneg %p4847_p11 }
  0x97   : > { %p4855_p5 = pnand %p4854_p2, %p4848_p12 }
  0x99   : > { %4858 = shalt.err (!%p4855_p5)
}
  0x9a   : > { %s6547_s27 = smov 16   ;;  %s6549_s18 = smov 1  }
  0x9b   : > { %4550 = dma.hbm_to_vmem [thread:$0]  (!%p5534_p6), %s6597_s7, 48, %s642_s20, [#allocation18], %s6547_s27, %s6547_s27, %s6549_s18  }
  0x9c   : > { %s6598_s9 = sld [smem:[#allocation56_spill]] }
  0xa2   : > { %s4859_s0 = scalar_lea.hbm %s6598_s9, 512 }
  0xa3   : > { %p4860_p7 = scmp.ne.s32.totalorder %s6598_s9, %s4859_s0  ;;  %p4866_p1 = scmp.lt.u32.totalorder %s4859_s0, %s6598_s9 }
  0xa5   : > { %p4862_p9 = pnand %p4860_p7, %p5550_p8 }
  0xa7   : > { %p4863_p3 = pneg %p4862_p9 }
  0xa9   : > { %p4868_p4 = pnand %p4866_p1, %p4863_p3 }
  0xab   : > { %4871 = shalt.err (!%p4868_p4)
}
  0xac   : > { %s4872_s1 = scalar_lea.vmem %s668_s19, 512  ;;  %p4880_p13 = scmp.lt.s32.totalorder %s668_s19, %s668_s19 }
  0xad   : > { %p4873_p10 = scmp.ne.s32.totalorder %s668_s19, %s4872_s1  ;;  %p4881_p0 = scmp.lt.s32.totalorder %s4872_s1, %s4872_s1 }
  0xaf   : > { %p4875_p11 = pnand %p4873_p10, %p5550_p8  ;;  %p4882_p2 = por %p4881_p0, %p4880_p13 }
  0xb1   : > { %p4876_p12 = pneg %p4875_p11 }
  0xb3   : > { %p4883_p5 = pnand %p4882_p2, %p4876_p12 }
  0xb5   : > { %4886 = shalt.err (!%p4883_p5)
}
  0xb6   : > { %4556 = dma.hbm_to_vmem [thread:$0]  (!%p5534_p6), %s6598_s9, 512, %s668_s19, [#allocation21], %s6551_s17, %s6551_s17, %s6553_s13  }
  0xb7   : > { %s5362_s25 = smov [#allocation23]   ;;  %s5363_s0 = smov [#allocation26]  }
  0xb8   : > { %s695_s2 = sshll.u32 %s5362_s25, 4  ;;  %s721_s24 = sshll.u32 %s5363_s0, 4  ;;  %s696_s2 = int_to_ptr.vmem [resolvable:$true] %s695_s2  ;;  %s722_s24 = int_to_ptr.vmem [resolvable:$true] %s721_s24 }
  0xb9   : > { %s6599_s12 = sld [smem:[#allocation59_spill]] }
  0xbf   : > { %s4887_s4 = scalar_lea.hbm %s6599_s12, 16 }
  0xc0   : > { %p4888_p7 = scmp.ne.s32.totalorder %s6599_s12, %s4887_s4  ;;  %p4894_p1 = scmp.lt.u32.totalorder %s4887_s4, %s6599_s12 }
  0xc2   : > { %p4890_p9 = pnand %p4888_p7, %p5550_p8 }
  0xc4   : > { %p4891_p3 = pneg %p4890_p9 }
  0xc6   : > { %p4896_p4 = pnand %p4894_p1, %p4891_p3 }
  0xc8   : > { %4899 = shalt.err (!%p4896_p4)
}
  0xc9   : > { %s4900_s19 = scalar_lea.vmem %s696_s2, 16  ;;  %s4907_s21 = scalar_lea.vmem %s696_s2, 32 }
  0xca   : > { %p4901_p10 = scmp.ne.s32.totalorder %s696_s2, %s4900_s19  ;;  %p4908_p13 = scmp.lt.s32.totalorder %s696_s2, %s696_s2 }
  0xcb   : > { %p4909_p0 = scmp.lt.s32.totalorder %s4907_s21, %s4900_s19 }
  0xcc   : > { %p4903_p11 = pnand %p4901_p10, %p5550_p8 }
  0xcd   : > { %p4910_p2 = por %p4909_p0, %p4908_p13 }
  0xce   : > { %p4904_p12 = pneg %p4903_p11 }
  0xd0   : > { %p4911_p5 = pnand %p4910_p2, %p4904_p12 }
  0xd2   : > { %4914 = shalt.err (!%p4911_p5)
}
  0xd3   : > { %4562 = dma.hbm_to_vmem [thread:$0]  (!%p5534_p6), %s6599_s12, 16, %s696_s2, [#allocation24]  }
  0xd4   : > { %s6600_s15 = sld [smem:[#allocation62_spill]] }
  0xda   : > { %s4915_s11 = scalar_lea.hbm %s6600_s15, 96 }
  0xdb   : > { %p4916_p7 = scmp.ne.s32.totalorder %s6600_s15, %s4915_s11  ;;  %p4922_p1 = scmp.lt.u32.totalorder %s4915_s11, %s6600_s15 }
  0xdd   : > { %p4918_p9 = pnand %p4916_p7, %p5550_p8 }
  0xdf   : > { %p4919_p3 = pneg %p4918_p9 }
  0xe1   : > { %p4924_p4 = pnand %p4922_p1, %p4919_p3 }
  0xe3   : > { %4927 = shalt.err (!%p4924_p4)
}
  0xe4   : > { %s4928_s19 = scalar_lea.vmem %s722_s24, 96  ;;  %p4936_p13 = scmp.lt.s32.totalorder %s722_s24, %s722_s24 }
  0xe5   : > { %p4929_p10 = scmp.ne.s32.totalorder %s722_s24, %s4928_s19  ;;  %p4937_p0 = scmp.lt.s32.totalorder %s4928_s19, %s4928_s19 }
  0xe7   : > { %p4931_p11 = pnand %p4929_p10, %p5550_p8  ;;  %p4938_p2 = por %p4937_p0, %p4936_p13 }
  0xe9   : > { %p4932_p12 = pneg %p4931_p11 }
  0xeb   : > { %p4939_p5 = pnand %p4938_p2, %p4932_p12 }
  0xed   : > { %4942 = shalt.err (!%p4939_p5)
}
  0xee   : > { %s6601_s2 = smov 1   ;;  %s6602_s21 = smov 16  }
  0xef   : > { %4568 = dma.hbm_to_vmem [thread:$0]  (!%p5534_p6), %s6600_s15, 96, %s722_s24, [#allocation27], %s6602_s21, %s6602_s21, %s6601_s2  }
  0xf0   : > { %s5364_s18 = smov [#allocation10]   ;;  %s5365_s11 = smov [#allocation13]  }
  0xf1   : > { %s576_s0 = sshll.u32 %s5364_s18, 4  ;;  %s602_s26 = sshll.u32 %s5365_s11, 4  ;;  %s577_s0 = int_to_ptr.vmem [resolvable:$true] %s576_s0  ;;  %s603_s26 = int_to_ptr.vmem [resolvable:$true] %s602_s26 }
  0xf2   : > { %s6603_s20 = sld [smem:[#allocation49_spill]] }
  0xf8   : > { %s4943_s19 = scalar_lea.hbm %s6603_s20, 256 }
  0xf9   : > { %p4944_p7 = scmp.ne.s32.totalorder %s6603_s20, %s4943_s19  ;;  %p4950_p1 = scmp.lt.u32.totalorder %s4943_s19, %s6603_s20 }
  0xfb   : > { %p4946_p9 = pnand %p4944_p7, %p5550_p8 }
  0xfd   : > { %p4947_p3 = pneg %p4946_p9 }
  0xff   : > { %p4952_p4 = pnand %p4950_p1, %p4947_p3 }
 0x101   : > { %4955 = shalt.err (!%p4952_p4)
}
 0x102   : > { %s4956_s24 = scalar_lea.vmem %s577_s0, 256  ;;  %p4964_p13 = scmp.lt.s32.totalorder %s577_s0, %s577_s0 }
 0x103   : > { %p4957_p10 = scmp.ne.s32.totalorder %s577_s0, %s4956_s24  ;;  %p4965_p0 = scmp.lt.s32.totalorder %s4956_s24, %s4956_s24 }
 0x105   : > { %p4959_p11 = pnand %p4957_p10, %p5550_p8  ;;  %p4966_p2 = por %p4965_p0, %p4964_p13 }
 0x107   : > { %p4960_p12 = pneg %p4959_p11 }
 0x109   : > { %p4967_p5 = pnand %p4966_p2, %p4960_p12 }
 0x10b   : > { %4970 = shalt.err (!%p4967_p5)
}
 0x10c   : > { %s6604_s17 = smov 8   ;;  %s6605_s13 = smov 128  }
 0x10d   : > { %4535 = dma.hbm_to_vmem [thread:$0]  (!%p5534_p6), %s6603_s20, 256, %s577_s0, [#allocation9], %s6605_s13, %s6605_s13, %s6604_s17  }
 0x10e   : > { %s6606_s4 = sld [smem:[#allocation51_spill]] }
 0x114   : > { %s4971_s1 = scalar_lea.hbm %s6606_s4, 1536 }
 0x115   : > { %p4972_p7 = scmp.ne.s32.totalorder %s6606_s4, %s4971_s1  ;;  %p4978_p1 = scmp.lt.u32.totalorder %s4971_s1, %s6606_s4 }
 0x117   : > { %p4974_p9 = pnand %p4972_p7, %p5550_p8 }
 0x119   : > { %p4975_p3 = pneg %p4974_p9 }
 0x11b   : > { %p4980_p4 = pnand %p4978_p1, %p4975_p3 }
 0x11d   : > { %4983 = shalt.err (!%p4980_p4)
}
 0x11e   : > { %s4984_s7 = scalar_lea.vmem %s603_s26, 1536  ;;  %p4992_p13 = scmp.lt.s32.totalorder %s603_s26, %s603_s26 }
 0x11f   : > { %p4985_p10 = scmp.ne.s32.totalorder %s603_s26, %s4984_s7  ;;  %p4993_p0 = scmp.lt.s32.totalorder %s4984_s7, %s4984_s7 }
 0x121   : > { %p4987_p11 = pnand %p4985_p10, %p5550_p8  ;;  %p4994_p2 = por %p4993_p0, %p4992_p13 }
 0x123   : > { %p4988_p12 = pneg %p4987_p11 }
 0x125   : > { %p4995_p5 = pnand %p4994_p2, %p4988_p12 }
 0x127   : > { %4998 = shalt.err (!%p4995_p5)
}
 0x128   : > { %4541 = dma.hbm_to_vmem [thread:$0]  (!%p5534_p6), %s6606_s4, 1536, %s603_s26, [#allocation12], %s6605_s13, %s6605_s13, %s6604_s17  }
 0x129   : > { %s5366_s25 = smov [#allocation16]   ;;  %s5367_s11 = smov [#allocation19]  }
 0x12a   : > { %s628_s18 = sshll.u32 %s5366_s25, 4  ;;  %s654_s1 = sshll.u32 %s5367_s11, 4  ;;  %s629_s18 = int_to_ptr.vmem [resolvable:$true] %s628_s18  ;;  %s655_s1 = int_to_ptr.vmem [resolvable:$true] %s654_s1 }
 0x12b   : > { %s6607_s24 = sld [smem:[#allocation53_spill]] }
 0x131   : > { %s4999_s7 = scalar_lea.hbm %s6607_s24, 48 }
 0x132   : > { %p5000_p7 = scmp.ne.s32.totalorder %s6607_s24, %s4999_s7  ;;  %p5006_p1 = scmp.lt.u32.totalorder %s4999_s7, %s6607_s24 }
 0x134   : > { %p5002_p9 = pnand %p5000_p7, %p5550_p8 }
 0x136   : > { %p5003_p3 = pneg %p5002_p9 }
 0x138   : > { %p5008_p4 = pnand %p5006_p1, %p5003_p3 }
 0x13a   : > { %5011 = shalt.err (!%p5008_p4)
}
 0x13b   : > { %s5012_s26 = scalar_lea.vmem %s629_s18, 48  ;;  %s5019_s0 = scalar_lea.vmem %s629_s18, 64 }
 0x13c   : > { %p5013_p10 = scmp.ne.s32.totalorder %s629_s18, %s5012_s26  ;;  %p5020_p13 = scmp.lt.s32.totalorder %s629_s18, %s629_s18 }
 0x13d   : > { %p5021_p0 = scmp.lt.s32.totalorder %s5019_s0, %s5012_s26 }
 0x13e   : > { %p5015_p11 = pnand %p5013_p10, %p5550_p8 }
 0x13f   : > { %p5022_p2 = por %p5021_p0, %p5020_p13 }
 0x140   : > { %p5016_p12 = pneg %p5015_p11 }
 0x142   : > { %p5023_p5 = pnand %p5022_p2, %p5016_p12 }
 0x144   : > { %5026 = shalt.err (!%p5023_p5)
}
 0x145   : > { %4547 = dma.hbm_to_vmem [thread:$0]  (!%p5534_p6), %s6607_s24, 48, %s629_s18, [#allocation15], %s6602_s21, %s6602_s21, %s6601_s2  }
 0x146   : > { %s6608_s8 = sld [smem:[#allocation55_spill]] }
 0x14c   : > { %s5027_s11 = scalar_lea.hbm %s6608_s8, 512 }
 0x14d   : > { %p5028_p7 = scmp.ne.s32.totalorder %s6608_s8, %s5027_s11  ;;  %p5034_p1 = scmp.lt.u32.totalorder %s5027_s11, %s6608_s8 }
 0x14f   : > { %p5030_p9 = pnand %p5028_p7, %p5550_p8 }
 0x151   : > { %p5031_p3 = pneg %p5030_p9 }
 0x153   : > { %p5036_p4 = pnand %p5034_p1, %p5031_p3 }
 0x155   : > { %5039 = shalt.err (!%p5036_p4)
}
 0x156   : > { %s5040_s26 = scalar_lea.vmem %s655_s1, 512  ;;  %p5048_p13 = scmp.lt.s32.totalorder %s655_s1, %s655_s1 }
 0x157   : > { %p5041_p10 = scmp.ne.s32.totalorder %s655_s1, %s5040_s26  ;;  %p5049_p0 = scmp.lt.s32.totalorder %s5040_s26, %s5040_s26 }
 0x159   : > { %p5043_p11 = pnand %p5041_p10, %p5550_p8  ;;  %p5050_p2 = por %p5049_p0, %p5048_p13 }
 0x15b   : > { %p5044_p12 = pneg %p5043_p11 }
 0x15d   : > { %p5051_p5 = pnand %p5050_p2, %p5044_p12 }
 0x15f   : > { %5054 = shalt.err (!%p5051_p5)
}
 0x160   : > { %4553 = dma.hbm_to_vmem [thread:$0]  (!%p5534_p6), %s6608_s8, 512, %s655_s1, [#allocation18], %s6605_s13, %s6605_s13, %s6604_s17  }
 0x161   : > { %s5368_s12 = smov [#allocation22]   ;;  %s5369_s20 = smov [#allocation25]  }
 0x162   : > { %s681_s15 = sshll.u32 %s5368_s12, 4  ;;  %s708_s25 = sshll.u32 %s5369_s20, 4  ;;  %s682_s15 = int_to_ptr.vmem [resolvable:$true] %s681_s15  ;;  %s709_s25 = int_to_ptr.vmem [resolvable:$true] %s708_s25 }
 0x163   : > { %s6609_s10 = sld [smem:[#allocation57_spill]] }
 0x169   : > { %s5055_s27 = scalar_lea.hbm %s6609_s10, 16 }
 0x16a   : > { %p5056_p7 = scmp.ne.s32.totalorder %s6609_s10, %s5055_s27  ;;  %p5062_p1 = scmp.lt.u32.totalorder %s5055_s27, %s6609_s10 }
 0x16c   : > { %p5058_p9 = pnand %p5056_p7, %p5550_p8 }
 0x16e   : > { %p5059_p3 = pneg %p5058_p9 }
 0x170   : > { %p5064_p4 = pnand %p5062_p1, %p5059_p3 }
 0x172   : > { %5067 = shalt.err (!%p5064_p4)
}
 0x173   : > { %s5068_s1 = scalar_lea.vmem %s682_s15, 16  ;;  %s5075_s0 = scalar_lea.vmem %s682_s15, 32 }
 0x174   : > { %p5069_p10 = scmp.ne.s32.totalorder %s682_s15, %s5068_s1  ;;  %p5076_p13 = scmp.lt.s32.totalorder %s682_s15, %s682_s15 }
 0x175   : > { %p5077_p0 = scmp.lt.s32.totalorder %s5075_s0, %s5068_s1 }
 0x176   : > { %p5071_p11 = pnand %p5069_p10, %p5550_p8 }
 0x177   : > { %p5078_p2 = por %p5077_p0, %p5076_p13 }
 0x178   : > { %p5072_p12 = pneg %p5071_p11 }
 0x17a   : > { %p5079_p5 = pnand %p5078_p2, %p5072_p12 }
 0x17c   : > { %5082 = shalt.err (!%p5079_p5)
}
 0x17d   : > { %4559 = dma.hbm_to_vmem [thread:$0]  (!%p5534_p6), %s6609_s10, 16, %s682_s15, [#allocation21]  }
 0x17e   : > { %s6610_s14 = sld [smem:[#allocation61_spill]] }
 0x184   : > { %s5083_s27 = scalar_lea.hbm %s6610_s14, 3072 }
 0x185   : > { %p5084_p7 = scmp.ne.s32.totalorder %s6610_s14, %s5083_s27  ;;  %p5090_p1 = scmp.lt.u32.totalorder %s5083_s27, %s6610_s14 }
 0x187   : > { %p5086_p9 = pnand %p5084_p7, %p5550_p8 }
 0x189   : > { %p5087_p3 = pneg %p5086_p9 }
 0x18b   : > { %p5092_p4 = pnand %p5090_p1, %p5087_p3 }
 0x18d   : > { %5095 = shalt.err (!%p5092_p4)
}
 0x18e   : > { %s5096_s1 = scalar_lea.vmem %s709_s25, 3072  ;;  %p5104_p13 = scmp.lt.s32.totalorder %s709_s25, %s709_s25 }
 0x18f   : > { %p5097_p10 = scmp.ne.s32.totalorder %s709_s25, %s5096_s1  ;;  %p5105_p0 = scmp.lt.s32.totalorder %s5096_s1, %s5096_s1 }
 0x191   : > { %p5099_p11 = pnand %p5097_p10, %p5550_p8  ;;  %p5106_p2 = por %p5105_p0, %p5104_p13 }
 0x193   : > { %p5100_p12 = pneg %p5099_p11 }
 0x195   : > { %p5107_p5 = pnand %p5106_p2, %p5100_p12 }
 0x197   : > { %5110 = shalt.err (!%p5107_p5)
}
 0x198   : > { %4565 = dma.hbm_to_vmem [thread:$0]  (!%p5534_p6), %s6610_s14, 3072, %s709_s25, [#allocation24], %s6605_s13, %s6605_s13, %s6604_s17  }
 0x199   : > { %s5370_s12 = smov [#allocation28]   ;;  %s6611_s16 = sld [smem:[#allocation63_spill]] }
 0x19a   : > { %s734_s20 = sshll.u32 %s5370_s12, 4  ;;  %s735_s20 = int_to_ptr.vmem [resolvable:$true] %s734_s20 }
 0x19f   : > { %s5111_s27 = scalar_lea.hbm %s6611_s16, 96 }
 0x1a0   : > { %p5112_p7 = scmp.ne.s32.totalorder %s6611_s16, %s5111_s27  ;;  %p5118_p1 = scmp.lt.u32.totalorder %s5111_s27, %s6611_s16 }
 0x1a2   : > { %p5114_p9 = pnand %p5112_p7, %p5550_p8 }
 0x1a4   : > { %p5115_p3 = pneg %p5114_p9 }
 0x1a6   : > { %p5120_p4 = pnand %p5118_p1, %p5115_p3 }
 0x1a8   : > { %5123 = shalt.err (!%p5120_p4)
}
 0x1a9   : > { %s5124_s17 = scalar_lea.vmem %s735_s20, 96  ;;  %p5132_p13 = scmp.lt.s32.totalorder %s735_s20, %s735_s20 }
 0x1aa   : > { %p5125_p10 = scmp.ne.s32.totalorder %s735_s20, %s5124_s17  ;;  %p5133_p0 = scmp.lt.s32.totalorder %s5124_s17, %s5124_s17 }
 0x1ac   : > { %p5127_p11 = pnand %p5125_p10, %p5550_p8  ;;  %p5134_p2 = por %p5133_p0, %p5132_p13 }
 0x1ae   : > { %p5128_p12 = pneg %p5127_p11 }
 0x1b0   : > { %p5135_p5 = pnand %p5134_p2, %p5128_p12 }
 0x1b2   : > { %5138 = shalt.err (!%p5135_p5)
}
 0x1b3   : > { %4571 = dma.hbm_to_vmem [thread:$0]  (!%p5534_p6), %s6611_s16, 96, %s735_s20, [#allocation27], %s6602_s21, %s6602_s21, %s6601_s2  }
 0x1b4   : > { %s3810_s6 = sadd.s32 4294967294, %s5351_s30   ;;  %s5845_s5 = sadd.s32 1, %s5351_s30  }
 0x1b5   : > { %s54_s1 = ssub.s32 %s5351_s30, %s5845_s5  ;;  %s57_s15 = sadd.s32 1, %s5347_s29 }
 0x1b6   : > { %p55_p8 = scmp.eq.s32.totalorder %s54_s1, 0  ;;  %p64_p7 = scmp.ne.s32.totalorder %s5347_s29, %s5343_s28 }
 0x1b7   : > { %p65_p9 = scmp.eq.s32.totalorder %s5351_s30, 0  ;;  %p70_p3 = scmp.ne.s32.totalorder %s5343_s28, %s5339_s3 }
 0x1b8   : > { %s5856_s0 = scalar_select %p55_p8, %s5347_s29, %s57_s15  }
 0x1b9   : > { %p5858_p1 = por %p65_p9, %p64_p7  ;;  %p6613_p4 = scmp.eq.s32.totalorder %s5520_s23, 0 }
 0x1ba   : > { %p6556_p10 = scmp.eq.s32.totalorder %s5520_s23, 3  ;;  %p478_p11 = scmp.eq.s32.totalorder %s3810_s6, 3 }
 0x1bb   : > { %p5864_p6 = por %p6613_p4, %p70_p3  ;;  %p4597_p12 = scmp.lt.s32.totalorder %s5351_s30, 4 }
 0x1bc   : > { %s754_s21 = sand.u32 1, %s5347_s29   ;;  %p5873_p13 = por %p6556_p10, %p64_p7 }
 0x1bd   : > { %p5877_p0 = por %p478_p11, %p70_p3  ;;  %s3827_s19 = sshll.u32 %s754_s21, 3 }
 0x1be   : > { %s6615_s20 = scalar_select %p5873_p13, 1, 0 }
 0x1bf   : > { %s6616_s11 = scalar_select %p5877_p0, 1, 0 }
 0x1c0   : > { %s3828_s27 = sshll.u32 %s5351_s30, 7  ;;  %s6617_s26 = sld [smem:[#allocation47_spill]] }
 0x1c1   : > { %s758_s17 = scalar_lea.vmem [#allocation5], %s3827_s19  ;;  %p5891_p2 = pnand %p4597_p12, %p5858_p1 }
 0x1c2   : > { %s765_s13 = sshll.u32 %s758_s17, 4  ;;  %s755_s6 = scalar_lea.sflag [#allocation6], %s754_s21  ;;  %s5887_s13 = int_to_ptr.vmem [resolvable:$true] %s765_s13 }
 0x1c3   : > { %p5141_p8 = pneg %p5891_p2 }
 0x1c6   : > { %s5885_s18 = scalar_lea.hbm %s6617_s26, %s3828_s27  ;;  %s5144_s27 = scalar_lea.hbm %s6617_s26, 512 }
 0x1c7   : > { %s5139_s1 = scalar_lea.hbm %s5885_s18, 128  ;;  %p5145_p3 = scmp.lt.u32.totalorder %s5885_s18, %s6617_s26 }
 0x1c8   : > { %p5140_p5 = scmp.ne.s32.totalorder %s5885_s18, %s5139_s1  ;;  %p5146_p1 = scmp.lt.u32.totalorder %s5144_s27, %s5139_s1 }
 0x1c9   : > { %p5148_p11 = scmp.lt.u32.totalorder %s5139_s1, %s5885_s18 }
 0x1ca   : > { %p5142_p7 = pnand %p5141_p8, %p5140_p5  ;;  %p5147_p4 = por %p5146_p1, %p5145_p3 }
 0x1cc   : > { %p5143_p9 = pneg %p5142_p7  ;;  %p5149_p12 = por %p5148_p11, %p5147_p4 }
 0x1ce   : > { %p5150_p10 = pnand %p5149_p12, %p5143_p9 }
 0x1d0   : > { %5153 = shalt.err (!%p5150_p10)
}
 0x1d1   : > { %s5154_s21 = scalar_lea.vmem %s5887_s13, 128  ;;  %s5371_s9 = smov [#allocation5]  }
 0x1d2   : > { %p5155_p5 = scmp.ne.s32.totalorder %s5887_s13, %s5154_s21  ;;  %s5159_s17 = sshll.u32 %s5371_s9, 4  ;;  %s5160_s17 = int_to_ptr.vmem [resolvable:$false] %s5159_s17 }
 0x1d3   : > { %s5161_s15 = scalar_lea.vmem %s5160_s17, 256  ;;  %p5162_p13 = scmp.lt.s32.totalorder %s5887_s13, %s5160_s17 }
 0x1d4   : > { %p5157_p7 = pnand %p5155_p5, %p5141_p8  ;;  %p5163_p3 = scmp.lt.s32.totalorder %s5161_s15, %s5154_s21 }
 0x1d6   : > { %p5158_p0 = pneg %p5157_p7  ;;  %p5164_p1 = por %p5163_p3, %p5162_p13 }
 0x1d8   : > { %p5165_p4 = pnand %p5164_p1, %p5158_p0 }
 0x1da   : > { %5168 = shalt.err (!%p5165_p4)
}
 0x1db   : > { %4575 = dma.hbm_to_vmem [thread:$0]  (!%p5891_p2), %s5885_s18, 128, %s5887_s13, %s755_s6  }
 0x1dc   : > { %s6619_s1 = sld [smem:[#allocation46_spill]] }
 0x1e2   : > { %p6620_p10 = scmp.ne.s32.totalorder %s6619_s1, 0 }
 0x1e3   : > { %s5923_s19 = sand.u32 (!%p6620_p10), 1, %s5343_s28  }
 0x1e4   : > { %774 = sbr.rel (%p6620_p10) target bundleno = 3573 (0xdf5), region = 96  ;;  %s5926_s27 = sshll.u32 (!%p6620_p10), %s5923_s19, 3 }
 0x1e5   : > { %s777_s12 = scalar_lea.sflag (!%p6620_p10), [#allocation6], %s5923_s19  ;;  %s780_s7 = scalar_lea.vmem (!%p6620_p10), [#allocation5], %s5926_s27 }
 0x1eb   : > { %5294 = dma.done.wait (%p5864_p6), %s777_s12, 128  }
 0x1ec   : > { %5296 = vsyncadd (%p5864_p6), %s777_s12, 4294967168  ;;  %p6621_p13 = scmp.eq.s32.totalorder %s5520_s23, 0 }
 0x1ee   : > { %5298 = dma.done.wait (%p6621_p13), [#allocation9], 384   ;;  %p6622_p0 = pmov %p6621_p13 }
 0x1f0   : > { %5300 = vsyncadd (%p6622_p0), [#allocation9], 4294966912  ;;  %p6623_p2 = pmov %p6622_p0 }
 0x1f1   : > { %p6624_p8 = pmov %p6622_p0 }
 0x1f2   : > { %5302 = dma.done.wait (%p6623_p2), [#allocation12], 2560  }
 0x1f3   : > { %5304 = vsyncadd (%p6624_p8), [#allocation12], 4294964736  ;;  %p6625_p9 = pmov %p6622_p0 }
 0x1f4   : > { %p6626_p11 = pmov %p6622_p0 }
 0x1f5   : > { %5306 = dma.done.wait (%p6625_p9), [#allocation15], 1584  }
 0x1f6   : > { %5308 = vsyncadd (%p6626_p11), [#allocation15], 4294965712  ;;  %p6627_p6 = pmov %p6622_p0 }
 0x1f7   : > { %p6628_p12 = pmov %p6622_p0 }
 0x1f8   : > { %5310 = dma.done.wait (%p6627_p6), [#allocation18], 560  }
 0x1f9   : > { %5312 = vsyncadd (%p6628_p12), [#allocation18], 4294966736  ;;  %p6629_p5 = pmov %p6622_p0 }
 0x1fa   : > { %p6630_p7 = pmov %p6622_p0 }
 0x1fb   : > { %5314 = dma.done.wait (%p6629_p5), [#allocation21], 528  }
 0x1fc   : > { %5316 = vsyncadd (%p6630_p7), [#allocation21], 4294966768  ;;  %p6631_p3 = pmov %p6622_p0 }
 0x1fd   : > { %p6632_p1 = pmov %p6622_p0 }
 0x1fe   : > { %5318 = dma.done.wait (%p6631_p3), [#allocation24], 3088  }
 0x1ff   : > { %5320 = vsyncadd (%p6632_p1), [#allocation24], 4294964208  ;;  %p6633_p4 = pmov %p6622_p0 }
 0x200   : > { %p6634_p10 = pmov %p6622_p0 }
 0x201   : > { %5322 = dma.done.wait (%p6633_p4), [#allocation27], 192  }
 0x202   : > { %5324 = vsyncadd (%p6634_p10), [#allocation27], 4294967104  ;;  %s6559_s2 = scalar_lea.vmem [#allocation29], %s5926_s27  ;;  %s6558_s18 = scalar_lea.vmem [#allocation33], %s5926_s27 }
 0x203   : > { %p6635_p13 = scmp.ne.s32.totalorder %s5520_s23, 0 }
 0x204   : > { %v921_v0 = vld [vmem:[#allocation19] sm:$0xff] (!%p6635_p13)  ;;  %v922_v1 = vld [vmem:[#allocation19 + $0x8] sm:$0xff] (!%p6635_p13)  ;;  %v923_v2 = vld [vmem:[#allocation19 + $0x10] sm:$0xff] (!%p6635_p13)  ;;  %vm907_vm0 = vcmask (!%p6635_p13), 261120  }
 0x205   : > { %905 = sbr.rel (%p6635_p13) target bundleno = 745 (0x2e9), region = 160  ;;  %v4315_v3 = vpack.c.bf16 (!%p6635_p13), %v922_v1, %v921_v0  ;;  %v924_v4 = vld [vmem:[#allocation19 + $0x18] sm:$0xff] (!%p6635_p13)  ;;  %v906_v5 = vld [vmem:[#allocation8] sm:$0xff] (!%p6635_p13)  ;;  %v909_v6 = vld [vmem:[#allocation10] sm:$0xff] (!%p6635_p13) }
 0x206   : > { %v4319_v7 = vpack.c.bf16 (!%p6635_p13), %v924_v4, %v923_v2  ;;  %908 = vst.msk [vmem:[#allocation2] sm:$0xff] (!%p6635_p13), %vm907_vm0, %v906_v5  ;;  %v910_v8 = vld [vmem:[#allocation10 + $0x8] sm:$0xff] (!%p6635_p13)  ;;  %911 = vst.msk [vmem:[#allocation3] sm:$0xff] (!%p6635_p13), %vm907_vm0, %v909_v6  ;;  %v913_v9 = vld [vmem:[#allocation11] sm:$0xff] (!%p6635_p13) }
 0x207   : > { %4316 = vmatprep.subr.bf16.mxu0 (!%p6635_p13), %v4315_v3  ;;  %4455 = vmatprep.subr.bf16.mxu1 (!%p6635_p13), %v4315_v3  ;;  %912 = vst.msk [vmem:[#allocation3 + $0x8] sm:$0xff] (!%p6635_p13), %vm907_vm0, %v910_v8  ;;  %v917_v10 = vld [vmem:[#allocation11 + $0x20] sm:$0xff] (!%p6635_p13)  ;;  %v914_v11 = vld [vmem:[#allocation11 + $0x8] sm:$0xff] (!%p6635_p13)  ;;  %v915_v13 = vld [vmem:[#allocation11 + $0x10] sm:$0xff] (!%p6635_p13) }
 0x208   : > { %4318 = vmatpush3.bf16.msra.mxu0 (!%p6635_p13), %v4315_v3  ;;  %4457 = vmatpush3.bf16.msra.mxu1 (!%p6635_p13), %v4315_v3  ;;  %v918_v12 = vld [vmem:[#allocation11 + $0x28] sm:$0xff] (!%p6635_p13)  ;;  %v919_v14 = vld [vmem:[#allocation11 + $0x30] sm:$0xff] (!%p6635_p13)  ;;  %v916_v15 = vld [vmem:[#allocation11 + $0x18] sm:$0xff] (!%p6635_p13) }
 0x209   : > { %4320 = vmatprep.subr.bf16.mxu0 (!%p6635_p13), %v4319_v7  ;;  %4456 = vmatprep.subr.bf16.mxu1 (!%p6635_p13), %v4319_v7  ;;  %v920_v16 = vld [vmem:[#allocation11 + $0x38] sm:$0xff] (!%p6635_p13) }
 0x20a   : > { %4064 = vmatprep.mubr.msk.f32.mxu0 (!%p6635_p13), %vm907_vm0, %v913_v9  ;;  %4070 = vmatprep.mubr.msk.f32.mxu1 (!%p6635_p13), %vm907_vm0, %v917_v10 }
 0x20c   : > { %4322 = vmatpush3.bf16.msra.mxu0 %v4319_v7  ;;  %4458 = vmatpush3.bf16.msra.mxu1 %v4319_v7 }
 0x20f   : > { %4065 = vmatmul.mubr.msk.f32.vlgmr.msra.gmra.mrb[0].mxu0 %vm907_vm0, %v914_v11  ;;  %4071 = vmatmul.mubr.msk.f32.vlgmr.msra.gmra.mrb[0].mxu1 %vm907_vm0, %v918_v12 }
 0x210   : > { %4067 = vmatprep.mubr.msk.f32.mxu0 %vm907_vm0, %v915_v13  ;;  %4073 = vmatprep.mubr.msk.f32.mxu1 %vm907_vm0, %v919_v14 }
 0x213   : > { %4068 = vmatmul.mubr.msk.f32.gmra.mrb[2].mxu0 %vm907_vm0, %v916_v15  ;;  %4074 = vmatmul.mubr.msk.f32.gmra.mrb[2].mxu1 %vm907_vm0, %v920_v16 }
 0x2e2   : > { %v4066_v17 = vpop.f32.mrb[0].mxu0  ;;  %v4072_v18 = vpop.f32.mrb[0].mxu1 }
 0x2e3   : > { %1055 = vst.msk [vmem:[#allocation4 + $0x8] sm:$0xff] %vm907_vm0, %v4066_v17  ;;  %1059 = vst.msk [vmem:[#allocation4 + $0x28] sm:$0xff] %vm907_vm0, %v4072_v18  ;;  %v1015_v19 = vpop.f32.mrb[1].mxu0  ;;  %v1035_v20 = vpop.f32.mrb[1].mxu1 }
 0x2e4   : > { %1054 = vst.msk [vmem:[#allocation4] sm:$0xff] %vm907_vm0, %v1015_v19  ;;  %1058 = vst.msk [vmem:[#allocation4 + $0x20] sm:$0xff] %vm907_vm0, %v1035_v20 }
 0x2e6   : > { %v4069_v21 = vpop.f32.mrb[2].mxu0  ;;  %v4075_v22 = vpop.f32.mrb[2].mxu1 }
 0x2e7   : > { %1057 = vst.msk [vmem:[#allocation4 + $0x18] sm:$0xff] %vm907_vm0, %v4069_v21  ;;  %1061 = vst.msk [vmem:[#allocation4 + $0x38] sm:$0xff] %vm907_vm0, %v4075_v22  ;;  %v1025_v23 = vpop.f32.mrb[3].mxu0  ;;  %v1045_v24 = vpop.f32.mrb[3].mxu1 }
 0x2e8   : > { %1056 = vst.msk [vmem:[#allocation4 + $0x10] sm:$0xff] %vm907_vm0, %v1025_v23  ;;  %1060 = vst.msk [vmem:[#allocation4 + $0x30] sm:$0xff] %vm907_vm0, %v1045_v24 }
 0x2e9 PF: > { %v1064_v25 = vld [vmem:[#allocation13] sm:$0xff]  ;;  %v1065_v26 = vld [vmem:[#allocation13 + $0x8] sm:$0xff]  ;;  %v5372_v28 = vmov 0.0|0.0   ;;  %v1066_v31 = vld [vmem:[#allocation13 + $0x10] sm:$0xff]  ;;  %vm5373_vm1 = vmmov 0   ;;  %v5374_v36 = vmov 0.0  }
 0x2ea   : > { %v1078_v27 = vld [vmem:[#allocation14] sm:$0xff]  ;;  %4323 = vmatprep.subr.bf16.mxu0 %v5372_v28  ;;  %v4324_v29 = vpack.c.bf16 %v1065_v26, %v1064_v25  ;;  %4329 = vmatprep.subr.bf16.mxu1 %v5372_v28  ;;  %v1079_v30 = vld [vmem:[#allocation14 + $0x8] sm:$0xff]  ;;  %v1067_v32 = vld [vmem:[#allocation13 + $0x18] sm:$0xff]  ;;  %vm1108_vm2 = vcmask 261120   ;;  %vm1870_vm3 = vcmask 1041409   ;;  %vm1872_vm4 = vcmask 1042434  }
 0x2eb   : > { %v4330_v33 = vpack.c.bf16 %v1079_v30, %v1078_v27  ;;  %v1080_v34 = vld [vmem:[#allocation14 + $0x10] sm:$0xff]  ;;  %v1081_v35 = vld [vmem:[#allocation14 + $0x18] sm:$0xff]  ;;  %4084 = vmatprep.mubr.msk.f32.mxu0 %vm5373_vm1, %v5374_v36  ;;  %4095 = vmatprep.mubr.msk.f32.mxu1 %vm5373_vm1, %v5374_v36  ;;  %v4327_v37 = vpack.c.bf16 %v1067_v32, %v1066_v31  ;;  %v1069_v39 = vld [vmem:[#allocation13 + $0x20] sm:$0xff]  ;;  %vm1874_vm5 = vcmask 1043459   ;;  %vm1876_vm6 = vcmask 1044484   ;;  %s6636_s6 = sld [smem:[#allocation58_spill]] }
 0x2ec   : > { %4325 = vmatpush3.bf16.msra.mxu0 %v4324_v29  ;;  %v4333_v38 = vpack.c.bf16 %v1081_v35, %v1080_v34  ;;  %v1070_v40 = vld [vmem:[#allocation13 + $0x28] sm:$0xff]  ;;  %v1083_v41 = vld [vmem:[#allocation14 + $0x20] sm:$0xff]  ;;  %v1071_v47 = vld [vmem:[#allocation13 + $0x30] sm:$0xff]  ;;  %vm1878_vm7 = vcmask 1045509   ;;  %vm1880_vm8 = vcmask 1046534   ;;  %vm1882_vm9 = vcmask 1047559  }
 0x2ed   : > { %4331 = vmatpush3.bf16.msra.mxu1 %v4330_v33  ;;  %4326 = vmatprep.subr.bf16.mxu0 %v5372_v28  ;;  %v1084_v42 = vld [vmem:[#allocation14 + $0x28] sm:$0xff]  ;;  %v1062_v43 = vld [vmem:[%s780_s7] sm:$0xff]  ;;  %v4336_v44 = vpack.c.bf16 %v1070_v40, %v1069_v39  ;;  %v1085_v49 = vld [vmem:[#allocation14 + $0x30] sm:$0xff]  ;;  %vm1885_vm10 = vcmask 64512   ;;  %s6637_s13 = sld [smem:[#allocation60_spill]]  ;;  %s5377_s12 = smov 32  }
 0x2ee   : > { %4332 = vmatprep.subr.bf16.mxu1 %v5372_v28  ;;  %v5995_v45 = vld [vmem:[#allocation2] sm:$0xff]  ;;  %v4342_v46 = vpack.c.bf16 %v1084_v42, %v1083_v41  ;;  %v1072_v48 = vld [vmem:[#allocation13 + $0x38] sm:$0xff]  ;;  %v1075_v54 = vld [vmem:[#allocation13 + $0x48] sm:$0xff]  ;;  %vm2258_vm11 = vcmask 523264   ;;  %s6638_s15 = sld [smem:[#allocation64_spill]]  ;;  %s6639_s1 = sld [smem:[#allocation65_spill]] }
 0x2ef   : > { %v1086_v50 = vld [vmem:[#allocation14 + $0x38] sm:$0xff]  ;;  %v4339_v51 = vpack.c.bf16 %v1072_v48, %v1071_v47  ;;  %v1074_v53 = vld [vmem:[#allocation13 + $0x40] sm:$0xff]  ;;  %v1089_v56 = vld [vmem:[#allocation14 + $0x48] sm:$0xff]  ;;  %vm3475_vm12 = vcmask 130048   ;;  %p3924_p0 = scmp.ne.s32.totalorder %s5520_s23, 3 }
 0x2f0   : > { %4328 = vmatpush3.bf16.msra.mxu0 %v4327_v37  ;;  %v4345_v52 = vpack.c.bf16 %v1086_v50, %v1085_v49  ;;  %v1088_v55 = vld [vmem:[#allocation14 + $0x40] sm:$0xff]  ;;  %v4348_v57 = vpack.c.bf16 %v1075_v54, %v1074_v53  ;;  %v1076_v59 = vld [vmem:[#allocation13 + $0x50] sm:$0xff]  ;;  %v1077_v60 = vld [vmem:[#allocation13 + $0x58] sm:$0xff]  ;;  %v1688_v54 = vlaneseq }
 0x2f1   : > { %4334 = vmatpush3.bf16.msra.mxu1 %v4333_v38  ;;  %4335 = vmatprep.subr.bf16.mxu0 %v5372_v28  ;;  %v4354_v58 = vpack.c.bf16 %v1089_v56, %v1088_v55  ;;  %v1090_v61 = vld [vmem:[#allocation14 + $0x50] sm:$0xff]  ;;  %v1091_v62 = vld [vmem:[#allocation14 + $0x58] sm:$0xff]  ;;  %v4351_v63 = vpack.c.bf16 %v1077_v60, %v1076_v59  ;;  %v1598_v1 = vld [vmem:[#allocation20] sm:$0xff] }
 0x2f2   : > { %4341 = vmatprep.subr.bf16.mxu1 %v5372_v28  ;;  %v4357_v0 = vpack.c.bf16 %v1091_v62, %v1090_v61  ;;  %v1599_v2 = vld [vmem:[#allocation20 + $0x8] sm:$0xff]  ;;  %v1600_v4 = vld [vmem:[#allocation20 + $0x10] sm:$0xff]  ;;  %v1601_v5 = vld [vmem:[#allocation20 + $0x18] sm:$0xff] }
 0x2f3   : > { %4085 = vmatmul.mubr.msk.f32.vlgmr.msra.gmra.mrb[0].mxu0 %vm1108_vm2, %v1062_v43  ;;  %v4360_v3 = vpack.c.bf16 %v1599_v2, %v1598_v1  ;;  %v4363_v6 = vpack.c.bf16 %v1601_v5, %v1600_v4  ;;  %v3856_v7 = vld [vmem:[#allocation16] ss:$0 sm:$0xff]  ;;  %v3859_v12 = vld [vmem:[#allocation17] ss:$0 sm:$0xff]  ;;  %v3861_v16 = vld [vmem:[#allocation16 + $0x1] ss:$0 sm:$0xff] }
 0x2f4   : > { %4096 = vmatmul.mubr.msk.f32.vlgmr.msra.gmra.mrb[0].mxu1 %vm1108_vm2, %v5995_v45  ;;  %4337 = vmatpush3.bf16.msra.mxu0 %v4336_v44  ;;  %v3864_v22 = vld [vmem:[#allocation17 + $0x1] ss:$0 sm:$0xff]  ;;  %v3868_v34 = vld [vmem:[#allocation17 + $0x2] ss:$0 sm:$0xff]  ;;  %v3866_v38 = vld [vmem:[#allocation16 + $0x2] ss:$0 sm:$0xff] }
 0x2f5   : > { %4343 = vmatpush3.bf16.msra.mxu1 %v4342_v46  ;;  %4338 = vmatprep.subr.bf16.mxu0 %v5372_v28  ;;  %v1675_v1 = vld [vmem:[#allocation4] sm:$0xff] }
 0x2f6   : > { %4344 = vmatprep.subr.bf16.mxu1 %v5372_v28  ;;  %4106 = vmatprep.mubr.msk.f32.mxu0 %vm5373_vm1, %v5374_v36 }
 0x2f7   : > { %4117 = vmatprep.mubr.msk.f32.mxu1 %vm5373_vm1, %v5374_v36 }
 0x2f8   : > { %4340 = vmatpush3.bf16.msra.mxu0 %v4339_v51 }
 0x2f9   : > { %4346 = vmatpush3.bf16.msra.mxu1 %v4345_v52  ;;  %4347 = vmatprep.subr.bf16.mxu0 %v5372_v28  ;;  %v5375_v52 = vmov 1966171168  }
 0x2fa   : > { %4353 = vmatprep.subr.bf16.mxu1 %v5372_v28  ;;  %v1686_v53 = vunpack.c.l.s4 %v5375_v52 }
 0x2fb   : > { %4107 = vmatmul.mubr.msk.f32.vlgmr.msra.gmra.mrb[2].mxu0 %vm1108_vm2, %v1062_v43 }
 0x2fc   : > { %4118 = vmatmul.mubr.msk.f32.vlgmr.msra.gmra.mrb[2].mxu1 %vm1108_vm2, %v5995_v45  ;;  %4349 = vmatpush3.bf16.msra.mxu0 %v4348_v57  ;;  %v1687_v55 = vunpack.c.0.s8 %v1686_v53 }
 0x2fd   : > { %4355 = vmatpush3.bf16.msra.mxu1 %v4354_v58  ;;  %4350 = vmatprep.subr.bf16.mxu0 %v5372_v28 }
 0x2fe   : > { %4356 = vmatprep.subr.bf16.mxu1 %v5372_v28  ;;  %4139 = vmatprep.mubr.msk.f32.mxu1 %vm5373_vm1, %v5374_v36 }
 0x2ff   : > { %4128 = vmatprep.mubr.msk.f32.mxu0 %vm5373_vm1, %v5374_v36 }
 0x300   : > { %4352 = vmatpush3.bf16.msra.mxu0 %v4351_v63 }
 0x301   : > { %4358 = vmatpush3.bf16.msra.mxu1 %v4357_v0  ;;  %4359 = vmatprep.subr.bf16.mxu0 %v5372_v28 }
 0x302   : > { %4365 = vmatprep.subr.bf16.mxu1 %v5372_v28 }
 0x303   : > { %4129 = vmatmul.mubr.msk.f32.vlgmr.msra.gmra.mrb[4].mxu0 %vm1108_vm2, %v1062_v43 }
 0x304   : > { %4140 = vmatmul.mubr.msk.f32.vlgmr.msra.gmra.mrb[4].mxu1 %vm1108_vm2, %v5995_v45  ;;  %4150 = vmatprep.mubr.msk.f32.mxu0 %vm5373_vm1, %v5374_v36 }
 0x305   : > { %4169 = vmatprep.mubr.msk.f32.mxu1 %vm5373_vm1, %v5374_v36  ;;  %4361 = vmatpush3.bf16.msra.mxu0 %v4360_v3 }
 0x306   : > { %4362 = vmatprep.subr.bf16.mxu0 %v5372_v28 }
 0x309   : > { %4364 = vmatpush3.bf16.msra.mxu0 %v4363_v6 }
 0x30a   : > { %4377 = vmatprep.subr.bf16.mxu0 %v5372_v28 }
 0x3c6   : > { %v1178_v8 = vpop.f32.mrb[0].mxu0 }
 0x3c7   : > { %v1179_v9 = vadd.f32 %v3856_v7, %v1178_v8  ;;  %v4086_v10 = vpop.f32.mrb[1].mxu0  ;;  %v1251_v11 = vpop.f32.mrb[0].mxu1  ;;  %v1676_v7 = vld [vmem:[#allocation4 + $0x8] sm:$0xff]  ;;  %v1677_v8 = vld [vmem:[#allocation4 + $0x10] sm:$0xff] }
 0x3c8   : > { %v4097_v13 = vpop.f32.mrb[1].mxu1 }
 0x3c9   : > { %v1255_v14 = vadd.f32 %v1251_v11, %v1179_v9  ;;  %v1678_v13 = vld [vmem:[#allocation4 + $0x18] sm:$0xff] }
 0x3cb   : > { %v1262_v15 = vadd.f32 %v3859_v12, %v1255_v14  ;;  %v1679_v14 = vld [vmem:[#allocation4 + $0x20] sm:$0xff] }
 0x3cd   : > { %v3860_v17 = vmul.f32 -1.442695, %v1262_v15 }
 0x3ce   : > { %v1341_v18 = vpop.f32.mrb[2].mxu0 }
 0x3cf   : > { %4679 = vpow2.f32 %v3860_v17  ;;  %v1342_v19 = vadd.f32 %v3861_v16, %v1341_v18  ;;  %v4108_v20 = vpop.f32.mrb[3].mxu0  ;;  %v1411_v21 = vpop.f32.mrb[2].mxu1 }
 0x3d0   : > { %v4119_v23 = vpop.f32.mrb[3].mxu1 }
 0x3d1   : > { %v1415_v24 = vadd.f32 %v1411_v21, %v1342_v19  ;;  %v1680_v21 = vld [vmem:[#allocation4 + $0x28] sm:$0xff] }
 0x3d3   : > { %v1422_v25 = vadd.f32 %v3864_v22, %v1415_v24 }
 0x3d5   : > { %v3865_v26 = vmul.f32 -1.442695, %v1422_v25  ;;  %v1681_v25 = vld [vmem:[#allocation4 + $0x30] sm:$0xff] }
 0x3d6   : > { %v1501_v27 = vpop.f32.mrb[4].mxu0 }
 0x3d7   : > { %4681 = vpow2.f32 %v3865_v26  ;;  %v1577_v29 = vpop.f32.mrb[4].mxu1  ;;  %v4130_v30 = vpop.f32.mrb[5].mxu0  ;;  %v1502_v40 = vadd.f32 %v3866_v38, %v1501_v27 }
 0x3d8   : > { %v4141_v31 = vpop.f32.mrb[5].mxu1  ;;  %v1578_v39 = vadd.f32 %v3868_v34, %v1577_v29  ;;  %v3871_v34 = vld [vmem:[#allocation22] ss:$0 sm:$0xff] }
 0x3d9   : > { %v4680_v32 = vpop.eup %4679  ;;  %v1682_v31 = vld [vmem:[#allocation4 + $0x38] sm:$0xff] }
 0x3da   : > { %v1266_v33 = vadd.f32 1.0, %v4680_v32 }
 0x3dc   : > { %4683 = vrcp.f32 %v1266_v33 }
 0x3e1   : > { %v4682_v35 = vpop.eup %4681 }
 0x3e2   : > { %v1426_v37 = vadd.f32 1.0, %v4682_v35 }
 0x3e4   : > { %4685 = vrcp.f32 %v1426_v37 }
 0x3e6   : > { %v4684_v41 = vpop.eup %4683 }
 0x3e7   : > { %v1581_v42 = vmul.f32 %v4684_v41, %v1578_v39 }
 0x3e9   : > { %v1582_v43 = vadd.f32 %v1581_v42, %v1502_v40 }
 0x3eb   : > { %4687 = vtanh.f32 %v1582_v43 }
 0x3ee   : > { %v4686_v44 = vpop.eup %4685 }
 0x3ef   : > { %v1584_v46 = vsub.f32 1.0, %v4686_v44  ;;  %v1586_v49 = vmul.f32 %v4686_v44, %v5995_v45  ;;  %v6042_v45 = vshrl.u32 %v1688_v54, 7 }
 0x3f1   : > { %v1690_v56 = vsub.s32 %v1687_v55, %v6042_v45  ;;  %v6046_v61 = vsub.s32 0, %v6042_v45 }
 0x3f5   : > { %v4688_v47 = vpop.eup %4687 }
 0x3f6   : > { %v1585_v48 = vmul.f32 %v4688_v47, %v1584_v46 }
 0x3f8   : > { %v6031_v50 = vadd.f32 %v1586_v49, %v1585_v48 }
 0x3fa   : > { %1588 = vst.msk [vmem:[#allocation2] sm:$0xff] %vm1108_vm2, %v6031_v50  ;;  %v1589_v51 = vmax.f32 %v6031_v50, 0.0  ;;  %v3879_v50 = vld [vmem:[%s6637_s13 + $0x48] sm:$0xff] }
 0x3fc   : > { %4151 = vmatmul.mubr.msk.f32.vlgmr.msra.gmra.mrb[6].mxu0 %vm1108_vm2, %v1589_v51 }
 0x3fd   : > { %4180 = vmatprep.mubr.msk.f32.mxu0 %vm5373_vm1, %v5374_v36 }
 0x4cf   : > { %v1671_v57 = vpop.f32.mrb[6].mxu0 }
 0x4d0   : > { %v1684_v58 = vcombine.high %v1671_v57, %v1671_v57  ;;  %v1691_v59 = vrot.slane %v1671_v57, %v1690_v56  ;;  %v4152_v60 = vpop.f32.mrb[7].mxu0 }
 0x4d2   : > { %v1698_v62 = vrot.slane %v1684_v58, %v1690_v56  ;;  %v1699_v63 = vcombine.high %v1691_v59, %v1691_v59  ;;  %v1707_v0 = vrot.slane %v1691_v59, %v1690_v56 }
 0x4d4   : > { %v1700_v2 = vcombine.high %v1698_v62, %v1698_v62  ;;  %v1714_v3 = vrot.slane %v1698_v62, %v1690_v56  ;;  %v1721_v4 = vrot.slane %v1699_v63, %v1690_v56  ;;  %v1729_v5 = vcombine.high %v1707_v0, %v1707_v0 }
 0x4d5   : > { %v1736_v6 = vrot.slane %v1707_v0, %v6046_v61 }
 0x4d6   : > { %v1728_v9 = vrot.slane %v1700_v2, %v1690_v56  ;;  %v1730_v10 = vcombine.high %v1714_v3, %v1714_v3  ;;  %v1731_v11 = vcombine.high %v1721_v4, %v1721_v4  ;;  %v1740_v12 = vrot.slane %v1721_v4, %v6046_v61 }
 0x4d7   : > { %v1744_v15 = vrot.slane %v1729_v5, %v6046_v61  ;;  %v1752_v16 = vrot.slane %v1714_v3, %v6046_v61  ;;  %v1773_v17 = vadd.f32 %v1736_v6, %v1675_v1  ;;  %v1837_v1 = vand.u32 127, %v1688_v54 }
 0x4d8   : > { %v1732_v18 = vcombine.high %v1728_v9, %v1728_v9  ;;  %v1748_v19 = vrot.slane %v1731_v11, %v6046_v61  ;;  %v1756_v20 = vrot.slane %v1728_v9, %v6046_v61  ;;  %v1760_v22 = vrot.slane %v1730_v10, %v6046_v61 }
 0x4d9   : > { %v1774_v23 = vadd.f32 %v1740_v12, %v1676_v7  ;;  %v1775_v24 = vadd.f32 %v1744_v15, %v1677_v8  ;;  %4689 = vtanh.f32 %v1773_v17  ;;  %v1777_v27 = vadd.f32 %v1752_v16, %v1679_v14 }
 0x4da   : > { %v1776_v26 = vadd.f32 %v1748_v19, %v1678_v13  ;;  %v1764_v29 = vrot.slane %v1732_v18, %v6046_v61  ;;  %v1778_v30 = vadd.f32 %v1756_v20, %v1680_v21  ;;  %v1779_v32 = vadd.f32 %v1760_v22, %v1681_v25 }
 0x4db   : > { %4691 = vtanh.f32 %v1774_v23  ;;  %v6066_v3 = vsub.s32 %v1837_v1, %v6042_v45 }
 0x4dc   : > { %4693 = vtanh.f32 %v1775_v24  ;;  %v1780_v33 = vadd.f32 %v1764_v29, %v1682_v31  ;;  %v1900_v29 = vsub.s32 2, %v6042_v45 }
 0x4dd   : > { %4695 = vtanh.f32 %v1776_v26  ;;  %v5376_v26 = vmov 0  }
 0x4de   : > { %4697 = vtanh.f32 %v1777_v27  ;;  %4678 = vset.pattern.permute.xlu0 %v5376_v26  ;;  %4677 = vset.pattern.permute.xlu1 %v5376_v26  ;;  %v1896_v27 = vsub.s32 1, %v6042_v45 }
 0x4df   : > { %4699 = vtanh.f32 %v1778_v30  ;;  %v1904_v30 = vsub.s32 3, %v6042_v45 }
 0x4e0   : > { %4701 = vtanh.f32 %v1779_v32 }
 0x4e1   : > { %4703 = vtanh.f32 %v1780_v33 }
 0x4e3   : > { %v4690_v35 = vpop.eup %4689 }
 0x4e4   : > { %v1796_v37 = vmul.f32 %v4690_v35, %v3871_v34  ;;  %v1908_v35 = vsub.s32 4, %v6042_v45 }
 0x4e5   : > { %v4692_v38 = vpop.eup %4691 }
 0x4e6   : > { %v4694_v39 = vpop.eup %4693  ;;  %v1804_v40 = vsel %vm1108_vm2, %v1796_v37, 0.0  ;;  %v1797_v41 = vmul.f32 %v4692_v38, %v3871_v34 }
 0x4e7   : > { %v4696_v42 = vpop.eup %4695  ;;  %1805 = vadd.xlane.f32.xlu0 %v1804_v40  ;;  %v1798_v43 = vmul.f32 %v4694_v39, %v3871_v34 }
 0x4e8   : > { %v4698_v44 = vpop.eup %4697  ;;  %v1799_v47 = vmul.f32 %v4696_v42, %v3871_v34  ;;  %v1807_v49 = vsel %vm1108_vm2, %v1797_v41, 0.0 }
 0x4e9   : > { %v1810_v46 = vsel %vm1108_vm2, %v1798_v43, 0.0  ;;  %v4700_v48 = vpop.eup %4699  ;;  %v1800_v52 = vmul.f32 %v4698_v44, %v3871_v34  ;;  %v1912_v43 = vsub.s32 5, %v6042_v45 }
 0x4ea   : > { %1811 = vadd.xlane.f32.xlu1 %v1810_v46  ;;  %v4702_v53 = vpop.eup %4701  ;;  %v1813_v55 = vsel %vm1108_vm2, %v1799_v47, 0.0  ;;  %v1801_v56 = vmul.f32 %v4700_v48, %v3871_v34  ;;  %v1916_v48 = vsub.s32 6, %v6042_v45 }
 0x4eb   : > { %1808 = vadd.xlane.f32.xlu0 %v1807_v49  ;;  %v4704_v57 = vpop.eup %4703  ;;  %v1816_v58 = vsel %vm1108_vm2, %v1800_v52, 0.0  ;;  %v1802_v59 = vmul.f32 %v4702_v53, %v3871_v34 }
 0x4ec   : > { %v1819_v60 = vsel %vm1108_vm2, %v1801_v56, 0.0  ;;  %v1803_v62 = vmul.f32 %v4704_v57, %v3871_v34 }
 0x4ed   : > { %v1822_v63 = vsel %vm1108_vm2, %v1802_v59, 0.0 }
 0x4ee   : > { %1814 = vadd.xlane.f32.xlu1 %v1813_v55  ;;  %v1825_v0 = vsel %vm1108_vm2, %v1803_v62, 0.0  ;;  %v1920_v55 = vsub.s32 7, %v6042_v45  ;;  %v2246_v45 = vld [vmem:[%s6636_s6 + $0x18] sm:$0xff] }
 0x4ef   : > { %1817 = vadd.xlane.f32.xlu0 %v1816_v58 }
 0x4f2   : > { %1820 = vadd.xlane.f32.xlu1 %v1819_v60 }
 0x4f3   : > { %1823 = vadd.xlane.f32.xlu0 %v1822_v63 }
 0x4f6   : > { %1826 = vadd.xlane.f32.xlu1 %v1825_v0 }
 0x574   : > { %v1806_v2 = vpop.xlane.xlu0 %1805 }
 0x575   : > { %v1841_v6 = vrot.slane %v1806_v2, %v6066_v3 }
 0x577   : > { %v1812_v4 = vpop.xlane.xlu1 %1811 }
 0x578   : > { %v1809_v5 = vpop.xlane.xlu0 %1808  ;;  %v1849_v8 = vrot.slane %v1812_v4, %v6066_v3 }
 0x579   : > { %v1845_v7 = vrot.slane %v1809_v5, %v6066_v3 }
 0x57b   : > { %v1871_v9 = vsel %vm1870_vm3, %v1845_v7, %v1841_v6  ;;  %v1815_v10 = vpop.xlane.xlu1 %1814 }
 0x57c   : > { %v1873_v54 = vsel %vm1872_vm4, %v1849_v8, %v1871_v9  ;;  %v1853_v11 = vrot.slane %v1815_v10, %v6066_v3  ;;  %v1818_v12 = vpop.xlane.xlu0 %1817 }
 0x57d   : > { %v1857_v13 = vrot.slane %v1818_v12, %v6066_v3 }
 0x57e   : > { %v1875_v14 = vsel %vm1874_vm5, %v1853_v11, %v1873_v54 }
 0x57f   : > { %v1877_v15 = vsel %vm1876_vm6, %v1857_v13, %v1875_v14  ;;  %v1821_v16 = vpop.xlane.xlu1 %1820 }
 0x580   : > { %v1861_v17 = vrot.slane %v1821_v16, %v6066_v3  ;;  %v1824_v18 = vpop.xlane.xlu0 %1823 }
 0x581   : > { %v1865_v19 = vrot.slane %v1824_v18, %v6066_v3 }
 0x582   : > { %v1879_v20 = vsel %vm1878_vm7, %v1861_v17, %v1877_v15 }
 0x583   : > { %v1827_v21 = vpop.xlane.xlu1 %1826  ;;  %v1881_v22 = vsel %vm1880_vm8, %v1865_v19, %v1879_v20 }
 0x584   : > { %v1869_v23 = vrot.slane %v1827_v21, %v6066_v3 }
 0x586   : > { %v1883_v24 = vsel %vm1882_vm9, %v1869_v23, %v1881_v22 }
 0x587   : > { %v1886_v25 = vsel %vm1885_vm10, %v1883_v24, -inf }
 0x588   : > { %1887 = vmax.xlane.f32.xlu0 %v1886_v25 }
 0x615   : > { %v1888_v31 = vpop.xlane.xlu0 %1887 }
 0x616   : > { %v1893_v32 = vrot.slane %v1888_v31, %v6046_v61  ;;  %v1897_v33 = vrot.slane %v1888_v31, %v1896_v27  ;;  %v1901_v34 = vrot.slane %v1888_v31, %v1900_v29  ;;  %v1905_v37 = vrot.slane %v1888_v31, %v1904_v30 }
 0x617   : > { %v1909_v44 = vrot.slane %v1888_v31, %v1908_v35  ;;  %v1913_v49 = vrot.slane %v1888_v31, %v1912_v43  ;;  %v1917_v56 = vrot.slane %v1888_v31, %v1916_v48  ;;  %v1921_v62 = vrot.slane %v1888_v31, %v1920_v55 }
 0x618   : > { %v1930_v38 = vsub.f32 %v1806_v2, %v1893_v32  ;;  %v1931_v39 = vsub.f32 %v1809_v5, %v1897_v33  ;;  %v1932_v40 = vsub.f32 %v1812_v4, %v1901_v34  ;;  %v1933_v46 = vsub.f32 %v1815_v10, %v1905_v37 }
 0x619   : > { %v1934_v52 = vsub.f32 %v1818_v12, %v1909_v44  ;;  %v1935_v57 = vsub.f32 %v1821_v16, %v1913_v49  ;;  %v1936_v63 = vsub.f32 %v1824_v18, %v1917_v56  ;;  %v1937_v2 = vsub.f32 %v1827_v21, %v1921_v62 }
 0x61a   : > { %v1938_v41 = vmul.f32 1.442695, %v1930_v38  ;;  %v1940_v42 = vmul.f32 1.442695, %v1931_v39  ;;  %v1942_v47 = vmul.f32 1.442695, %v1932_v40 }
 0x61b   : > { %v1944_v53 = vmul.f32 1.442695, %v1933_v46  ;;  %v1946_v58 = vmul.f32 1.442695, %v1934_v52  ;;  %v1948_v0 = vmul.f32 1.442695, %v1935_v57 }
 0x61c   : > { %4705 = vpow2.f32 %v1938_v41  ;;  %v1950_v4 = vmul.f32 1.442695, %v1936_v63  ;;  %v1952_v6 = vmul.f32 1.442695, %v1937_v2  ;;  %v2247_v63 = vld [vmem:[%s6636_s6 + $0x20] sm:$0xff]  ;;  %v2249_v2 = vld [vmem:[%s6636_s6 + $0x30] sm:$0xff] }
 0x61d   : > { %4707 = vpow2.f32 %v1940_v42 }
 0x61e   : > { %4709 = vpow2.f32 %v1942_v47 }
 0x61f   : > { %4711 = vpow2.f32 %v1944_v53 }
 0x620   : > { %4713 = vpow2.f32 %v1946_v58 }
 0x621   : > { %4715 = vpow2.f32 %v1948_v0  ;;  %v2248_v0 = vld [vmem:[%s6636_s6 + $0x28] sm:$0xff] }
 0x622   : > { %4717 = vpow2.f32 %v1950_v4  ;;  %v2250_v4 = vld [vmem:[%s6636_s6 + $0x38] sm:$0xff] }
 0x623   : > { %4719 = vpow2.f32 %v1952_v6 }
 0x626   : > { %v4706_v59 = vpop.eup %4705 }
 0x627   : > { %v4708_v60 = vpop.eup %4707  ;;  %1963 = vperm.xlu1 %4677, %v4706_v59  }
 0x628   : > { %1966 = vperm.xlu0 %4678, %v4708_v60   ;;  %v4710_v1 = vpop.eup %4709 }
 0x629   : > { %v4712_v5 = vpop.eup %4711 }
 0x62a   : > { %v4714_v7 = vpop.eup %4713 }
 0x62b   : > { %1969 = vperm.xlu1 %4677, %v4710_v1   ;;  %v4716_v8 = vpop.eup %4715 }
 0x62c   : > { %v4718_v9 = vpop.eup %4717 }
 0x62d   : > { %v4720_v10 = vpop.eup %4719 }
 0x62f   : > { %1972 = vperm.xlu1 %4677, %v4712_v5  }
 0x633   : > { %1975 = vperm.xlu1 %4677, %v4714_v7  }
 0x637   : > { %1978 = vperm.xlu1 %4677, %v4716_v8  }
 0x63b   : > { %1981 = vperm.xlu1 %4677, %v4718_v9  }
 0x63f   : > { %1984 = vperm.xlu1 %4677, %v4720_v10  }
 0x6a6   : > { %v1964_v54 = vpop.permute.xlu1 %1963 }
 0x6a7   : > { %v1967_v14 = vpop.permute.xlu0 %1966  ;;  %v1989_v17 = vrot.slane %v1964_v54, %v6066_v3  ;;  %v1592_v54 = vld [vmem:[#allocation11 + $0x10] sm:$0xff] }
 0x6a8   : > { %v1993_v16 = vrot.slane %v1967_v14, %v6066_v3 }
 0x6aa   : > { %v1970_v11 = vpop.permute.xlu1 %1969  ;;  %v2018_v22 = vsel %vm1870_vm3, %v1993_v16, %v1989_v17 }
 0x6ab   : > { %v1997_v18 = vrot.slane %v1970_v11, %v6066_v3 }
 0x6ad   : > { %v2019_v24 = vsel %vm1872_vm4, %v1997_v18, %v2018_v22  ;;  %v1594_v22 = vld [vmem:[#allocation11 + $0x20] sm:$0xff] }
 0x6ae   : > { %v1973_v12 = vpop.permute.xlu1 %1972 }
 0x6af   : > { %v2001_v19 = vrot.slane %v1973_v12, %v6066_v3 }
 0x6b1   : > { %v2020_v26 = vsel %vm1874_vm5, %v2001_v19, %v2019_v24 }
 0x6b2   : > { %v1976_v13 = vpop.permute.xlu1 %1975 }
 0x6b3   : > { %v2005_v20 = vrot.slane %v1976_v13, %v6066_v3 }
 0x6b5   : > { %v2021_v31 = vsel %vm1876_vm6, %v2005_v20, %v2020_v26 }
 0x6b6   : > { %v1979_v15 = vpop.permute.xlu1 %1978 }
 0x6b7   : > { %v2009_v23 = vrot.slane %v1979_v15, %v6066_v3  ;;  %v1593_v15 = vld [vmem:[#allocation11 + $0x18] sm:$0xff] }
 0x6b9   : > { %v2022_v33 = vsel %vm1878_vm7, %v2009_v23, %v2021_v31 }
 0x6ba   : > { %v1982_v21 = vpop.permute.xlu1 %1981 }
 0x6bb   : > { %v2013_v25 = vrot.slane %v1982_v21, %v6066_v3 }
 0x6bd   : > { %v2023_v37 = vsel %vm1880_vm8, %v2013_v25, %v2022_v33 }
 0x6be   : > { %v1985_v32 = vpop.permute.xlu1 %1984 }
 0x6bf   : > { %v2017_v34 = vrot.slane %v1985_v32, %v6066_v3 }
 0x6c1   : > { %v2024_v38 = vsel %vm1882_vm9, %v2017_v34, %v2023_v37  ;;  %v1595_v34 = vld [vmem:[#allocation11 + $0x28] sm:$0xff] }
 0x6c2   : > { %v2026_v39 = vsel %vm1885_vm10, %v2024_v38, 0.0 }
 0x6c3   : > { %2027 = vadd.xlane.f32.xlu1 %v2026_v39 }
 0x750   : > { %v2028_v40 = vpop.xlane.xlu1 %2027 }
 0x751   : > { %4721 = vrcp.f32 %v2028_v40 }
 0x75b   : > { %v4722_v41 = vpop.eup %4721 }
 0x75c   : > { %v2034_v42 = vrot.slane %v4722_v41, %v6046_v61  ;;  %v2038_v46 = vrot.slane %v4722_v41, %v1896_v27  ;;  %v2042_v49 = vrot.slane %v4722_v41, %v1900_v29  ;;  %v2046_v53 = vrot.slane %v4722_v41, %v1904_v30 }
 0x75d   : > { %v2050_v57 = vrot.slane %v4722_v41, %v1908_v35  ;;  %v2054_v27 = vrot.slane %v4722_v41, %v1912_v43  ;;  %v2058_v29 = vrot.slane %v4722_v41, %v1916_v48  ;;  %v2062_v30 = vrot.slane %v4722_v41, %v1920_v55  ;;  %v2243_v35 = vld [vmem:[%s6636_s6] sm:$0xff]  ;;  %v2244_v43 = vld [vmem:[%s6636_s6 + $0x8] sm:$0xff]  ;;  %v2245_v48 = vld [vmem:[%s6636_s6 + $0x10] sm:$0xff] }
 0x75e   : > { %v2071_v44 = vmul.f32 %v4706_v59, %v2034_v42  ;;  %v2072_v47 = vmul.f32 %v4708_v60, %v2038_v46  ;;  %v2073_v52 = vmul.f32 %v4710_v1, %v2042_v49  ;;  %v2074_v56 = vmul.f32 %v4712_v5, %v2046_v53 }
 0x75f   : > { %v2075_v61 = vmul.f32 %v4714_v7, %v2050_v57  ;;  %v2076_v58 = vmul.f32 %v4716_v8, %v2054_v27  ;;  %v2077_v59 = vmul.f32 %v4718_v9, %v2058_v29  ;;  %v2078_v60 = vmul.f32 %v4720_v10, %v2062_v30  ;;  %v1591_v7 = vld [vmem:[#allocation11 + $0x8] sm:$0xff]  ;;  %v1590_v8 = vld [vmem:[#allocation11] sm:$0xff] }
 0x760   : > { %2088 = vperm.xlu0 %4678, %v2071_v44   ;;  %v4366_v62 = vpack.c.bf16 %v2244_v43, %v2243_v35  ;;  %v4369_v55 = vpack.c.bf16 %v2246_v45, %v2245_v48  ;;  %v4372_v1 = vpack.c.bf16 %v2248_v0, %v2247_v63  ;;  %v4375_v5 = vpack.c.bf16 %v2250_v4, %v2249_v2 }
 0x762   : > { %4367 = vmatpush3.bf16.msra.mxu1 %v4366_v62 }
 0x763   : > { %4368 = vmatprep.subr.bf16.mxu1 %v5372_v28 }
 0x764   : > { %2091 = vperm.xlu0 %4678, %v2072_v47  }
 0x766   : > { %4370 = vmatpush3.bf16.msra.mxu1 %v4369_v55 }
 0x767   : > { %4371 = vmatprep.subr.bf16.mxu1 %v5372_v28 }
 0x768   : > { %2094 = vperm.xlu0 %4678, %v2073_v52  }
 0x76a   : > { %4373 = vmatpush3.bf16.msra.mxu1 %v4372_v1  ;;  %v1597_v1 = vld [vmem:[#allocation11 + $0x38] sm:$0xff] }
 0x76b   : > { %4374 = vmatprep.subr.bf16.mxu1 %v5372_v28 }
 0x76c   : > { %2097 = vperm.xlu0 %4678, %v2074_v56   ;;  %v1596_v56 = vld [vmem:[#allocation11 + $0x30] sm:$0xff] }
 0x76e   : > { %4376 = vmatpush3.bf16.msra.mxu1 %v4375_v5 }
 0x76f   : > { %4389 = vmatprep.subr.bf16.mxu1 %v5372_v28 }
 0x770   : > { %2100 = vperm.xlu0 %4678, %v2075_v61  }
 0x774   : > { %2103 = vperm.xlu0 %4678, %v2076_v58  }
 0x778   : > { %2106 = vperm.xlu0 %4678, %v2077_v59  }
 0x77c   : > { %2109 = vperm.xlu0 %4678, %v2078_v60  }
 0x7df   : > { %v2089_v6 = vpop.permute.xlu0 %2088 }
 0x7e0   : > { %v2160_v11 = vmul.f32 %v2089_v6, %v1590_v8  ;;  %v2114_v47 = vrot.slane %v2089_v6, %v6066_v3 }
 0x7e2   : > { %v2168_v16 = vsel %vm1108_vm2, %v2160_v11, 0.0 }
 0x7e3   : > { %v2092_v9 = vpop.permute.xlu0 %2091  ;;  %v2169_v21 = vrot.slane %v2168_v16, 4 }
 0x7e4   : > { %v2161_v10 = vmul.f32 %v2092_v9, %v1591_v7  ;;  %v2118_v44 = vrot.slane %v2092_v9, %v6066_v3 }
 0x7e5   : > { %v2170_v33 = vadd.f32 %v2169_v21, %v2168_v16 }
 0x7e6   : > { %v2175_v12 = vsel %vm1108_vm2, %v2161_v10, 0.0  ;;  %v2143_v35 = vsel %vm1870_vm3, %v2118_v44, %v2114_v47 }
 0x7e7   : > { %v2095_v13 = vpop.permute.xlu0 %2094  ;;  %v2176_v17 = vrot.slane %v2175_v12, 4  ;;  %v2171_v49 = vrot.slane %v2170_v33, 2 }
 0x7e8   : > { %v2162_v14 = vmul.f32 %v2095_v13, %v1592_v54  ;;  %v2122_v52 = vrot.slane %v2095_v13, %v6066_v3 }
 0x7e9   : > { %v2177_v23 = vadd.f32 %v2176_v17, %v2175_v12  ;;  %v2172_v45 = vadd.f32 %v2171_v49, %v2170_v33 }
 0x7ea   : > { %v2182_v18 = vsel %vm1108_vm2, %v2162_v14, 0.0  ;;  %v2144_v55 = vsel %vm1872_vm4, %v2122_v52, %v2143_v35 }
 0x7eb   : > { %v2098_v19 = vpop.permute.xlu0 %2097  ;;  %v2183_v24 = vrot.slane %v2182_v18, 4  ;;  %v2178_v37 = vrot.slane %v2177_v23, 2 }
 0x7ec   : > { %v2163_v20 = vmul.f32 %v2098_v19, %v1593_v15  ;;  %v2126_v27 = vrot.slane %v2098_v19, %v6066_v3 }
 0x7ed   : > { %v2184_v38 = vadd.f32 %v2183_v24, %v2182_v18  ;;  %v2179_v57 = vadd.f32 %v2178_v37, %v2177_v23  ;;  %v2173_v18 = vrot.slane %v2172_v45, 1 }
 0x7ee   : > { %v2189_v25 = vsel %vm1108_vm2, %v2163_v20, 0.0  ;;  %v2145_v5 = vsel %vm1874_vm5, %v2126_v27, %v2144_v55  ;;  %v3876_v55 = vld [vmem:[%s6637_s13 + $0x30] sm:$0xff] }
 0x7ef   : > { %v2190_v26 = vrot.slane %v2189_v25, 4  ;;  %v2101_v31 = vpop.permute.xlu0 %2100  ;;  %v2185_v61 = vrot.slane %v2184_v38, 2  ;;  %v2180_v2 = vrot.slane %v2179_v57, 1 }
 0x7f0   : > { %v2164_v32 = vmul.f32 %v2101_v31, %v1594_v22  ;;  %v2130_v59 = vrot.slane %v2101_v31, %v6066_v3  ;;  %v2334_v31 = vld [vmem:[%s6637_s13 + $0x8] sm:$0xff] }
 0x7f1   : > { %v2191_v40 = vadd.f32 %v2190_v26, %v2189_v25  ;;  %v2186_v4 = vadd.f32 %v2185_v61, %v2184_v38  ;;  %v2181_v25 = vadd.f32 %v2180_v2, %v2179_v57  ;;  %v2174_v38 = vadd.f32 %v2173_v18, %v2172_v45  ;;  %v2347_v2 = vld [vmem:[#allocation25] sm:$0xff] }
 0x7f2   : > { %v2196_v39 = vsel %vm1108_vm2, %v2164_v32, 0.0  ;;  %v2146_v8 = vsel %vm1876_vm6, %v2130_v59, %v2145_v5  ;;  %v3878_v5 = vld [vmem:[%s6637_s13 + $0x40] sm:$0xff]  ;;  %v6255_v18 = vld [vmem:[#allocation3] sm:$0xff] }
 0x7f3   : > { %v2197_v41 = vrot.slane %v2196_v39, 4  ;;  %v2104_v42 = vpop.permute.xlu0 %2103  ;;  %v2192_v29 = vrot.slane %v2191_v40, 2  ;;  %v2187_v19 = vrot.slane %v2186_v4, 1  ;;  %v2232_v52 = vsel %vm1870_vm3, %v2181_v25, %v2174_v38  ;;  %v2878_v38 = vld [vmem:[#allocation25 + $0x68] sm:$0xff] }
 0x7f4   : > { %v2165_v46 = vmul.f32 %v2104_v42, %v1595_v34  ;;  %v2134_v48 = vrot.slane %v2104_v42, %v6066_v3 }
 0x7f5   : > { %v2198_v53 = vadd.f32 %v2197_v41, %v2196_v39  ;;  %v2193_v7 = vadd.f32 %v2192_v29, %v2191_v40  ;;  %v2188_v39 = vadd.f32 %v2187_v19, %v2186_v4  ;;  %v2335_v40 = vld [vmem:[%s6637_s13 + $0x10] sm:$0xff]  ;;  %v2336_v41 = vld [vmem:[%s6637_s13 + $0x18] sm:$0xff] }
 0x7f6   : > { %v2203_v58 = vsel %vm1108_vm2, %v2165_v46, 0.0  ;;  %v2147_v12 = vsel %vm1878_vm7, %v2134_v48, %v2146_v8  ;;  %v4381_v47 = vpack.c.bf16 %v2336_v41, %v2335_v40  ;;  %v3875_v48 = vld [vmem:[%s6637_s13 + $0x28] sm:$0xff]  ;;  %v2348_v4 = vld [vmem:[#allocation25 + $0x8] sm:$0xff]  ;;  %v4402_v8 = vpack.c.bf16 %v3879_v50, %v3878_v5 }
 0x7f7   : > { %v2204_v30 = vrot.slane %v2203_v58, 4  ;;  %v2107_v60 = vpop.permute.xlu0 %2106  ;;  %v2199_v43 = vrot.slane %v2198_v53, 2  ;;  %v2194_v22 = vrot.slane %v2193_v7, 1  ;;  %v2233_v61 = vsel %vm1872_vm4, %v2188_v39, %v2232_v52  ;;  %v3898_v39 = vld [vmem:[%s6637_s13 + $0x70] sm:$0xff]  ;;  %v3899_v40 = vld [vmem:[%s6637_s13 + $0x78] sm:$0xff] }
 0x7f8   : > { %v2166_v62 = vmul.f32 %v2107_v60, %v1596_v56  ;;  %v2138_v0 = vrot.slane %v2107_v60, %v6066_v3  ;;  %v2882_v52 = vld [vmem:[#allocation25 + $0x80] sm:$0xff] }
 0x7f9   : > { %v2205_v63 = vadd.f32 %v2204_v30, %v2203_v58  ;;  %v2200_v11 = vadd.f32 %v2199_v43, %v2198_v53  ;;  %v2195_v42 = vadd.f32 %v2194_v22, %v2193_v7  ;;  %v3874_v43 = vld [vmem:[%s6637_s13 + $0x20] sm:$0xff]  ;;  %v4384_v7 = vpack.c.bf16 %v2348_v4, %v2347_v2 }
 0x7fa   : > { %v2210_v6 = vsel %vm1108_vm2, %v2166_v62, 0.0  ;;  %v2148_v16 = vsel %vm1880_vm8, %v2138_v0, %v2147_v12  ;;  %v4390_v62 = vpack.c.bf16 %v3875_v48, %v3874_v43  ;;  %v3880_v12 = vld [vmem:[%s6637_s13 + $0x50] sm:$0xff] }
 0x7fb   : > { %v2206_v9 = vrot.slane %v2205_v63, 2  ;;  %v2211_v10 = vrot.slane %v2210_v6, 4  ;;  %v2110_v54 = vpop.permute.xlu0 %2109  ;;  %v2201_v26 = vrot.slane %v2200_v11, 1  ;;  %v2234_v58 = vsel %vm1874_vm5, %v2195_v42, %v2233_v61  ;;  %v2879_v42 = vld [vmem:[#allocation25 + $0x70] sm:$0xff]  ;;  %v2885_v61 = vld [vmem:[#allocation25 + $0x98] sm:$0xff] }
 0x7fc   : > { %v2142_v13 = vrot.slane %v2110_v54, %v6066_v3  ;;  %v2167_v14 = vmul.f32 %v2110_v54, %v1597_v1  ;;  %v2333_v3 = vld [vmem:[%s6637_s13] sm:$0xff] }
 0x7fd   : > { %v2207_v15 = vadd.f32 %v2206_v9, %v2205_v63  ;;  %v2212_v17 = vadd.f32 %v2211_v10, %v2210_v6  ;;  %v4378_v37 = vpack.c.bf16 %v2334_v31, %v2333_v3  ;;  %v2202_v49 = vadd.f32 %v2201_v26, %v2200_v11  ;;  %v3877_v63 = vld [vmem:[%s6637_s13 + $0x38] sm:$0xff]  ;;  %v2350_v11 = vld [vmem:[#allocation25 + $0x18] sm:$0xff] }
 0x7fe   : > { %v2149_v20 = vsel %vm1882_vm9, %v2142_v13, %v2148_v16  ;;  %v2217_v21 = vsel %vm1108_vm2, %v2167_v14, 0.0  ;;  %v4393_v1 = vpack.c.bf16 %v3877_v63, %v3876_v55  ;;  %v2349_v9 = vld [vmem:[#allocation25 + $0x10] sm:$0xff]  ;;  %v2352_v16 = vld [vmem:[#allocation25 + $0x20] sm:$0xff]  ;;  %v2360_v3 = vld [vmem:[#allocation25 + $0x58] sm:$0xff] }
 0x7ff   : > { %v2213_v23 = vrot.slane %v2212_v17, 2  ;;  %2151 = vst.msk [vmem:[%s6558_s18] sm:$0xff] %vm1885_vm10, %v2149_v20  ;;  %v2218_v24 = vrot.slane %v2217_v21, 4  ;;  %v2208_v32 = vrot.slane %v2207_v15, 1  ;;  %4379 = vmatpush3.bf16.msra.mxu0 %v4378_v37  ;;  %v2235_v29 = vsel %vm1876_vm6, %v2202_v49, %v2234_v58  ;;  %v3881_v13 = vld [vmem:[%s6637_s13 + $0x58] sm:$0xff]  ;;  %v6294_v49 = vld [vmem:[#allocation3 + $0x8] sm:$0xff] }
 0x800   : > { %4380 = vmatprep.subr.bf16.mxu0 %v5372_v28  ;;  %v4387_v14 = vpack.c.bf16 %v2350_v11, %v2349_v9  ;;  %v2354_v20 = vld [vmem:[#allocation25 + $0x30] sm:$0xff]  ;;  %v2887_v58 = vld [vmem:[#allocation25 + $0xa0] sm:$0xff] }
 0x801   : > { %v2214_v33 = vadd.f32 %v2213_v23, %v2212_v17  ;;  %v2219_v34 = vadd.f32 %v2218_v24, %v2217_v21  ;;  %v2209_v53 = vadd.f32 %v2208_v32, %v2207_v15  ;;  %v4405_v15 = vpack.c.bf16 %v3881_v13, %v3880_v12  ;;  %v2353_v17 = vld [vmem:[#allocation25 + $0x28] sm:$0xff]  ;;  %v2355_v21 = vld [vmem:[#allocation25 + $0x38] sm:$0xff]  ;;  %v2357_v23 = vld [vmem:[#allocation25 + $0x40] sm:$0xff] }
 0x802   : > { %v4396_v19 = vpack.c.bf16 %v2353_v17, %v2352_v16  ;;  %v4399_v22 = vpack.c.bf16 %v2355_v21, %v2354_v20  ;;  %v2358_v24 = vld [vmem:[#allocation25 + $0x48] sm:$0xff]  ;;  %v2359_v26 = vld [vmem:[#allocation25 + $0x50] sm:$0xff]  ;;  %v3882_v55 = vld [vmem:[#allocation26] ss:$0 sm:$0xff] }
 0x803   : > { %v2215_v44 = vrot.slane %v2214_v33, 1  ;;  %v2220_v46 = vrot.slane %v2219_v34, 2  ;;  %4382 = vmatpush3.bf16.msra.mxu0 %v4381_v47  ;;  %v2236_v30 = vsel %vm1878_vm7, %v2209_v53, %v2235_v29  ;;  %v4408_v25 = vpack.c.bf16 %v2358_v24, %v2357_v23  ;;  %v3896_v32 = vld [vmem:[%s6637_s13 + $0x60] sm:$0xff]  ;;  %v2883_v53 = vld [vmem:[#allocation25 + $0x88] sm:$0xff]  ;;  %v3890_v9 = vld [vmem:[#allocation28 + $0x1] ss:$0 sm:$0xff] }
 0x804   : > { %4383 = vmatprep.subr.bf16.mxu0 %v5372_v28  ;;  %v4411_v31 = vpack.c.bf16 %v2360_v3, %v2359_v26  ;;  %v2888_v29 = vld [vmem:[#allocation25 + $0xa8] sm:$0xff]  ;;  %v3892_v24 = vld [vmem:[#allocation26 + $0x2] ss:$0 sm:$0xff] }
 0x805   : > { %v2221_v56 = vadd.f32 %v2220_v46, %v2219_v34  ;;  %v2216_v57 = vadd.f32 %v2215_v44, %v2214_v33  ;;  %v3897_v33 = vld [vmem:[%s6637_s13 + $0x68] sm:$0xff]  ;;  %v4417_v46 = vpack.c.bf16 %v3899_v40, %v3898_v39  ;;  %v3894_v20 = vld [vmem:[#allocation28 + $0x2] ss:$0 sm:$0xff]  ;;  %v3900_v40 = vld [vmem:[%s6637_s13 + $0x80] sm:$0xff] }
 0x806   : > { %v2877_v34 = vld [vmem:[#allocation25 + $0x60] sm:$0xff]  ;;  %v4414_v37 = vpack.c.bf16 %v3897_v33, %v3896_v32  ;;  %v2880_v44 = vld [vmem:[#allocation25 + $0x78] sm:$0xff] }
 0x807   : > { %v2222_v27 = vrot.slane %v2221_v56, 1  ;;  %v2237_v60 = vsel %vm1880_vm8, %v2216_v57, %v2236_v30  ;;  %v4420_v41 = vpack.c.bf16 %v2878_v38, %v2877_v34  ;;  %v4423_v47 = vpack.c.bf16 %v2880_v44, %v2879_v42  ;;  %v2884_v57 = vld [vmem:[#allocation25 + $0x90] sm:$0xff] }
 0x808   : > { %v4444_v30 = vpack.c.bf16 %v2888_v29, %v2887_v58 }
 0x809   : > { %v2223_v59 = vadd.f32 %v2222_v27, %v2221_v56  ;;  %v4432_v56 = vpack.c.bf16 %v2883_v53, %v2882_v52  ;;  %v4435_v27 = vpack.c.bf16 %v2885_v61, %v2884_v57  ;;  %v3905_v53 = vld [vmem:[%s6637_s13 + $0xa8] sm:$0xff]  ;;  %v3906_v57 = vld [vmem:[%s6637_s13 + $0xb0] sm:$0xff]  ;;  %v3907_v61 = vld [vmem:[%s6637_s13 + $0xb8] sm:$0xff] }
 0x80b   : > { %v2238_v35 = vsel %vm1882_vm9, %v2223_v59, %v2237_v60  ;;  %v2889_v59 = vld [vmem:[#allocation25 + $0xb0] sm:$0xff]  ;;  %v2890_v60 = vld [vmem:[#allocation25 + $0xb8] sm:$0xff] }
 0x80c   : > { %2239 = vrot.lane.b32.xlu1 %v2238_v35, %s5377_s12  ;;  %v4447_v35 = vpack.c.bf16 %v2890_v60, %v2889_v59 }
 0x87e   : > { %v2240_v45 = vpop.permute.xlu1 %2239 }
 0x87f   : > { %v2242_v0 = vsel %vm1108_vm2, %v1589_v51, %v2240_v45  ;;  %v3872_v51 = vld [vmem:[#allocation23] ss:$0 sm:$0xff] }
 0x880   : > { %4170 = vmatmul.mubr.msk.f32.vlgmr.msra.gmra.mrb[6].mxu1 %vm2258_vm11, %v2242_v0  ;;  %v3885_v0 = vld [vmem:[#allocation28] ss:$0 sm:$0xff] }
 0x881   : > { %4391 = vmatpush3.bf16.msra.mxu1 %v4390_v62  ;;  %4202 = vmatprep.mubr.msk.f32.mxu1 %vm5373_vm1, %v5374_v36 }
 0x882   : > { %4392 = vmatprep.subr.bf16.mxu1 %v5372_v28 }
 0x885   : > { %4394 = vmatpush3.bf16.msra.mxu1 %v4393_v1 }
 0x886   : > { %4401 = vmatprep.subr.bf16.mxu1 %v5372_v28 }
 0x953   : > { %v2328_v6 = vpop.f32.mrb[6].mxu1 }
 0x954   : > { %v6237_v10 = vadd.f32 %v3872_v51, %v2328_v6  ;;  %v4171_v54 = vpop.f32.mrb[7].mxu1  ;;  %v3887_v6 = vld [vmem:[#allocation26 + $0x1] ss:$0 sm:$0xff] }
 0x956   : > { %4181 = vmatmul.mubr.msk.f32.vlgmr.msra.gmra.mrb[8].mxu0 %vm1108_vm2, %v6237_v10  ;;  %4203 = vmatmul.mubr.msk.f32.vlgmr.msra.gmra.mrb[8].mxu1 %vm1108_vm2, %v6237_v10 }
 0x957   : > { %4385 = vmatpush3.bf16.msra.mxu0 %v4384_v7  ;;  %4403 = vmatpush3.bf16.msra.mxu1 %v4402_v8 }
 0x958   : > { %4386 = vmatprep.subr.bf16.mxu0 %v5372_v28  ;;  %4404 = vmatprep.subr.bf16.mxu1 %v5372_v28 }
 0x959   : > { %4191 = vmatprep.mubr.msk.f32.mxu0 %vm5373_vm1, %v5374_v36  ;;  %4224 = vmatprep.mubr.msk.f32.mxu1 %vm5373_vm1, %v5374_v36 }
 0x95b   : > { %4388 = vmatpush3.bf16.msra.mxu0 %v4387_v14  ;;  %4406 = vmatpush3.bf16.msra.mxu1 %v4405_v15 }
 0x95c   : > { %4395 = vmatprep.subr.bf16.mxu0 %v5372_v28  ;;  %4413 = vmatprep.subr.bf16.mxu1 %v5372_v28 }
 0x95e   : > { %4192 = vmatmul.mubr.msk.f32.vlgmr.msra.gmra.mrb[10].mxu0 %vm1108_vm2, %v6255_v18  ;;  %4225 = vmatmul.mubr.msk.f32.vlgmr.msra.gmra.mrb[10].mxu1 %vm1108_vm2, %v6237_v10 }
 0x95f   : > { %4397 = vmatpush3.bf16.msra.mxu0 %v4396_v19  ;;  %4213 = vmatprep.mubr.msk.f32.mxu0 %vm5373_vm1, %v5374_v36 }
 0x960   : > { %4398 = vmatprep.subr.bf16.mxu0 %v5372_v28  ;;  %4246 = vmatprep.mubr.msk.f32.mxu1 %vm5373_vm1, %v5374_v36 }
 0x961   : > { %4415 = vmatpush3.bf16.msra.mxu1 %v4414_v37 }
 0x962   : > { %4416 = vmatprep.subr.bf16.mxu1 %v5372_v28 }
 0x963   : > { %4400 = vmatpush3.bf16.msra.mxu0 %v4399_v22 }
 0x964   : > { %4407 = vmatprep.subr.bf16.mxu0 %v5372_v28 }
 0x965   : > { %4418 = vmatpush3.bf16.msra.mxu1 %v4417_v46 }
 0x966   : > { %4214 = vmatmul.mubr.msk.f32.vlgmr.msra.gmra.mrb[12].mxu0 %vm1108_vm2, %v6255_v18  ;;  %4425 = vmatprep.subr.bf16.mxu1 %v5372_v28 }
 0x967   : > { %4409 = vmatpush3.bf16.msra.mxu0 %v4408_v25  ;;  %4235 = vmatprep.mubr.msk.f32.mxu0 %vm5373_vm1, %v5374_v36 }
 0x968   : > { %4410 = vmatprep.subr.bf16.mxu0 %v5372_v28 }
 0x96b   : > { %4412 = vmatpush3.bf16.msra.mxu0 %v4411_v31 }
 0x96c   : > { %4419 = vmatprep.subr.bf16.mxu0 %v5372_v28 }
 0x96e   : > { %4236 = vmatmul.mubr.msk.f32.vlgmr.msra.gmra.mrb[14].mxu0 %vm1108_vm2, %v6255_v18 }
 0x96f   : > { %4257 = vmatprep.mubr.msk.f32.mxu0 %vm5373_vm1, %v5374_v36  ;;  %4421 = vmatpush3.bf16.msra.mxu0 %v4420_v41  ;;  %v3901_v41 = vld [vmem:[%s6637_s13 + $0x88] sm:$0xff] }
 0x970   : > { %4422 = vmatprep.subr.bf16.mxu0 %v5372_v28  ;;  %v4426_v44 = vpack.c.bf16 %v3901_v41, %v3900_v40  ;;  %v3922_v40 = vld [vmem:[%s6639_s1] ss:$0 sm:$0xff] }
 0x973   : > { %4424 = vmatpush3.bf16.msra.mxu0 %v4423_v47  ;;  %v3903_v47 = vld [vmem:[%s6637_s13 + $0x98] sm:$0xff] }
 0x974   : > { %4431 = vmatprep.subr.bf16.mxu0 %v5372_v28 }
 0x976   : > { %4258 = vmatmul.mubr.msk.f32.vlgmr.msra.gmra.mrb[16].mxu0 %vm1108_vm2, %v6294_v49 }
 0x977   : > { %4433 = vmatpush3.bf16.msra.mxu0 %v4432_v56  ;;  %4279 = vmatprep.mubr.msk.f32.mxu0 %vm5373_vm1, %v5374_v36 }
 0x978   : > { %4434 = vmatprep.subr.bf16.mxu0 %v5372_v28 }
 0x97b   : > { %4436 = vmatpush3.bf16.msra.mxu0 %v4435_v27  ;;  %v4441_v27 = vpack.c.bf16 %v3907_v61, %v3906_v57  ;;  %v3492_v61 = vld [vmem:[#allocation2] sm:$0xff] (!%p3924_p0) }
 0x97c   : > { %4443 = vmatprep.subr.bf16.mxu0 %v5372_v28  ;;  %3493 = vst.msk [vmem:[#allocation30] sm:$0xff] (!%p3924_p0), %vm1108_vm2, %v3492_v61 }
 0x97e   : > { %4280 = vmatmul.mubr.msk.f32.vlgmr.msra.gmra.mrb[18].mxu0 %vm1108_vm2, %v6294_v49 }
 0x97f   : > { %4301 = vmatprep.mubr.msk.f32.mxu0 %vm5373_vm1, %v5374_v36  ;;  %4445 = vmatpush3.bf16.msra.mxu0 %v4444_v30 }
 0x980   : > { %4446 = vmatprep.subr.bf16.mxu0 %v5372_v28 }
 0x983   : > { %4448 = vmatpush3.bf16.msra.mxu0 %v4447_v35 }
 0x986   : > { %4302 = vmatmul.mubr.msk.f32.vlgmr.msra.gmra.mrb[20].mxu0 %vm1108_vm2, %v6294_v49 }
 0xa29   : > { %v2446_v43 = vpop.f32.mrb[8].mxu0  ;;  %v2609_v48 = vpop.f32.mrb[8].mxu1 }
 0xa2a   : > { %v4182_v62 = vpop.f32.mrb[9].mxu0  ;;  %v4204_v45 = vpop.f32.mrb[9].mxu1  ;;  %v2447_v63 = vadd.f32 %v3882_v55, %v2446_v43  ;;  %v2610_v8 = vadd.f32 %v3887_v6, %v2609_v48  ;;  %v3391_v43 = vld [vmem:[%s6638_s15] sm:$0xff]  ;;  %v3392_v48 = vld [vmem:[%s6638_s15 + $0x8] sm:$0xff] }
 0xa2b   : > { %v3393_v62 = vld [vmem:[%s6638_s15 + $0x10] sm:$0xff]  ;;  %v4450_v45 = vpack.c.bf16 %v3392_v48, %v3391_v43 }
 0xa31   : > { %v2519_v1 = vpop.f32.mrb[10].mxu0  ;;  %v2769_v2 = vpop.f32.mrb[10].mxu1 }
 0xa32   : > { %v2523_v4 = vadd.f32 %v2519_v1, %v2447_v63  ;;  %v4193_v5 = vpop.f32.mrb[11].mxu0  ;;  %v4226_v50 = vpop.f32.mrb[11].mxu1  ;;  %v2770_v26 = vadd.f32 %v3892_v24, %v2769_v2  ;;  %v3908_v63 = vld [vmem:[#allocation26 + $0x3] ss:$0 sm:$0xff] }
 0xa34   : > { %v2530_v51 = vadd.f32 %v3885_v0, %v2523_v4  ;;  %v3911_v4 = vld [vmem:[#allocation28 + $0x3] ss:$0 sm:$0xff] }
 0xa36   : > { %v3886_v7 = vmul.f32 -1.442695, %v2530_v51  ;;  %v3913_v51 = vld [vmem:[#allocation26 + $0x4] ss:$0 sm:$0xff] }
 0xa38   : > { %4723 = vpow2.f32 %v3886_v7 }
 0xa39   : > { %v2679_v54 = vpop.f32.mrb[12].mxu0 }
 0xa3a   : > { %v2683_v11 = vadd.f32 %v2679_v54, %v2610_v8  ;;  %v4215_v12 = vpop.f32.mrb[13].mxu0  ;;  %v3916_v54 = vld [vmem:[#allocation28 + $0x4] ss:$0 sm:$0xff] }
 0xa3c   : > { %v2690_v13 = vadd.f32 %v3890_v9, %v2683_v11 }
 0xa3e   : > { %v3891_v14 = vmul.f32 -1.442695, %v2690_v13 }
 0xa40   : > { %4725 = vpow2.f32 %v3891_v14 }
 0xa41   : > { %v2845_v15 = vpop.f32.mrb[14].mxu0 }
 0xa42   : > { %v4724_v16 = vpop.eup %4723  ;;  %v4237_v17 = vpop.f32.mrb[15].mxu0  ;;  %v2846_v23 = vadd.f32 %v3894_v20, %v2845_v15 }
 0xa43   : > { %v2534_v19 = vadd.f32 1.0, %v4724_v16  ;;  %v3920_v17 = vld [vmem:[#allocation28 + $0x5] ss:$0 sm:$0xff] }
 0xa45   : > { %4727 = vrcp.f32 %v2534_v19 }
 0xa49   : > { %v3051_v58 = vpop.f32.mrb[16].mxu0 }
 0xa4a   : > { %v4726_v21 = vpop.eup %4725  ;;  %v4259_v29 = vpop.f32.mrb[17].mxu0 }
 0xa4b   : > { %v2694_v22 = vadd.f32 1.0, %v4726_v21 }
 0xa4d   : > { %4729 = vrcp.f32 %v2694_v22  ;;  %v3918_v22 = vld [vmem:[#allocation26 + $0x5] ss:$0 sm:$0xff] }
 0xa4f   : > { %v4728_v25 = vpop.eup %4727 }
 0xa50   : > { %v2849_v3 = vmul.f32 %v4728_v25, %v2846_v23 }
 0xa51   : > { %v3211_v59 = vpop.f32.mrb[18].mxu0 }
 0xa52   : > { %v2850_v31 = vadd.f32 %v2849_v3, %v2770_v26  ;;  %v4281_v30 = vpop.f32.mrb[19].mxu0 }
 0xa54   : > { %4731 = vtanh.f32 %v2850_v31 }
 0xa57   : > { %v4730_v32 = vpop.eup %4729 }
 0xa58   : > { %v2852_v33 = vsub.f32 1.0, %v4730_v32  ;;  %v2854_v37 = vmul.f32 %v4730_v32, %v6255_v18  ;;  %v3902_v18 = vld [vmem:[%s6637_s13 + $0x90] sm:$0xff] }
 0xa59   : > { %v4429_v52 = vpack.c.bf16 %v3903_v47, %v3902_v18  ;;  %v3377_v60 = vpop.f32.mrb[20].mxu0 }
 0xa5a   : > { %v4303_v35 = vpop.f32.mrb[21].mxu0  ;;  %v3378_v21 = vadd.f32 %v3920_v17, %v3377_v60 }
 0xa5e   : > { %v4732_v34 = vpop.eup %4731 }
 0xa5f   : > { %v2853_v38 = vmul.f32 %v4732_v34, %v2852_v33 }
 0xa61   : > { %v2855_v39 = vadd.f32 %v2854_v37, %v2853_v38 }
 0xa63   : > { %2856 = vst.msk [vmem:[#allocation3] sm:$0xff] %vm1108_vm2, %v2855_v39  ;;  %v2857_v42 = vmax.f32 %v2855_v39, 0.0 }
 0xa65   : > { %v6319_v46 = vadd.f32 %v2857_v42, %v6237_v10  ;;  %v3904_v10 = vld [vmem:[%s6637_s13 + $0xa0] sm:$0xff] }
 0xa66   : > { %v4438_v56 = vpack.c.bf16 %v3905_v53, %v3904_v10 }
 0xa67   : > { %4247 = vmatmul.mubr.msk.f32.vlgmr.msra.gmra.mrb[12].mxu1 %vm1108_vm2, %v6319_v46 }
 0xa68   : > { %4427 = vmatpush3.bf16.msra.mxu1 %v4426_v44  ;;  %4268 = vmatprep.mubr.msk.f32.mxu1 %vm5373_vm1, %v5374_v36 }
 0xa69   : > { %4428 = vmatprep.subr.bf16.mxu1 %v5372_v28 }
 0xa6c   : > { %4430 = vmatpush3.bf16.msra.mxu1 %v4429_v52 }
 0xa6d   : > { %4437 = vmatprep.subr.bf16.mxu1 %v5372_v28 }
 0xa6f   : > { %4269 = vmatmul.mubr.msk.f32.vlgmr.msra.gmra.mrb[14].mxu1 %vm1108_vm2, %v6319_v46 }
 0xa70   : > { %4439 = vmatpush3.bf16.msra.mxu1 %v4438_v56  ;;  %4290 = vmatprep.mubr.msk.f32.mxu1 %vm5373_vm1, %v5374_v36 }
 0xa71   : > { %4440 = vmatprep.subr.bf16.mxu1 %v5372_v28 }
 0xa74   : > { %4442 = vmatpush3.bf16.msra.mxu1 %v4441_v27  ;;  %v3494_v27 = vld [vmem:[#allocation3] sm:$0xff] (!%p3924_p0) }
 0xa75   : > { %4449 = vmatprep.subr.bf16.mxu1 %v5372_v28  ;;  %3496 = vst.msk [vmem:[#allocation32] sm:$0xff] (!%p3924_p0), %vm1108_vm2, %v3494_v27 }
 0xa77   : > { %4291 = vmatmul.mubr.msk.f32.vlgmr.msra.gmra.mrb[16].mxu1 %vm1108_vm2, %v6319_v46 }
 0xa78   : > { %4312 = vmatprep.mubr.msk.f32.mxu1 %vm5373_vm1, %v5374_v36  ;;  %v3394_v36 = vld [vmem:[%s6638_s15 + $0x18] sm:$0xff]  ;;  %4451 = vmatpush3.bf16.msra.mxu1 %v4450_v45 }
 0xa79   : > { %v4453_v55 = vpack.c.bf16 %v3394_v36, %v3393_v62  ;;  %4452 = vmatprep.subr.bf16.mxu1 %v5372_v28 }
 0xa7c   : > { %4454 = vmatpush3.bf16.msra.mxu1 %v4453_v55 }
 0xb3a   : > { %v2978_v0 = vpop.f32.mrb[12].mxu1 }
 0xb3b   : > { %v2979_v1 = vadd.f32 %v3908_v63, %v2978_v0  ;;  %v4248_v2 = vpop.f32.mrb[13].mxu1 }
 0xb3d   : > { %v3055_v5 = vadd.f32 %v3051_v58, %v2979_v1 }
 0xb3f   : > { %v3062_v50 = vadd.f32 %v3911_v4, %v3055_v5 }
 0xb41   : > { %v3912_v6 = vmul.f32 -1.442695, %v3062_v50 }
 0xb42   : > { %v3141_v7 = vpop.f32.mrb[14].mxu1 }
 0xb43   : > { %4733 = vpow2.f32 %v3912_v6  ;;  %v3142_v8 = vadd.f32 %v3913_v51, %v3141_v7  ;;  %v4270_v9 = vpop.f32.mrb[15].mxu1 }
 0xb45   : > { %v3215_v11 = vadd.f32 %v3211_v59, %v3142_v8 }
 0xb47   : > { %v3222_v12 = vadd.f32 %v3916_v54, %v3215_v11 }
 0xb49   : > { %v3917_v13 = vmul.f32 -1.442695, %v3222_v12 }
 0xb4a   : > { %v3301_v14 = vpop.f32.mrb[16].mxu1 }
 0xb4b   : > { %4735 = vpow2.f32 %v3917_v13  ;;  %v4292_v28 = vpop.f32.mrb[17].mxu1  ;;  %v3302_v24 = vadd.f32 %v3918_v22, %v3301_v14 }
 0xb4d   : > { %v4734_v15 = vpop.eup %4733 }
 0xb4e   : > { %v3066_v16 = vadd.f32 1.0, %v4734_v15 }
 0xb50   : > { %4737 = vrcp.f32 %v3066_v16 }
 0xb55   : > { %v4736_v19 = vpop.eup %4735 }
 0xb56   : > { %v3226_v20 = vadd.f32 1.0, %v4736_v19 }
 0xb58   : > { %4739 = vrcp.f32 %v3226_v20 }
 0xb5a   : > { %v4738_v23 = vpop.eup %4737 }
 0xb5b   : > { %v3381_v25 = vmul.f32 %v4738_v23, %v3378_v21 }
 0xb5d   : > { %v3382_v26 = vadd.f32 %v3381_v25, %v3302_v24 }
 0xb5f   : > { %4741 = vtanh.f32 %v3382_v26 }
 0xb62   : > { %v4740_v3 = vpop.eup %4739 }
 0xb63   : > { %v3384_v31 = vsub.f32 1.0, %v4740_v3  ;;  %v3386_v33 = vmul.f32 %v4740_v3, %v6294_v49 }
 0xb69   : > { %v4742_v32 = vpop.eup %4741 }
 0xb6a   : > { %v3385_v34 = vmul.f32 %v4742_v32, %v3384_v31 }
 0xb6c   : > { %v3387_v37 = vadd.f32 %v3386_v33, %v3385_v34 }
 0xb6e   : > { %3388 = vst.msk [vmem:[#allocation3 + $0x8] sm:$0xff] %vm1108_vm2, %v3387_v37  ;;  %v3389_v38 = vmax.f32 %v3387_v37, 0.0 }
 0xb70   : > { %v3390_v39 = vadd.f32 %v3389_v38, %v6319_v46 }
 0xb72   : > { %4313 = vmatmul.mubr.msk.f32.vlgmr.msra.gmra.mrb[18].mxu1 %vm1108_vm2, %v3390_v39 }
 0xb75   : > { %v3495_v58 = vld [vmem:[#allocation3 + $0x8] sm:$0xff] (!%p3924_p0) }
 0xb76   : > { %3497 = vst.msk [vmem:[#allocation32 + $0x8] sm:$0xff] (!%p3924_p0), %vm1108_vm2, %v3495_v58 }
 0xc45   : > { %v3471_v41 = vpop.f32.mrb[18].mxu1 }
 0xc46   : > { %v3472_v42 = vadd.f32 %v3922_v40, %v3471_v41  ;;  %v4314_v44 = vpop.f32.mrb[19].mxu1 }
 0xc48   : > { %v3476_v49 = vsel %vm3475_vm12, %v3472_v42, -inf }
 0xc49   : > { %3477 = vmax.xlane.f32.xlu0 %v3476_v49 }
 0xcd6   : > { %v3478_v18 = vpop.xlane.xlu0 %3477 }
 0xcd7   : > { %v3479_v47 = vsub.f32 %v3472_v42, %v3478_v18 }
 0xcd9   : > { %v3480_v52 = vmul.f32 1.442695, %v3479_v47 }
 0xcdb   : > { %4743 = vpow2.f32 %v3480_v52 }
 0xce5   : > { %v4744_v10 = vpop.eup %4743 }
 0xce6   : > { %v3482_v46 = vsel %vm3475_vm12, %v4744_v10, 0.0 }
 0xce7   : > { %3483 = vadd.xlane.f32.xlu1 %v3482_v46 }
 0xd74   : > { %v3484_v53 = vpop.xlane.xlu1 %3483 }
 0xd75   : > { %4745 = vrcp.f32 %v3484_v53 }
 0xd7c   : > { %3491 = sbr.rel (%p3924_p0) target bundleno = 3459 (0xd83), region = 164 }
 0xd7f   : > { %v4746_v56 = vpop.eup %4745 }
 0xd80   : > { %v3486_v57 = vmul.f32 %v4746_v56, %v4744_v10 }
 0xd82   : > { %3487 = vst.msk [vmem:[%s6559_s2] sm:$0xff] %vm3475_vm12, %v3486_v57 }
 0xd83 PF: > { %s5378_s12 = smov [#allocation30]   ;;  %s6562_s7 = sshll.u32 %s5520_s23, 7 }
 0xd84   : > { %s3528_s18 = sshll.u32 %s5378_s12, 4  ;;  %s6640_s9 = sld [smem:[#allocation66_spill]]  ;;  %s3529_s18 = int_to_ptr.vmem [resolvable:$true] %s3528_s18 }
 0xd85   : > { %s5169_s1 = scalar_lea.vmem %s3529_s18, 128  ;;  %p6641_p8 = scmp.eq.s32.totalorder %s5520_s23, 3 }
 0xd86   : > { %p5170_p2 = scmp.ne.s32.totalorder %s3529_s18, %s5169_s1  ;;  %p5176_p6 = scmp.lt.s32.totalorder %s3529_s18, %s3529_s18 }
 0xd87   : > { %p5177_p12 = scmp.lt.s32.totalorder %s5169_s1, %s5169_s1 }
 0xd88   : > { %p5171_p9 = pnand %p5170_p2, %p6641_p8 }
 0xd89   : > { %p5178_p5 = por %p5177_p12, %p5176_p6 }
 0xd8a   : > { %s6390_s17 = scalar_lea.hbm %s6640_s9, %s6562_s7  ;;  %p5172_p11 = pneg %p5171_p9 }
 0xd8c   : > { %p5179_p7 = pnand %p5178_p5, %p5172_p11 }
 0xd8e   : > { %5182 = shalt.err (!%p5179_p7)
}
 0xd8f   : > { %s6642_s4 = sld [smem:[#allocation67_spill]]  ;;  %p6643_p1 = pmov %p6641_p8 }
 0xd95   : > { %s5183_s6 = scalar_lea.hbm %s6642_s4, 128 }
 0xd96   : > { %p5184_p3 = scmp.ne.s32.totalorder %s6642_s4, %s5183_s6  ;;  %p5189_p13 = scmp.lt.u32.totalorder %s5183_s6, %s6642_s4 }
 0xd98   : > { %p5185_p4 = pnand %p5184_p3, %p6643_p1 }
 0xd9a   : > { %p5186_p10 = pneg %p5185_p4 }
 0xd9c   : > { %p5191_p0 = pnand %p5189_p13, %p5186_p10 }
 0xd9e   : > { %5194 = shalt.err (!%p5191_p0)
}
 0xd9f   : > { %p6644_p2 = pmov %p6643_p1  ;;  %s6645_s8 = scalar_lea.vmem [#allocation29], %s5926_s27 }
 0xda0   : > { %s3517_s10 = sshll.u32 %s6645_s8, 4  ;;  %s5379_s2 = smov [#allocation32]   ;;  %s6412_s10 = int_to_ptr.vmem [resolvable:$true] %s3517_s10 }
 0xda1   : > { %4519 = dma.vmem_to_hbm [thread:$0]  (%p6644_p2), %s3529_s18, 128, %s6642_s4, [#allocation31]  }
 0xda2   : > { %s6414_s6 = sshll.u32 %s5379_s2, 4  ;;  %s3499_s12 = scalar_lea.sflag [#allocation7], %s5923_s19  ;;  %s3539_s6 = int_to_ptr.vmem [resolvable:$true] %s6414_s6 }
 0xda3   : > { %s5195_s25 = scalar_lea.vmem %s6412_s10, 128  ;;  %p6646_p9 = scmp.ne.s32.totalorder %s6615_s20, 0 }
 0xda4   : > { %p5196_p8 = scmp.ne.s32.totalorder %s6412_s10, %s5195_s25  ;;  %s5380_s7 = smov [#allocation29]  }
 0xda5   : > { %s5199_s21 = sshll.u32 %s5380_s7, 4  ;;  %s5200_s21 = int_to_ptr.vmem [resolvable:$false] %s5199_s21 }
 0xda6   : > { %p5197_p11 = pnand %p5196_p8, %p6646_p9  ;;  %s5201_s18 = scalar_lea.vmem %s5200_s21, 256 }
 0xda7   : > { %p5202_p12 = scmp.lt.s32.totalorder %s6412_s10, %s5200_s21  ;;  %p5203_p5 = scmp.lt.s32.totalorder %s5201_s18, %s5195_s25 }
 0xda8   : > { %p5198_p6 = pneg %p5197_p11 }
 0xda9   : > { %p5204_p7 = por %p5203_p5, %p5202_p12 }
 0xdab   : > { %p5205_p3 = pnand %p5204_p7, %p5198_p6 }
 0xdad   : > { %5208 = shalt.err (!%p5205_p3)
}
 0xdae   : > { %s5209_s1 = scalar_lea.hbm %s6390_s17, 128  ;;  %s5213_s7 = scalar_lea.hbm %s6640_s9, 512 }
 0xdaf   : > { %p5210_p1 = scmp.ne.s32.totalorder %s6390_s17, %s5209_s1  ;;  %p5214_p13 = scmp.lt.u32.totalorder %s6390_s17, %s6640_s9 }
 0xdb0   : > { %p5215_p0 = scmp.lt.u32.totalorder %s5213_s7, %s5209_s1  ;;  %p5217_p8 = scmp.lt.u32.totalorder %s5209_s1, %s6390_s17 }
 0xdb1   : > { %p5211_p4 = pnand %p5210_p1, %p6646_p9 }
 0xdb2   : > { %p5216_p2 = por %p5215_p0, %p5214_p13 }
 0xdb3   : > { %p5212_p10 = pneg %p5211_p4 }
 0xdb4   : > { %p5218_p11 = por %p5217_p8, %p5216_p2 }
 0xdb6   : > { %p5219_p6 = pnand %p5218_p11, %p5212_p10 }
 0xdb8   : > { %5222 = shalt.err (!%p5219_p6)
}
 0xdb9   : > { %4517 = dma.vmem_to_hbm [thread:$0]  (%p6646_p9), %s6412_s10, 128, %s6390_s17, %s3499_s12  }
 0xdba   : > { %s5223_s25 = scalar_lea.vmem %s3539_s6, 256  ;;  %p6647_p5 = scmp.eq.s32.totalorder %s5520_s23, 3 }
 0xdbb   : > { %p5224_p12 = scmp.ne.s32.totalorder %s3539_s6, %s5223_s25  ;;  %p5230_p1 = scmp.lt.s32.totalorder %s3539_s6, %s3539_s6 }
 0xdbc   : > { %p5231_p4 = scmp.lt.s32.totalorder %s5223_s25, %s5223_s25 }
 0xdbd   : > { %p5225_p7 = pnand %p5224_p12, %p6647_p5 }
 0xdbe   : > { %p5232_p13 = por %p5231_p4, %p5230_p1 }
 0xdbf   : > { %p5226_p3 = pneg %p5225_p7 }
 0xdc1   : > { %p5233_p0 = pnand %p5232_p13, %p5226_p3 }
 0xdc3   : > { %5236 = shalt.err (!%p5233_p0)
}
 0xdc4   : > { %s6648_s1 = sld [smem:[#allocation68_spill]]  ;;  %p6649_p2 = pmov %p6647_p5 }
 0xdca   : > { %s5237_s8 = scalar_lea.hbm %s6648_s1, 256 }
 0xdcb   : > { %p5238_p10 = scmp.ne.s32.totalorder %s6648_s1, %s5237_s8  ;;  %p5243_p6 = scmp.lt.u32.totalorder %s5237_s8, %s6648_s1 }
 0xdcd   : > { %p5239_p8 = pnand %p5238_p10, %p6649_p2 }
 0xdcf   : > { %p5240_p11 = pneg %p5239_p8 }
 0xdd1   : > { %p5245_p12 = pnand %p5243_p6, %p5240_p11 }
 0xdd3   : > { %5248 = shalt.err (!%p5245_p12)
}
 0xdd4   : > { %s5381_s12 = smov 128   ;;  %s5382_s21 = smov 8  }
 0xdd5   : > { %p6650_p5 = pmov %p6649_p2  ;;  %s6651_s18 = sshll.u32 %s5520_s23, 7 }
 0xdd6   : > { %s6652_s9 = sld [smem:[#allocation69_spill]]  ;;  %s6653_s8 = scalar_lea.vmem [#allocation33], %s5926_s27 }
 0xdd7   : > { %4521 = dma.vmem_to_hbm [thread:$0]  (%p6650_p5), %s3539_s6, 256, %s6648_s1, [#allocation31], %s5381_s12, %s5381_s12, %s5382_s21  }
 0xdd8   : > { %s3554_s10 = sshll.u32 %s6653_s8, 4  ;;  %s3504_s13 = scalar_lea.sflag [#allocation34], %s5923_s19  ;;  %s3555_s10 = int_to_ptr.vmem [resolvable:$true] %s3554_s10 }
 0xdd9   : > { %s5249_s14 = scalar_lea.vmem %s3555_s10, 128  ;;  %s5383_s15 = smov [#allocation33]  }
 0xdda   : > { %p5250_p7 = scmp.ne.s32.totalorder %s3555_s10, %s5249_s14  ;;  %s5253_s16 = sshll.u32 %s5383_s15, 4  ;;  %s5254_s16 = int_to_ptr.vmem [resolvable:$false] %s5253_s16 }
 0xddb   : > { %s5255_s25 = scalar_lea.vmem %s5254_s16, 256  ;;  %p5256_p4 = scmp.lt.s32.totalorder %s3555_s10, %s5254_s16 }
 0xddc   : > { %s6462_s17 = scalar_lea.hbm %s6652_s9, %s6651_s18  ;;  %p5251_p3 = pnand %p5250_p7, %p6646_p9 }
 0xddd   : > { %p5257_p13 = scmp.lt.s32.totalorder %s5255_s25, %s5249_s14 }
 0xdde   : > { %p5252_p1 = pneg %p5251_p3 }
 0xddf   : > { %p5258_p0 = por %p5257_p13, %p5256_p4 }
 0xde1   : > { %p5259_p10 = pnand %p5258_p0, %p5252_p1 }
 0xde3   : > { %5262 = shalt.err (!%p5259_p10)
}
 0xde4   : > { %s5263_s19 = scalar_lea.hbm %s6462_s17, 128  ;;  %s5267_s15 = scalar_lea.hbm %s6652_s9, 512 }
 0xde5   : > { %p5264_p2 = scmp.ne.s32.totalorder %s6462_s17, %s5263_s19  ;;  %p5268_p6 = scmp.lt.u32.totalorder %s6462_s17, %s6652_s9 }
 0xde6   : > { %p5269_p12 = scmp.lt.u32.totalorder %s5267_s15, %s5263_s19  ;;  %p5271_p7 = scmp.lt.u32.totalorder %s5263_s19, %s6462_s17 }
 0xde7   : > { %p5265_p8 = pnand %p5264_p2, %p6646_p9 }
 0xde8   : > { %p5270_p5 = por %p5269_p12, %p5268_p6 }
 0xde9   : > { %p5266_p11 = pneg %p5265_p8 }
 0xdea   : > { %p5272_p3 = por %p5271_p7, %p5270_p5 }
 0xdec   : > { %p5273_p1 = pnand %p5272_p3, %p5266_p11 }
 0xdee   : > { %5276 = shalt.err (!%p5273_p1)
}
 0xdef   : > { %4522 = dma.vmem_to_hbm [thread:$0]  (%p6646_p9), %s3555_s10, 128, %s6462_s17, %s3504_s13  }
 0xdf0   : > { %p6654_p4 = scmp.eq.s32.totalorder %s5520_s23, 3 }
 0xdf2   : > { %5326 = dma.done.wait (%p6654_p4), [#allocation31], 384   ;;  %p6655_p13 = pmov %p6654_p4 }
 0xdf4   : > { %5328 = vsyncadd (%p6655_p13), [#allocation31], 4294966912 }
 0xdf5 PF: > { %p4616_p0 = scmp.ge.s32.totalorder %s5351_s30, 2  ;;  %s3574_s14 = sand.u32 1, %s5339_s3  }
 0xdf6   : > { %p6656_p10 = scmp.ne.s32.totalorder %s6616_s11, 0  ;;  %s3575_s21 = scalar_lea.sflag [#allocation7], %s3574_s14 }
 0xdf8   : > { %p4577_p2 = pnand %p4616_p0, %p6656_p10 }
 0xdfa   : > { %5330 = dma.done.wait (!%p4577_p2), %s3575_s21, 128  }
 0xdfb   : > { %5332 = vsyncadd (!%p4577_p2), %s3575_s21, 4294967168  ;;  %s3584_s20 = scalar_lea.sflag [#allocation34], %s3574_s14 }
 0xdfc   : > { %5334 = dma.done.wait (!%p4577_p2), %s3584_s20, 128  }
 0xdfd   : > { %5336 = vsyncadd (!%p4577_p2), %s3584_s20, 4294967168  ;;  %p47_p9 = scmp.ge.s32.totalorder %s5845_s5, 6   ;;  %s6657_s3 = smov %s5343_s28 }
 0xdfe   : > { %s6658_s28 = smov %s5347_s29  ;;  %s6659_s29 = smov %s5856_s0 }
 0xdff   : > { %s6660_s30 = smov %s5845_s5  ;;  %49 = sbr.rel (!%p47_p9) target bundleno = 39 (0x27), region = 267 }
 0xe06   :  { %3589 = vsyncpa [#allocation6], 1 }
 0xe07   :  { %3591 = vsyncpa [#allocation6 + $0x1], 1 }
 0xe08   :  { %3592 = vsyncpa [#allocation9], 1 }
 0xe09   :  { %3593 = vsyncpa [#allocation12], 1 }
 0xe0a   :  { %3594 = vsyncpa [#allocation15], 1 }
 0xe0b   :  { %3595 = vsyncpa [#allocation18], 1 }
 0xe0c   :  { %3596 = vsyncpa [#allocation21], 1 }
 0xe0d   :  { %3597 = vsyncpa [#allocation24], 1 }
 0xe0e   :  { %3598 = vsyncpa [#allocation27], 1 }
 0xe0f   :  { %3599 = vsyncpa [#allocation7], 1 }
 0xe10   :  { %3601 = vsyncpa [#allocation7 + $0x1], 1 }
 0xe11   :  { %3602 = vsyncpa [#allocation31], 1 }
 0xe12   :  { %3603 = vsyncpa [#allocation34], 1 }
 0xe13   :  { %3605 = vsyncpa [#allocation34 + $0x1], 1 }

</bundles_post_ra>
